<compile_context>
chip_gen: v6e
topology: v6e:2x2x1
jax: 0.10.0
libtpu: 0.0.40
codegen_flags: <defaults>
</compile_context>

<pallas_src>
import functools

import jax
import jax.numpy as jnp
from jax.experimental import pallas as pl
from jax.experimental.pallas import tpu as pltpu

# ---- problem sizes (TPU-tile friendly; re-derived from inputs in the wrapper) ----
B = 16            # bags (batch)
T = 8             # MIL instances per bag (spectrogram crops)
H, W = 16, 16     # spectrogram spatial size (1 channel after unsqueeze(2))
EEG_L, EEG_C = 128, 8    # raw EEG: length x channels
F_SPEC = 128      # spect_backbone.backbone.num_features
F_EEG = 128       # eeg_backbone.backbone.num_features
ATT_HIDDEN = 2048 # nn.Linear(num_features, 2048) in MIL attention
NUM_CLASSES = 6
OUT_PAD = 128     # lane-dense padded head width; sliced back to NUM_CLASSES in the wrapper

HW = H * W
DE = EEG_L * EEG_C
F_TOTAL = F_EEG + F_SPEC


def _double_mil_kernel(
    xs_ref,            # (bb*T, HW)   bf16  flattened spectrogram instances (this batch tile)
    xe_ref,            # (bb, DE)     bf16  flattened raw EEG (this batch tile)
    wbs_ref, bbs_ref,  # spect backbone encoder: (HW, F_SPEC) bf16, (1, F_SPEC) f32
    wbe_ref, bbe_ref,  # eeg backbone encoder:   (DE, F_EEG)  bf16, (1, F_EEG)  f32
    w1_ref, b1_ref,    # attention Linear 1:     (F_SPEC, ATT) bf16, (1, ATT) f32
    w2_ref, b2_ref,    # attention Linear 2 (transposed): (1, ATT) f32, (1, 1) f32
    wh_ref, bh_ref,    # head_fc1 (lane-padded): (F_TOTAL, OUT_PAD) bf16, (1, OUT_PAD) f32
    out_ref,           # (bb, OUT_PAD) f32
    *, bb, t,
):
    # ---- spect backbone (stand-in for timm CNN): per-instance features, bf16 MXU / f32 acc ----
    feat = jnp.dot(xs_ref[...], wbs_ref[...],
                   preferred_element_type=jnp.float32) + bbs_ref[...]          # (bb*t, F_SPEC) f32

    # ---- MIL self-attention: Linear -> tanh (f32, EUP) -> N=1 logits via VPU mul + lane reduce ----
    hdn = jnp.tanh(jnp.dot(feat.astype(jnp.bfloat16), w1_ref[...],
                           preferred_element_type=jnp.float32) + b1_ref[...])  # (bb*t, ATT) f32
    logits = jnp.sum(hdn * w2_ref[...], axis=-1, keepdims=True) + b2_ref[...]  # (bb*t, 1) f32

    # ---- softmax over the instance axis (torch.softmax(a, dim=1)), f32 ----
    logits_bt = logits.reshape(bb, t, 1)                                       # (bb, t, 1)
    feat_bt = feat.reshape(bb, t, -1)                                          # (bb, t, F_SPEC)
    m = jnp.max(logits_bt, axis=1, keepdims=True)
    e = jnp.exp(logits_bt - m)
    a = e / jnp.sum(e, axis=1, keepdims=True)                                  # (bb, t, 1)

    # ---- attention-weighted pooling: sum_t a[b,t] * x[b,t,:] ----
    pooled_spec = jnp.sum(feat_bt * a, axis=1)                                 # (bb, F_SPEC) f32

    # ---- eeg backbone (stand-in for SpectStackClassifier features) ----
    feat_eeg = jnp.dot(xe_ref[...], wbe_ref[...],
                       preferred_element_type=jnp.float32) + bbe_ref[...]      # (bb, F_EEG) f32

    # ---- head_fc1 on concat([x_eeg, x_spec], dim=1): single fused K=F_TOTAL MXU pass ----
    comb = jnp.concatenate([feat_eeg, pooled_spec], axis=1).astype(jnp.bfloat16)  # (bb, F_TOTAL)
    out_ref[...] = (jnp.dot(comb, wh_ref[...], preferred_element_type=jnp.float32)
                    + bh_ref[...])                                             # (bb, OUT_PAD) f32


def _choose_batch_tile(b, t):
    """Pick (bb, b_pad): bags per grid step and the padded batch size.

    Single grid step when the 8-padded batch fits in a <=bb_cap tile (fills the
    MXU M dimension and avoids per-step overhead on single-TC chips); otherwise
    a capped tile keeps the (bb*t, 2048) f32 tanh intermediate bounded in VMEM.
    """
    rows_target = 256                                    # ~full MXU M per step
    bb_cap = max(8, min(64, (rows_target // max(t, 1)) // 8 * 8))
    b_pad = -(-b // 8) * 8                               # pad bags to a multiple of 8
    if b_pad <= bb_cap:
        return b_pad, b_pad                              # grid = (1,)
    bb = bb_cap
    b_pad = -(-b_pad // bb) * bb                         # pad to a multiple of the tile
    return bb, b_pad


def prepare_params(params, out_pad=OUT_PAD):
    """One-time weight preprocessing (do NOT call per forward): bf16 MXU operands,
    f32 biases, lane-padded head."""
    f_total, n_cls = params["wh"].shape
    wh_pad = jnp.zeros((f_total, out_pad), jnp.float32).at[:, :n_cls].set(params["wh"])
    bh_pad = jnp.zeros((1, out_pad), jnp.float32).at[:, :n_cls].set(params["bh"])
    return dict(
        wbs=params["wbs"].astype(jnp.bfloat16), bbs=params["bbs"],
        wbe=params["wbe"].astype(jnp.bfloat16), bbe=params["bbe"],
        w1=params["w1"].astype(jnp.bfloat16), b1=params["b1"],
        w2=params["w2"], b2=params["b2"],                 # (1, ATT) f32, VPU path
        wh=wh_pad.astype(jnp.bfloat16), bh=bh_pad,
        num_classes=n_cls,
    )


def double_mil_forward(x, prepared):
    """x is a dict like the PyTorch module expects. Shapes derived from inputs."""
    x_spec = x["input_comp_spectrogram"]        # (b, t, h, w); unsqueeze(2) implicit (1 channel)
    x_eeg = x["input_eeg_raw"]                  # (b, L, C)

    b, t, h, w = x_spec.shape
    hw = h * w
    de = x_eeg.shape[1] * x_eeg.shape[2]
    f_spec = prepared["wbs"].shape[1]
    f_eeg = prepared["wbe"].shape[1]
    f_total = f_eeg + f_spec
    att = prepared["w1"].shape[1]
    out_pad = prepared["wh"].shape[1]
    n_cls = prepared["num_classes"]

    bb, b_pad = _choose_batch_tile(b, t)
    grid = (b_pad // bb,)

    # --- activations: flatten + bf16 for the MXU (per-call work only) ---
    xs = x_spec.reshape(b * t, hw).astype(jnp.bfloat16)   # x.view(b*t, c, h, w) flattened
    xe = x_eeg.reshape(b, de).astype(jnp.bfloat16)
    if b_pad != b:
        xs = jnp.pad(xs, ((0, (b_pad - b) * t), (0, 0)))
        xe = jnp.pad(xe, ((0, b_pad - b), (0, 0)))

    kernel = functools.partial(_double_mil_kernel, bb=bb, t=t)

    # Weights get constant index maps -> DMA'd once, VMEM-resident across the grid.
    in_specs = [
        pl.BlockSpec((bb * t, hw), lambda i: (i, 0)),        # xs  (batch-tiled)
        pl.BlockSpec((bb, de), lambda i: (i, 0)),            # xe  (batch-tiled)
        pl.BlockSpec((hw, f_spec), lambda i: (0, 0)),        # wbs
        pl.BlockSpec((1, f_spec), lambda i: (0, 0)),         # bbs
        pl.BlockSpec((de, f_eeg), lambda i: (0, 0)),         # wbe
        pl.BlockSpec((1, f_eeg), lambda i: (0, 0)),          # bbe
        pl.BlockSpec((f_spec, att), lambda i: (0, 0)),       # w1
        pl.BlockSpec((1, att), lambda i: (0, 0)),            # b1
        pl.BlockSpec((1, att), lambda i: (0, 0)),            # w2 (transposed)
        pl.BlockSpec((1, 1), lambda i: (0, 0)),              # b2
        pl.BlockSpec((f_total, out_pad), lambda i: (0, 0)),  # wh (lane-padded)
        pl.BlockSpec((1, out_pad), lambda i: (0, 0)),        # bh (lane-padded)
    ]
    out_specs = pl.BlockSpec((bb, out_pad), lambda i: (i, 0))

    out_padded = pl.pallas_call(
        kernel,
        grid=grid,
        in_specs=in_specs,
        out_specs=out_specs,
        out_shape=jax.ShapeDtypeStruct((b_pad, out_pad), jnp.float32),
        compiler_params=pltpu.CompilerParams(
            dimension_semantics=("parallel",)),   # shards multi-step grids across both TCs on v7x
    )(xs, xe,
      prepared["wbs"], prepared["bbs"], prepared["wbe"], prepared["bbe"],
      prepared["w1"], prepared["b1"], prepared["w2"], prepared["b2"],
      prepared["wh"], prepared["bh"])

    return out_padded[:b, :n_cls]


def init_params(key):
    ks = jax.random.split(key, 10)

    def lin(kw, kb, fan_in, fan_out):
        scale = 1.0 / jnp.sqrt(jnp.float32(fan_in))
        w = jax.random.normal(kw, (fan_in, fan_out), jnp.float32) * scale
        b = jax.random.normal(kb, (1, fan_out), jnp.float32) * scale
        return w, b

    wbs, bbs = lin(ks[0], ks[1], HW, F_SPEC)           # spect backbone encoder
    wbe, bbe = lin(ks[2], ks[3], DE, F_EEG)            # eeg backbone encoder
    w1, b1 = lin(ks[4], ks[5], F_SPEC, ATT_HIDDEN)     # attention Linear(num_features, 2048)
    w2t, b2 = lin(ks[6], ks[7], ATT_HIDDEN, 1)         # attention Linear(2048, 1)
    w2 = w2t.T                                         # stored transposed: (1, ATT_HIDDEN)
    wh, bh = lin(ks[8], ks[9], F_TOTAL, NUM_CLASSES)   # head_fc1
    return dict(wbs=wbs, bbs=bbs, wbe=wbe, bbe=bbe,
                w1=w1, b1=b1, w2=w2, b2=b2, wh=wh, bh=bh)


def reference_forward(x, params):
    """Pure-JAX f32 reference (same math, no bf16)."""
    x_spec = x["input_comp_spectrogram"].astype(jnp.float32)
    x_eeg = x["input_eeg_raw"].astype(jnp.float32)
    b, t, h, w = x_spec.shape
    feat = x_spec.reshape(b * t, h * w) @ params["wbs"] + params["bbs"]
    hdn = jnp.tanh(feat @ params["w1"] + params["b1"])
    logits = (jnp.sum(hdn * params["w2"], axis=-1, keepdims=True)
              + params["b2"]).reshape(b, t, 1)
    a = jax.nn.softmax(logits, axis=1)
    pooled = jnp.sum(feat.reshape(b, t, -1) * a, axis=1)
    feat_eeg = x_eeg.reshape(b, -1) @ params["wbe"] + params["bbe"]
    return jnp.concatenate([feat_eeg, pooled], axis=1) @ params["wh"] + params["bh"]


if __name__ == "__main__":
    key = jax.random.PRNGKey(0)
    k_in1, k_in2, k_p = jax.random.split(key, 3)

    x = {
        "input_comp_spectrogram": jax.random.normal(k_in1, (B, T, H, W), jnp.float32),
        "input_eeg_raw": jax.random.normal(k_in2, (B, EEG_L, EEG_C), jnp.float32),
    }
    params = init_params(k_p)
    prepared = prepare_params(params)      # one-time weight preprocessing (not per-call)

    out = double_mil_forward(x, prepared)
    out = jax.block_until_ready(out)
    assert out.shape == (B, NUM_CLASSES), out.shape
    assert bool(jnp.all(jnp.isfinite(out)))

    # loose check vs f32 reference (kernel uses bf16 MXU operands)
    ref = reference_forward(x, params)
    max_diff = float(jnp.max(jnp.abs(out - ref)))
    assert max_diff < 0.35, max_diff

    print("KERNEL_OK")
</pallas_src>

<mosaic_0001>
module attributes {stable_mosaic.version = 11 : i64} {
  func.func @_double_mil_kernel(%arg0: i32, %arg1: memref<128x256xbf16, #tpu.memory_space<vmem>>, %arg2: memref<16x1024xbf16, #tpu.memory_space<vmem>>, %arg3: memref<256x128xbf16, #tpu.memory_space<vmem>>, %arg4: memref<1x128xf32, #tpu.memory_space<vmem>>, %arg5: memref<1024x128xbf16, #tpu.memory_space<vmem>>, %arg6: memref<1x128xf32, #tpu.memory_space<vmem>>, %arg7: memref<128x2048xbf16, #tpu.memory_space<vmem>>, %arg8: memref<1x2048xf32, #tpu.memory_space<vmem>>, %arg9: memref<1x2048xf32, #tpu.memory_space<vmem>>, %arg10: memref<1x1xf32, #tpu.memory_space<vmem>>, %arg11: memref<256x128xbf16, #tpu.memory_space<vmem>>, %arg12: memref<1x128xf32, #tpu.memory_space<vmem>>, %arg13: memref<16x128xf32, #tpu.memory_space<vmem>>) attributes {dimension_semantics = [#tpu.dimension_semantics<parallel>], iteration_bounds = array<i64: 1>, scalar_prefetch = 0 : i64, scratch_operands = 0 : i64, tpu.core_type = #tpu.core_type<tc>, window_params = [{transform_indices = @transform_0, window_bounds = array<i64: 128, 256>}, {transform_indices = @transform_1, window_bounds = array<i64: 16, 1024>}, {pipeline_mode = #tpu.pipeline_mode<synchronous>, transform_indices = @transform_2, window_bounds = array<i64: 256, 128>}, {pipeline_mode = #tpu.pipeline_mode<synchronous>, transform_indices = @transform_3, window_bounds = array<i64: 1, 128>}, {pipeline_mode = #tpu.pipeline_mode<synchronous>, transform_indices = @transform_4, window_bounds = array<i64: 1024, 128>}, {pipeline_mode = #tpu.pipeline_mode<synchronous>, transform_indices = @transform_5, window_bounds = array<i64: 1, 128>}, {pipeline_mode = #tpu.pipeline_mode<synchronous>, transform_indices = @transform_6, window_bounds = array<i64: 128, 2048>}, {pipeline_mode = #tpu.pipeline_mode<synchronous>, transform_indices = @transform_7, window_bounds = array<i64: 1, 2048>}, {pipeline_mode = #tpu.pipeline_mode<synchronous>, transform_indices = @transform_8, window_bounds = array<i64: 1, 2048>}, {pipeline_mode = #tpu.pipeline_mode<synchronous>, transform_indices = @transform_9, window_bounds = array<i64: 1, 1>}, {pipeline_mode = #tpu.pipeline_mode<synchronous>, transform_indices = @transform_10, window_bounds = array<i64: 256, 128>}, {pipeline_mode = #tpu.pipeline_mode<synchronous>, transform_indices = @transform_11, window_bounds = array<i64: 1, 128>}, {transform_indices = @transform_12, window_bounds = array<i64: 16, 128>}]} {
    %c0 = arith.constant 0 : index
    %c0_0 = arith.constant 0 : index
    %0 = vector.load %arg1[%c0, %c0_0] : memref<128x256xbf16, #tpu.memory_space<vmem>>, vector<128x256xbf16>
    %c0_1 = arith.constant 0 : index
    %c0_2 = arith.constant 0 : index
    %1 = vector.load %arg3[%c0_1, %c0_2] : memref<256x128xbf16, #tpu.memory_space<vmem>>, vector<256x128xbf16>
    %cst = arith.constant dense<0.000000e+00> : vector<128x128xf32>
    %2 = tpu.matmul %0, %1, %cst {dimension_numbers = #tpu.dot_dimension_numbers<[1], [0], [0], [1], [0, 0, 1, 1], [], []>} : vector<128x256xbf16>, vector<256x128xbf16>, vector<128x128xf32> -> vector<128x128xf32>
    %c0_3 = arith.constant 0 : index
    %c0_4 = arith.constant 0 : index
    %3 = vector.load %arg4[%c0_3, %c0_4] : memref<1x128xf32, #tpu.memory_space<vmem>>, vector<1x128xf32>
    %4 = vector.broadcast %3 : vector<1x128xf32> to vector<128x128xf32>
    %5 = arith.addf %2, %4 : vector<128x128xf32>
    %6 = arith.truncf %5 : vector<128x128xf32> to vector<128x128xbf16>
    %c0_5 = arith.constant 0 : index
    %c0_6 = arith.constant 0 : index
    %7 = vector.load %arg7[%c0_5, %c0_6] : memref<128x2048xbf16, #tpu.memory_space<vmem>>, vector<128x2048xbf16>
    %cst_7 = arith.constant dense<0.000000e+00> : vector<128x2048xf32>
    %8 = tpu.matmul %6, %7, %cst_7 {dimension_numbers = #tpu.dot_dimension_numbers<[1], [0], [0], [1], [0, 0, 1, 1], [], []>} : vector<128x128xbf16>, vector<128x2048xbf16>, vector<128x2048xf32> -> vector<128x2048xf32>
    %c0_8 = arith.constant 0 : index
    %c0_9 = arith.constant 0 : index
    %9 = vector.load %arg8[%c0_8, %c0_9] : memref<1x2048xf32, #tpu.memory_space<vmem>>, vector<1x2048xf32>
    %10 = vector.broadcast %9 : vector<1x2048xf32> to vector<128x2048xf32>
    %11 = arith.addf %8, %10 : vector<128x2048xf32>
    %12 = math.tanh %11 : vector<128x2048xf32>
    %c0_10 = arith.constant 0 : index
    %c0_11 = arith.constant 0 : index
    %13 = vector.load %arg9[%c0_10, %c0_11] : memref<1x2048xf32, #tpu.memory_space<vmem>>, vector<1x2048xf32>
    %14 = vector.broadcast %13 : vector<1x2048xf32> to vector<128x2048xf32>
    %15 = arith.mulf %12, %14 : vector<128x2048xf32>
    %cst_12 = arith.constant dense<0.000000e+00> : vector<128xf32>
    %16 = vector.multi_reduction <add>, %15, %cst_12 [1] : vector<128x2048xf32> to vector<128xf32>
    %17 = vector.shape_cast %16 : vector<128xf32> to vector<128x1xf32>
    %c0_13 = arith.constant 0 : index
    %c0_14 = arith.constant 0 : index
    %18 = vector.load %arg10[%c0_13, %c0_14] : memref<1x1xf32, #tpu.memory_space<vmem>>, vector<1x1xf32>
    %19 = vector.broadcast %18 : vector<1x1xf32> to vector<128x1xf32>
    %20 = arith.addf %17, %19 : vector<128x1xf32>
    %21 = vector.shape_cast %20 : vector<128x1xf32> to vector<16x8x1xf32>
    %22 = vector.shape_cast %5 : vector<128x128xf32> to vector<16x8x128xf32>
    %cst_15 = arith.constant dense<0xFF800000> : vector<16x1xf32>
    %23 = vector.multi_reduction <maximumf>, %21, %cst_15 [1] : vector<16x8x1xf32> to vector<16x1xf32>
    %24 = vector.shape_cast %23 : vector<16x1xf32> to vector<16x1x1xf32>
    %25 = vector.broadcast %24 : vector<16x1x1xf32> to vector<16x8x1xf32>
    %26 = arith.subf %21, %25 : vector<16x8x1xf32>
    %27 = math.exp %26 : vector<16x8x1xf32>
    %cst_16 = arith.constant dense<0.000000e+00> : vector<16x1xf32>
    %28 = vector.multi_reduction <add>, %27, %cst_16 [1] : vector<16x8x1xf32> to vector<16x1xf32>
    %29 = vector.shape_cast %28 : vector<16x1xf32> to vector<16x1x1xf32>
    %30 = vector.broadcast %29 : vector<16x1x1xf32> to vector<16x8x1xf32>
    %31 = arith.divf %27, %30 : vector<16x8x1xf32>
    %32 = vector.broadcast %31 : vector<16x8x1xf32> to vector<16x8x128xf32>
    %33 = arith.mulf %22, %32 : vector<16x8x128xf32>
    %cst_17 = arith.constant dense<0.000000e+00> : vector<16x128xf32>
    %34 = vector.multi_reduction <add>, %33, %cst_17 [1] : vector<16x8x128xf32> to vector<16x128xf32>
    %c0_18 = arith.constant 0 : index
    %c0_19 = arith.constant 0 : index
    %35 = vector.load %arg2[%c0_18, %c0_19] : memref<16x1024xbf16, #tpu.memory_space<vmem>>, vector<16x1024xbf16>
    %c0_20 = arith.constant 0 : index
    %c0_21 = arith.constant 0 : index
    %36 = vector.load %arg5[%c0_20, %c0_21] : memref<1024x128xbf16, #tpu.memory_space<vmem>>, vector<1024x128xbf16>
    %cst_22 = arith.constant dense<0.000000e+00> : vector<16x128xf32>
    %37 = tpu.matmul %35, %36, %cst_22 {dimension_numbers = #tpu.dot_dimension_numbers<[1], [0], [0], [1], [0, 0, 1, 1], [], []>} : vector<16x1024xbf16>, vector<1024x128xbf16>, vector<16x128xf32> -> vector<16x128xf32>
    %c0_23 = arith.constant 0 : index
    %c0_24 = arith.constant 0 : index
    %38 = vector.load %arg6[%c0_23, %c0_24] : memref<1x128xf32, #tpu.memory_space<vmem>>, vector<1x128xf32>
    %39 = vector.broadcast %38 : vector<1x128xf32> to vector<16x128xf32>
    %40 = arith.addf %37, %39 : vector<16x128xf32>
    %41 = tpu.concatenate %40, %34 in 1 : vector<16x128xf32>, vector<16x128xf32> -> vector<16x256xf32>
    %42 = arith.truncf %41 : vector<16x256xf32> to vector<16x256xbf16>
    %c0_25 = arith.constant 0 : index
    %c0_26 = arith.constant 0 : index
    %43 = vector.load %arg11[%c0_25, %c0_26] : memref<256x128xbf16, #tpu.memory_space<vmem>>, vector<256x128xbf16>
    %cst_27 = arith.constant dense<0.000000e+00> : vector<16x128xf32>
    %44 = tpu.matmul %42, %43, %cst_27 {dimension_numbers = #tpu.dot_dimension_numbers<[1], [0], [0], [1], [0, 0, 1, 1], [], []>} : vector<16x256xbf16>, vector<256x128xbf16>, vector<16x128xf32> -> vector<16x128xf32>
    %c0_28 = arith.constant 0 : index
    %c0_29 = arith.constant 0 : index
    %45 = vector.load %arg12[%c0_28, %c0_29] : memref<1x128xf32, #tpu.memory_space<vmem>>, vector<1x128xf32>
    %46 = vector.broadcast %45 : vector<1x128xf32> to vector<16x128xf32>
    %47 = arith.addf %44, %46 : vector<16x128xf32>
    %c0_30 = arith.constant 0 : index
    %c0_31 = arith.constant 0 : index
    %48 = vector.load %arg13[%c0_30, %c0_31] : memref<16x128xf32, #tpu.memory_space<vmem>>, vector<16x128xf32>
    tpu.vector_store %arg13[%c0_30, %c0_31], %47 {strides = array<i32>} : memref<16x128xf32, #tpu.memory_space<vmem>>, vector<16x128xf32>,
    return
  }
  func.func @transform_0(%arg0: i32) -> (i32, i32) {
    %c0_i32 = arith.constant 0 : i32
    %c0_i32_0 = arith.constant 0 : i32
    return %arg0, %c0_i32 : i32, i32
  }
  func.func @transform_1(%arg0: i32) -> (i32, i32) {
    %c0_i32 = arith.constant 0 : i32
    %c0_i32_0 = arith.constant 0 : i32
    return %arg0, %c0_i32 : i32, i32
  }
  func.func @transform_2(%arg0: i32) -> (i32, i32) {
    %c0_i32 = arith.constant 0 : i32
    %c0_i32_0 = arith.constant 0 : i32
    %c0_i32_1 = arith.constant 0 : i32
    return %c0_i32, %c0_i32_0 : i32, i32
  }
  func.func @transform_3(%arg0: i32) -> (i32, i32) {
    %c0_i32 = arith.constant 0 : i32
    %c0_i32_0 = arith.constant 0 : i32
    %c0_i32_1 = arith.constant 0 : i32
    return %c0_i32, %c0_i32_0 : i32, i32
  }
  func.func @transform_4(%arg0: i32) -> (i32, i32) {
    %c0_i32 = arith.constant 0 : i32
    %c0_i32_0 = arith.constant 0 : i32
    %c0_i32_1 = arith.constant 0 : i32
    return %c0_i32, %c0_i32_0 : i32, i32
  }
  func.func @transform_5(%arg0: i32) -> (i32, i32) {
    %c0_i32 = arith.constant 0 : i32
    %c0_i32_0 = arith.constant 0 : i32
    %c0_i32_1 = arith.constant 0 : i32
    return %c0_i32, %c0_i32_0 : i32, i32
  }
  func.func @transform_6(%arg0: i32) -> (i32, i32) {
    %c0_i32 = arith.constant 0 : i32
    %c0_i32_0 = arith.constant 0 : i32
    %c0_i32_1 = arith.constant 0 : i32
    return %c0_i32, %c0_i32_0 : i32, i32
  }
  func.func @transform_7(%arg0: i32) -> (i32, i32) {
    %c0_i32 = arith.constant 0 : i32
    %c0_i32_0 = arith.constant 0 : i32
    %c0_i32_1 = arith.constant 0 : i32
    return %c0_i32, %c0_i32_0 : i32, i32
  }
  func.func @transform_8(%arg0: i32) -> (i32, i32) {
    %c0_i32 = arith.constant 0 : i32
    %c0_i32_0 = arith.constant 0 : i32
    %c0_i32_1 = arith.constant 0 : i32
    return %c0_i32, %c0_i32_0 : i32, i32
  }
  func.func @transform_9(%arg0: i32) -> (i32, i32) {
    %c0_i32 = arith.constant 0 : i32
    %c0_i32_0 = arith.constant 0 : i32
    %c0_i32_1 = arith.constant 0 : i32
    return %c0_i32, %c0_i32_0 : i32, i32
  }
  func.func @transform_10(%arg0: i32) -> (i32, i32) {
    %c0_i32 = arith.constant 0 : i32
    %c0_i32_0 = arith.constant 0 : i32
    %c0_i32_1 = arith.constant 0 : i32
    return %c0_i32, %c0_i32_0 : i32, i32
  }
  func.func @transform_11(%arg0: i32) -> (i32, i32) {
    %c0_i32 = arith.constant 0 : i32
    %c0_i32_0 = arith.constant 0 : i32
    %c0_i32_1 = arith.constant 0 : i32
    return %c0_i32, %c0_i32_0 : i32, i32
  }
  func.func @transform_12(%arg0: i32) -> (i32, i32) {
    %c0_i32 = arith.constant 0 : i32
    %c0_i32_0 = arith.constant 0 : i32
    return %arg0, %c0_i32 : i32, i32
  }
}

</mosaic_0001>

<bundles_post_ra>
// kernel: tpu_custom_call.1
= control target key start
LH: loop header
LB: loop body
LE: loop exit
PB: predicated region body
PF: predicated region fallthrough
CT: control target
= control target key end

     0   :  { %s7449_s0 = inlined_call_operand.hbm [shape: bf16[128,256], index: 0, kind: input, shape index: {}]   ;;  %s7450_s1 = inlined_call_operand.hbm [shape: bf16[16,1024], index: 1, kind: input, shape index: {}]   ;;  %s7451_s2 = inlined_call_operand.hbm [shape: bf16[256,128], index: 2, kind: input, shape index: {}]   ;;  %s7452_s3 = inlined_call_operand.hbm [shape: f32[1,128], index: 3, kind: input, shape index: {}]   ;;  %s7453_s4 = inlined_call_operand.hbm [shape: bf16[1024,128], index: 4, kind: input, shape index: {}]   ;;  %s7454_s5 = inlined_call_operand.hbm [shape: f32[1,128], index: 5, kind: input, shape index: {}]   ;;  %s7455_s6 = inlined_call_operand.hbm [shape: bf16[128,2048], index: 6, kind: input, shape index: {}]   ;;  %s7456_s7 = inlined_call_operand.hbm [shape: f32[1,2048], index: 7, kind: input, shape index: {}]   ;;  %s7457_s8 = inlined_call_operand.vmem [shape: f32[1,2048], index: 8, kind: input, shape index: {}]   ;;  %s7458_s9 = inlined_call_operand.<no memory space> [shape: f32[1,1], index: 9, kind: input, shape index: {}]   ;;  %s7459_s10 = inlined_call_operand.hbm [shape: bf16[256,128], index: 10, kind: input, shape index: {}]   ;;  %s7460_s11 = inlined_call_operand.vmem [shape: f32[1,128], index: 11, kind: input, shape index: {}]   ;;  %s7461_s12 = inlined_call_operand.hbm [shape: f32[16,128], index: 12, kind: output, shape index: {}]  }
   0x1   :  { %v17_v0 = vstv %s7458_s9 }
   0x2   :  { %18 = vst [vmem:[#allocation2] sm:$0x1] %v17_v0 }
   0x3   :  { %19 = vsyncpa [#allocation4], 0 }
   0x4   :  { %20 = vsyncpa [#allocation7], 0 }
   0x5   :  { %21 = vsyncpa [#allocation10], 0 }
   0x6   :  { %22 = vsyncpa [#allocation13], 0 }
   0x7   :  { %23 = vsyncpa [#allocation16], 0 }
   0x8   :  { %24 = vsyncpa [#allocation5], 0  ;;  %s5967_s23 = smov [#allocation6]  }
   0x9   :  { %s42_s24 = sshll.u32 %s5967_s23, 4  ;;  %s43_s24 = int_to_ptr.vmem [resolvable:$true] %s42_s24 }
   0xa   :  { %s5763_s25 = scalar_lea.vmem %s43_s24, 1024  ;;  %p5768_p1 = scmp.lt.s32.totalorder %s43_s24, %s43_s24 }
   0xb   :  { %p5764_p0 = scmp.ne.s32.totalorder %s43_s24, %s5763_s25  ;;  %p5769_p2 = scmp.lt.s32.totalorder %s5763_s25, %s5763_s25 }
   0xd   :  { %p5770_p3 = por %p5769_p2, %p5768_p1 }
   0xf   :  { %p5771_p4 = pnand %p5770_p3, %p5764_p0 }
  0x11   :  { %5774 = shalt.err (!%p5771_p4)
}
  0x12   :  { %s5968_s26 = smov 512   ;;  %s5969_s27 = smov 32  }
  0x13   :  { %48 = dma.hbm_to_vmem [thread:$0]  %s7450_s1, 1024, %s43_s24, [#allocation7], %s5968_s26, %s5968_s26, %s5969_s27  }
  0x14   :  { %s5970_s29 = smov [#allocation9]   ;;  %s5971_s13 = smov [#allocation12]  }
  0x15   :  { %s67_s30 = sshll.u32 %s5970_s29, 4  ;;  %s89_s14 = sshll.u32 %s5971_s13, 4  ;;  %s68_s30 = int_to_ptr.vmem [resolvable:$true] %s67_s30  ;;  %s90_s14 = int_to_ptr.vmem [resolvable:$true] %s89_s14 }
  0x16   :  { %s5783_s15 = scalar_lea.vmem %s68_s30, 16  ;;  %s5787_s16 = scalar_lea.vmem %s68_s30, 32 }
  0x17   :  { %p5784_p5 = scmp.ne.s32.totalorder %s68_s30, %s5783_s15  ;;  %p5788_p6 = scmp.lt.s32.totalorder %s68_s30, %s68_s30 }
  0x18   :  { %p5789_p7 = scmp.lt.s32.totalorder %s5787_s16, %s5783_s15 }
  0x1a   :  { %p5790_p8 = por %p5789_p7, %p5788_p6 }
  0x1c   :  { %p5791_p9 = pnand %p5790_p8, %p5784_p5 }
  0x1e   :  { %5794 = shalt.err (!%p5791_p9)
}
  0x1f   :  { %70 = dma.hbm_to_vmem [thread:$0]  %s7452_s3, 16, %s68_s30, [#allocation10]  }
  0x20   :  { %s5803_s19 = scalar_lea.vmem %s90_s14, 16  ;;  %s5807_s1 = scalar_lea.vmem %s90_s14, 32 }
  0x21   :  { %p5804_p10 = scmp.ne.s32.totalorder %s90_s14, %s5803_s19  ;;  %p5808_p11 = scmp.lt.s32.totalorder %s90_s14, %s90_s14 }
  0x22   :  { %p5809_p12 = scmp.lt.s32.totalorder %s5807_s1, %s5803_s19 }
  0x24   :  { %p5810_p13 = por %p5809_p12, %p5808_p11 }
  0x26   :  { %p5811_p0 = pnand %p5810_p13, %p5804_p10 }
  0x28   :  { %5814 = shalt.err (!%p5811_p0)
}
  0x29   :  { %92 = dma.hbm_to_vmem [thread:$0]  %s7454_s5, 16, %s90_s14, [#allocation13]  }
  0x2a   :  { %s5972_s22 = smov [#allocation15]   ;;  %s5973_s24 = smov [#allocation3]  }
  0x2b   :  { %s111_s23 = sshll.u32 %s5972_s22, 4  ;;  %s30_s25 = sshll.u32 %s5973_s24, 4  ;;  %s112_s23 = int_to_ptr.vmem [resolvable:$true] %s111_s23  ;;  %s31_s25 = int_to_ptr.vmem [resolvable:$true] %s30_s25 }
  0x2c   :  { %s5823_s26 = scalar_lea.vmem %s112_s23, 256  ;;  %p5828_p2 = scmp.lt.s32.totalorder %s112_s23, %s112_s23 }
  0x2d   :  { %p5824_p1 = scmp.ne.s32.totalorder %s112_s23, %s5823_s26  ;;  %p5829_p3 = scmp.lt.s32.totalorder %s5823_s26, %s5823_s26 }
  0x2f   :  { %p5830_p4 = por %p5829_p3, %p5828_p2 }
  0x31   :  { %p5831_p5 = pnand %p5830_p4, %p5824_p1 }
  0x33   :  { %5834 = shalt.err (!%p5831_p5)
}
  0x34   :  { %114 = dma.hbm_to_vmem [thread:$0]  %s7456_s7, 256, %s112_s23, [#allocation16]  }
  0x35   :  { %s5843_s9 = scalar_lea.vmem %s31_s25, 2048  ;;  %p5848_p7 = scmp.lt.s32.totalorder %s31_s25, %s31_s25 }
  0x36   :  { %p5844_p6 = scmp.ne.s32.totalorder %s31_s25, %s5843_s9  ;;  %p5849_p8 = scmp.lt.s32.totalorder %s5843_s9, %s5843_s9 }
  0x38   :  { %p5850_p9 = por %p5849_p8, %p5848_p7 }
  0x3a   :  { %p5851_p10 = pnand %p5850_p9, %p5844_p6 }
  0x3c   :  { %5854 = shalt.err (!%p5851_p10)
}
  0x3d   :  { %s5974_s5 = smov 128   ;;  %s5975_s28 = smov 8  }
  0x3e   :  { %36 = dma.hbm_to_vmem [thread:$0]  %s7449_s0, 2048, %s31_s25, [#allocation4], %s5974_s5, %s5974_s5, %s5975_s28  }
  0x3f   :  { %s5976_s13 = smov [#allocation8]  }
  0x40   :  { %s54_s14 = sshll.u32 %s5976_s13, 4  ;;  %s55_s14 = int_to_ptr.vmem [resolvable:$true] %s54_s14 }
  0x41   :  { %s5863_s7 = scalar_lea.vmem %s55_s14, 2048  ;;  %p5868_p12 = scmp.lt.s32.totalorder %s55_s14, %s55_s14 }
  0x42   :  { %p5864_p11 = scmp.ne.s32.totalorder %s55_s14, %s5863_s7  ;;  %p5869_p13 = scmp.lt.s32.totalorder %s5863_s7, %s5863_s7 }
  0x44   :  { %p5870_p0 = por %p5869_p13, %p5868_p12 }
  0x46   :  { %p5871_p1 = pnand %p5870_p0, %p5864_p11 }
  0x48   :  { %5874 = shalt.err (!%p5871_p1)
}
  0x49   :  { %s5977_s15 = smov 64   ;;  %s5978_s16 = smov 4  }
  0x4a   :  { %60 = dma.hbm_to_vmem [thread:$0]  %s7451_s2, 2048, %s55_s14, [#allocation7], %s5977_s15, %s5977_s15, %s5978_s16  }
  0x4b   :  { %s5979_s0 = smov [#allocation11]   ;;  %s5980_s1 = smov [#allocation14]  }
  0x4c   :  { %s76_s19 = sshll.u32 %s5979_s0, 4  ;;  %s98_s20 = sshll.u32 %s5980_s1, 4  ;;  %s77_s19 = int_to_ptr.vmem [resolvable:$true] %s76_s19  ;;  %s99_s20 = int_to_ptr.vmem [resolvable:$true] %s98_s20 }
  0x4d   :  { %s5883_s21 = scalar_lea.vmem %s77_s19, 8192  ;;  %p5888_p3 = scmp.lt.s32.totalorder %s77_s19, %s77_s19 }
  0x4e   :  { %p5884_p2 = scmp.ne.s32.totalorder %s77_s19, %s5883_s21  ;;  %p5889_p4 = scmp.lt.s32.totalorder %s5883_s21, %s5883_s21 }
  0x50   :  { %p5890_p5 = por %p5889_p4, %p5888_p3 }
  0x52   :  { %p5891_p6 = pnand %p5890_p5, %p5884_p2 }
  0x54   :  { %5894 = shalt.err (!%p5891_p6)
}
  0x55   :  { %82 = dma.hbm_to_vmem [thread:$0]  %s7453_s4, 8192, %s77_s19, [#allocation10], %s5977_s15, %s5977_s15, %s5978_s16  }
  0x56   :  { %s5903_s2 = scalar_lea.vmem %s99_s20, 16384  ;;  %p5908_p8 = scmp.lt.s32.totalorder %s99_s20, %s99_s20 }
  0x57   :  { %p5904_p7 = scmp.ne.s32.totalorder %s99_s20, %s5903_s2  ;;  %p5909_p9 = scmp.lt.s32.totalorder %s5903_s2, %s5903_s2 }
  0x59   :  { %p5910_p10 = por %p5909_p9, %p5908_p8 }
  0x5b   :  { %p5911_p11 = pnand %p5910_p10, %p5904_p7 }
  0x5d   :  { %5914 = shalt.err (!%p5911_p11)
}
  0x5e   :  { %s5981_s24 = smov 1024   ;;  %s5982_s3 = smov [#allocation17]  }
  0x5f   :  { %104 = dma.hbm_to_vmem [thread:$0]  %s7455_s6, 16384, %s99_s20, [#allocation13], %s5981_s24, %s5981_s24, %s5977_s15  }
  0x60   :  { %s124_s27 = sshll.u32 %s5982_s3, 4  ;;  %s125_s27 = int_to_ptr.vmem [resolvable:$true] %s124_s27 }
  0x61   :  { %s5923_s9 = scalar_lea.vmem %s125_s27, 2048  ;;  %p5928_p13 = scmp.lt.s32.totalorder %s125_s27, %s125_s27 }
  0x62   :  { %p5924_p12 = scmp.ne.s32.totalorder %s125_s27, %s5923_s9  ;;  %p5929_p0 = scmp.lt.s32.totalorder %s5923_s9, %s5923_s9 }
  0x64   :  { %p5930_p1 = por %p5929_p0, %p5928_p13 }
  0x66   :  { %p5931_p2 = pnand %p5930_p1, %p5924_p12 }
  0x68   :  { %5934 = shalt.err (!%p5931_p2)
}
  0x69   :  { %130 = dma.hbm_to_vmem [thread:$0]  %s7459_s10, 2048, %s125_s27, [#allocation16], %s5977_s15, %s5977_s15, %s5978_s16  }
  0x6a   :  { %5955 = dma.done.wait [#allocation4], 2048  }
  0x6b   :  { %5956 = vsyncadd [#allocation4], 4294965248 }
  0x6c   :  { %5957 = dma.done.wait [#allocation7], 3072  }
  0x6d   :  { %5958 = vsyncadd [#allocation7], 4294964224 }
  0x6e   :  { %5959 = dma.done.wait [#allocation10], 8208  }
  0x6f   :  { %5960 = vsyncadd [#allocation10], 4294959088 }
  0x70   :  { %5961 = dma.done.wait [#allocation13], 16400  }
  0x71   :  { %5962 = vsyncadd [#allocation13], 4294950896 }
  0x72   :  { %5963 = dma.done.wait [#allocation16], 2304  }
  0x73   :  { %5964 = vsyncadd [#allocation16], 4294964992  ;;  %v5058_v1 = vld [vmem:[#allocation8 + $0x78] sm:$0xff]   ;;  %v5060_v3 = vld [vmem:[#allocation8 + $0x70] sm:$0xff]   ;;  %vm3144_vm0 = vcmask 7168   ;;  %vm4388_vm1 = vcmask 1041409  }
  0x74   :  { %v5059_v2 = vld [vmem:[#allocation8 + $0x38] sm:$0xff]   ;;  %4864 = vmatprep.subr.bf16.mxu0 %v5058_v1  ;;  %v5061_v4 = vld [vmem:[#allocation8 + $0x30] sm:$0xff]   ;;  %v5062_v5 = vld [vmem:[#allocation8 + $0x68] sm:$0xff]   ;;  %vm4390_vm2 = vcmask 1042434   ;;  %vm4392_vm3 = vcmask 1043459   ;;  %vm4394_vm4 = vcmask 1044484  }
  0x75   :  { %4865 = vmatpush3.bf16.msra.mxu0 %v5059_v2  ;;  %v5063_v6 = vld [vmem:[#allocation8 + $0x28] sm:$0xff]   ;;  %v5064_v7 = vld [vmem:[#allocation8 + $0x60] sm:$0xff]   ;;  %v5066_v9 = vld [vmem:[#allocation8 + $0x58] sm:$0xff]   ;;  %vm4396_vm5 = vcmask 1045509   ;;  %vm4398_vm6 = vcmask 1046534   ;;  %vm4400_vm7 = vcmask 1047559  }
  0x76   :  { %4866 = vmatprep.subr.bf16.mxu0 %v5060_v3  ;;  %v5065_v8 = vld [vmem:[#allocation8 + $0x20] sm:$0xff]   ;;  %v5067_v10 = vld [vmem:[#allocation8 + $0x18] sm:$0xff]   ;;  %v5068_v11 = vld [vmem:[#allocation8 + $0x50] sm:$0xff]   ;;  %s5984_s16 = smov [#allocation18]  }
  0x77   :  { %v5076_v12 = vld [vmem:[#allocation3 + $0x4] ss:$8 sps:$4 sm:$0xff]   ;;  %v5069_v13 = vld [vmem:[#allocation8 + $0x10] sm:$0xff]   ;;  %v5074_v25 = vld [vmem:[#allocation3] ss:$8 sps:$4 sm:$0xff]   ;;  %s4596_s17 = sshll.u32 %s5984_s16, 4  ;;  %s4597_s17 = int_to_ptr.vmem [resolvable:$true] %s4596_s17 }
  0x78   :  { %424 = vmatprep.mubr.bf16.mxu0 %v5076_v12  ;;  %v5070_v14 = vld [vmem:[#allocation8 + $0x48] sm:$0xff]   ;;  %v5072_v16 = vld [vmem:[#allocation8 + $0x40] sm:$0xff]   ;;  %v5077_v30 = vld [vmem:[#allocation3 + $0x14] ss:$8 sps:$4 sm:$0xff]   ;;  %s5935_s18 = scalar_lea.vmem %s4597_s17, 256  ;;  %p5940_p4 = scmp.lt.s32.totalorder %s4597_s17, %s4597_s17 }
  0x79   :  { %4867 = vmatpush3.bf16.msra.mxu0 %v5061_v4  ;;  %v5071_v15 = vld [vmem:[#allocation8 + $0x8] sm:$0xff]   ;;  %v5073_v18 = vld [vmem:[#allocation8] sm:$0xff]   ;;  %v5079_v45 = vld [vmem:[#allocation3 + $0x10] ss:$8 sps:$4 sm:$0xff]   ;;  %p5936_p3 = scmp.ne.s32.totalorder %s4597_s17, %s5935_s18  ;;  %p5941_p5 = scmp.lt.s32.totalorder %s5935_s18, %s5935_s18 }
  0x7a   :  { %4868 = vmatprep.subr.bf16.mxu0 %v5062_v5  ;;  %v610_v17 = vld [vmem:[#allocation14 + $0x388] sm:$0xff]  ;;  %v609_v23 = vld [vmem:[#allocation14 + $0x380] sm:$0xff]  ;;  %v5083_v63 = vld [vmem:[#allocation3 + $0x34] ss:$8 sps:$4 sm:$0xff]  }
  0x7b   :  { %v618_v19 = vld [vmem:[#allocation14 + $0x3c8] sm:$0xff]  ;;  %v617_v24 = vld [vmem:[#allocation14 + $0x3c0] sm:$0xff]  ;;  %p5942_p6 = por %p5941_p5, %p5940_p4 }
  0x7c   :  { %v4760_v20 = vcombine.high %v610_v17, %v618_v19  ;;  %v594_v21 = vld [vmem:[#allocation14 + $0x308] sm:$0xff]  ;;  %v4758_v26 = vcombine.high %v609_v23, %v617_v24  ;;  %v4757_v27 = vcombine.low %v609_v23, %v617_v24  ;;  %v593_v28 = vld [vmem:[#allocation14 + $0x300] sm:$0xff]  ;;  %v4759_v31 = vcombine.low %v610_v17, %v618_v19 }
  0x7d   :  { %4869 = vmatpush3.bf16.msra.mxu0 %v5063_v6  ;;  %v602_v22 = vld [vmem:[#allocation14 + $0x348] sm:$0xff]  ;;  %v601_v29 = vld [vmem:[#allocation14 + $0x340] sm:$0xff]  ;;  %p5943_p7 = pnand %p5942_p6, %p5936_p3 }
  0x7e   :  { %4870 = vmatprep.subr.bf16.mxu0 %v5064_v7  ;;  %v4742_v32 = vcombine.high %v593_v28, %v601_v29  ;;  %v577_v33 = vld [vmem:[#allocation14 + $0x280] sm:$0xff]  ;;  %v4744_v35 = vcombine.high %v594_v21, %v602_v22  ;;  %v578_v36 = vld [vmem:[#allocation14 + $0x288] sm:$0xff]  ;;  %1349 = vmatprep.subr.bf16.mxu1 %v4758_v26  ;;  %v4741_v38 = vcombine.low %v593_v28, %v601_v29  ;;  %v5089_v7 = vld [vmem:[#allocation3 + $0x54] ss:$8 sps:$4 sm:$0xff]  }
  0x7f   :  { %v585_v34 = vld [vmem:[#allocation14 + $0x2c0] sm:$0xff]  ;;  %v586_v37 = vld [vmem:[#allocation14 + $0x2c8] sm:$0xff]  ;;  %1350 = vmatpush1.bf16.msra.mxu1 %v4757_v27  ;;  %v4743_v42 = vcombine.low %v594_v21, %v602_v22 }
  0x80   :  { %v561_v39 = vld [vmem:[#allocation14 + $0x200] sm:$0xff]  ;;  %1351 = vmatprep.subr.bf16.mxu1 %v4742_v32  ;;  %v4726_v41 = vcombine.high %v577_v33, %v585_v34  ;;  %v562_v43 = vld [vmem:[#allocation14 + $0x208] sm:$0xff]  ;;  %v4728_v46 = vcombine.high %v578_v36, %v586_v37  ;;  %v4725_v48 = vcombine.low %v577_v33, %v585_v34  ;;  %v4727_v52 = vcombine.low %v578_v36, %v586_v37  ;;  %v611_v34 = vld [vmem:[#allocation14 + $0x390] sm:$0xff] }
  0x81   :  { %4871 = vmatpush3.bf16.msra.mxu0 %v5065_v8  ;;  %v569_v40 = vld [vmem:[#allocation14 + $0x240] sm:$0xff]  ;;  %v570_v44 = vld [vmem:[#allocation14 + $0x248] sm:$0xff]  ;;  %v7462_v33 = vmov 0  }
  0x82   :  { %4872 = vmatprep.subr.bf16.mxu0 %v5066_v9  ;;  %v5080_v47 = vld [vmem:[#allocation3 + $0x24] ss:$8 sps:$4 sm:$0xff]   ;;  %v4710_v51 = vcombine.high %v561_v39, %v569_v40  ;;  %v4712_v55 = vcombine.high %v562_v43, %v570_v44  ;;  %v4709_v56 = vcombine.low %v561_v39, %v569_v40  ;;  %v4711_v58 = vcombine.low %v562_v43, %v570_v44  ;;  %v5082_v61 = vld [vmem:[#allocation3 + $0x20] ss:$8 sps:$4 sm:$0xff]   ;;  %v5085_v4 = vld [vmem:[#allocation3 + $0x30] ss:$8 sps:$4 sm:$0xff]  }
  0x83   :  { %1352 = vmatpush1.bf16.msra.mxu1 %v4741_v38  ;;  %v545_v49 = vld [vmem:[#allocation14 + $0x180] sm:$0xff]  ;;  %v546_v53 = vld [vmem:[#allocation14 + $0x188] sm:$0xff]  ;;  %1381 = vmatprep.mubr.bf16.mxu1 %v7462_v33  ;;  %v612_v38 = vld [vmem:[#allocation14 + $0x398] sm:$0xff] }
  0x84   :  { %v553_v50 = vld [vmem:[#allocation14 + $0x1c0] sm:$0xff]  ;;  %1353 = vmatprep.subr.bf16.mxu1 %v4726_v41  ;;  %v554_v54 = vld [vmem:[#allocation14 + $0x1c8] sm:$0xff]  ;;  %5056 = vset.pattern.permute.xlu0 %v7462_v33  ;;  %v620_v39 = vld [vmem:[#allocation14 + $0x3d8] sm:$0xff] }
  0x85   :  { %4873 = vmatpush3.bf16.msra.mxu0 %v5067_v10  ;;  %v4694_v57 = vcombine.high %v545_v49, %v553_v50  ;;  %v530_v59 = vld [vmem:[#allocation14 + $0x108] sm:$0xff]  ;;  %v4696_v62 = vcombine.high %v546_v53, %v554_v54  ;;  %v4693_v0 = vcombine.low %v545_v49, %v553_v50  ;;  %v4695_v1 = vcombine.low %v546_v53, %v554_v54  ;;  %v5088_v6 = vld [vmem:[#allocation3 + $0x40] ss:$8 sps:$4 sm:$0xff]   ;;  %v595_v50 = vld [vmem:[#allocation14 + $0x310] sm:$0xff] }
  0x86   :  { %4874 = vmatprep.subr.bf16.mxu0 %v5068_v11  ;;  %v538_v60 = vld [vmem:[#allocation14 + $0x148] sm:$0xff]  ;;  %v5094_v10 = vld [vmem:[#allocation3 + $0x60] ss:$8 sps:$4 sm:$0xff]   ;;  %v5095_v11 = vld [vmem:[#allocation3 + $0x74] ss:$8 sps:$4 sm:$0xff]   ;;  %5057 = vset.pattern.permute.xlu1 %v7462_v33  ;;  %v4763_v40 = vcombine.low %v612_v38, %v620_v39  ;;  %v4764_v41 = vcombine.high %v612_v38, %v620_v39 }
  0x87   :  { %1354 = vmatpush1.bf16.msra.mxu1 %v4725_v48  ;;  %v4680_v2 = vcombine.high %v530_v59, %v538_v60  ;;  %v4679_v3 = vcombine.low %v530_v59, %v538_v60  ;;  %v5086_v5 = vld [vmem:[#allocation3 + $0x44] ss:$8 sps:$4 sm:$0xff]   ;;  %v5091_v8 = vld [vmem:[#allocation3 + $0x50] ss:$8 sps:$4 sm:$0xff]   ;;  %v596_v54 = vld [vmem:[#allocation14 + $0x318] sm:$0xff] }
  0x88   :  { %1355 = vmatprep.subr.bf16.mxu1 %v4710_v51  ;;  %v5092_v9 = vld [vmem:[#allocation3 + $0x64] ss:$8 sps:$4 sm:$0xff]   ;;  %v5097_v12 = vld [vmem:[#allocation3 + $0x70] ss:$8 sps:$4 sm:$0xff]   ;;  %v532_v39 = vld [vmem:[#allocation14 + $0x118] sm:$0xff] }
  0x89   :  { %4875 = vmatpush3.bf16.msra.mxu0 %v5069_v13  ;;  %v529_v13 = vld [vmem:[#allocation14 + $0x100] sm:$0xff]  ;;  %v522_v17 = vld [vmem:[#allocation14 + $0xc8] sm:$0xff]  ;;  %v603_v53 = vld [vmem:[#allocation14 + $0x350] sm:$0xff] }
  0x8a   :  { %4876 = vmatprep.subr.bf16.mxu0 %v5070_v14  ;;  %v537_v14 = vld [vmem:[#allocation14 + $0x140] sm:$0xff]  ;;  %v498_v27 = vld [vmem:[#allocation14 + $0x8] sm:$0xff]  ;;  %v4746_v60 = vcombine.high %v595_v50, %v603_v53  ;;  %v539_v38 = vld [vmem:[#allocation14 + $0x150] sm:$0xff] }
  0x8b   :  { %1356 = vmatpush1.bf16.msra.mxu1 %v4709_v56  ;;  %v513_v21 = vld [vmem:[#allocation14 + $0x80] sm:$0xff]  ;;  %v506_v29 = vld [vmem:[#allocation14 + $0x48] sm:$0xff] }
  0x8c   :  { %1357 = vmatprep.subr.bf16.mxu1 %v4694_v57  ;;  %v521_v22 = vld [vmem:[#allocation14 + $0xc0] sm:$0xff] }
  0x8d   :  { %4877 = vmatpush3.bf16.msra.mxu0 %v5071_v15  ;;  %v4678_v15 = vcombine.high %v529_v13, %v537_v14  ;;  %v4662_v23 = vcombine.high %v513_v21, %v521_v22  ;;  %v4661_v24 = vcombine.low %v513_v21, %v521_v22  ;;  %v505_v26 = vld [vmem:[#allocation14 + $0x40] sm:$0xff]  ;;  %v547_v22 = vld [vmem:[#allocation14 + $0x190] sm:$0xff] }
  0x8e   :  { %4878 = vmatprep.subr.bf16.mxu0 %v5072_v16  ;;  %v514_v16 = vld [vmem:[#allocation14 + $0x88] sm:$0xff] }
  0x8f   :  { %1358 = vmatpush1.bf16.msra.mxu1 %v4693_v0  ;;  %v4663_v19 = vcombine.low %v514_v16, %v522_v17  ;;  %v588_v0 = vld [vmem:[#allocation14 + $0x2d8] sm:$0xff] }
  0x90   :  { %1359 = vmatprep.subr.bf16.mxu1 %v4678_v15 }
  0x91   :  { %4879 = vmatpush3.bf16.msra.mxu0 %v5073_v18  ;;  %v4677_v18 = vcombine.low %v529_v13, %v537_v14  ;;  %v564_v13 = vld [vmem:[#allocation14 + $0x218] sm:$0xff] }
  0x92   :  { %1462 = vmatprep.subr.bf16.mxu0 %v4760_v20  ;;  %v4664_v20 = vcombine.high %v514_v16, %v522_v17  ;;  %v572_v14 = vld [vmem:[#allocation14 + $0x258] sm:$0xff] }
  0x93   :  { %1360 = vmatpush1.bf16.msra.mxu1 %v4677_v18  ;;  %v4716_v21 = vcombine.high %v564_v13, %v572_v14 }
  0x94   :  { %425 = vmatmul.mubr.bf16.vlgmr.msra.gmra.mxu0 %v5074_v25  ;;  %1361 = vmatprep.subr.bf16.mxu1 %v4662_v23  ;;  %v497_v25 = vld [vmem:[#allocation14] sm:$0xff] }
  0x95   :  { %432 = vmatprep.mubr.bf16.mxu0 %v5077_v30  ;;  %1463 = vmatpush1.bf16.msra.mxu0 %v4759_v31  ;;  %v4646_v28 = vcombine.high %v497_v25, %v505_v26  ;;  %v4647_v30 = vcombine.low %v498_v27, %v506_v29  ;;  %v4648_v31 = vcombine.high %v498_v27, %v506_v29 }
  0x96   :  { %1464 = vmatprep.subr.bf16.mxu0 %v4744_v35  ;;  %v4645_v32 = vcombine.low %v497_v25, %v505_v26  ;;  %v619_v35 = vld [vmem:[#allocation14 + $0x3d0] sm:$0xff]  ;;  %v548_v25 = vld [vmem:[#allocation14 + $0x198] sm:$0xff] }
  0x97   :  { %1362 = vmatpush1.bf16.msra.mxu1 %v4661_v24  ;;  %v4761_v36 = vcombine.low %v611_v34, %v619_v35  ;;  %v4762_v37 = vcombine.high %v611_v34, %v619_v35  ;;  %v555_v24 = vld [vmem:[#allocation14 + $0x1d0] sm:$0xff]  ;;  %v556_v26 = vld [vmem:[#allocation14 + $0x1d8] sm:$0xff] }
  0x98   :  { %1363 = vmatprep.subr.bf16.mxu1 %v4646_v28  ;;  %v4700_v34 = vcombine.high %v548_v25, %v556_v26  ;;  %v531_v35 = vld [vmem:[#allocation14 + $0x110] sm:$0xff] }
  0x99   :  { %1465 = vmatpush1.bf16.msra.mxu0 %v4743_v42 }
  0x9a   :  { %1466 = vmatprep.subr.bf16.mxu0 %v4728_v46  ;;  %v6097_v46 = vld [vmem:[#allocation9] ss:$0 sm:$0xff] }
  0x9b   :  { %1364 = vmatpush1.bf16.msra.mxu1 %v4645_v32  ;;  %v4698_v32 = vcombine.high %v547_v22, %v555_v24 }
  0x9c   :  { %433 = vmatmul.mubr.bf16.gmra.mxu0 %v5079_v45  ;;  %1575 = vmatprep.subr.bf16.mxu1 %v4762_v37 }
  0x9d   :  { %440 = vmatprep.mubr.bf16.mxu0 %v5080_v47  ;;  %1467 = vmatpush1.bf16.msra.mxu0 %v4727_v52 }
  0x9e   :  { %1468 = vmatprep.subr.bf16.mxu0 %v4712_v55  ;;  %v604_v55 = vld [vmem:[#allocation14 + $0x358] sm:$0xff] }
  0xa1   :  { %1469 = vmatpush1.bf16.msra.mxu0 %v4711_v58  ;;  %v579_v58 = vld [vmem:[#allocation14 + $0x290] sm:$0xff] }
  0xa2   :  { %1470 = vmatprep.subr.bf16.mxu0 %v4696_v62  ;;  %v587_v62 = vld [vmem:[#allocation14 + $0x2d0] sm:$0xff] }
  0xa3   :  { %v4729_v17 = vcombine.low %v579_v58, %v587_v62 }
  0xa4   :  { %441 = vmatmul.mubr.bf16.gmra.mxu0 %v5082_v61  ;;  %v4748_v61 = vcombine.high %v596_v54, %v604_v55 }
  0xa5   :  { %448 = vmatprep.mubr.bf16.mxu0 %v5083_v63  ;;  %1471 = vmatpush1.bf16.msra.mxu0 %v4695_v1  ;;  %v580_v63 = vld [vmem:[#allocation14 + $0x298] sm:$0xff] }
  0xa6   :  { %1472 = vmatprep.subr.bf16.mxu0 %v4680_v2  ;;  %v4731_v18 = vcombine.low %v580_v63, %v588_v0 }
  0xa9   :  { %1473 = vmatpush1.bf16.msra.mxu0 %v4679_v3  ;;  %v4745_v3 = vcombine.low %v595_v50, %v603_v53  ;;  %v523_v53 = vld [vmem:[#allocation14 + $0xd0] sm:$0xff] }
  0xaa   :  { %1474 = vmatprep.subr.bf16.mxu0 %v4664_v20 }
  0xac   :  { %449 = vmatmul.mubr.bf16.gmra.mxu0 %v5085_v4  ;;  %v4747_v4 = vcombine.low %v596_v54, %v604_v55  ;;  %v516_v54 = vld [vmem:[#allocation14 + $0x98] sm:$0xff] }
  0xad   :  { %456 = vmatprep.mubr.bf16.mxu0 %v5086_v5  ;;  %1475 = vmatpush1.bf16.msra.mxu0 %v4663_v19  ;;  %v524_v55 = vld [vmem:[#allocation14 + $0xd8] sm:$0xff] }
  0xae   :  { %1476 = vmatprep.subr.bf16.mxu0 %v4648_v31 }
  0xb1   :  { %1477 = vmatpush1.bf16.msra.mxu0 %v4647_v30  ;;  %v4715_v30 = vcombine.low %v564_v13, %v572_v14 }
  0xb2   :  { %1688 = vmatprep.subr.bf16.mxu0 %v4764_v41 }
  0xb4   :  { %457 = vmatmul.mubr.bf16.gmra.mxu0 %v5088_v6  ;;  %v4730_v6 = vcombine.high %v579_v58, %v587_v62 }
  0xb5   :  { %464 = vmatprep.mubr.bf16.mxu0 %v5089_v7  ;;  %v4732_v7 = vcombine.high %v580_v63, %v588_v0  ;;  %v4668_v63 = vcombine.high %v516_v54, %v524_v55  ;;  %v499_v0 = vld [vmem:[#allocation14 + $0x10] sm:$0xff] }
  0xbc   :  { %465 = vmatmul.mubr.bf16.gmra.mxu0 %v5091_v8 }
  0xbd   :  { %472 = vmatprep.mubr.bf16.mxu0 %v5092_v9  ;;  %v563_v9 = vld [vmem:[#allocation14 + $0x210] sm:$0xff] }
  0xc4   :  { %473 = vmatmul.mubr.bf16.gmra.mxu0 %v5094_v10 }
  0xc5   :  { %480 = vmatprep.mubr.bf16.mxu0 %v5095_v11 }
  0xcc   :  { %481 = vmatmul.mubr.bf16.gmra.mxu0 %v5097_v12  ;;  %v571_v12 = vld [vmem:[#allocation14 + $0x250] sm:$0xff] }
  0xcd   :  { %1494 = vmatprep.mubr.bf16.mxu0 %v7462_v33  ;;  %v4714_v20 = vcombine.high %v563_v9, %v571_v12  ;;  %v4713_v29 = vcombine.low %v563_v9, %v571_v12  ;;  %v4667_v9 = vcombine.low %v516_v54, %v524_v55 }
 0x154   :  { %v4880_v42 = vpop.f32.mrf.mxu0 }
 0x156   :  { %v4881_v43 = vpop.f32.mrf.mxu0 }
 0x157   :  { %v4882_v45 = vadd.f32 %v4881_v43, %v4880_v42  ;;  %v4697_v43 = vcombine.low %v547_v22, %v555_v24 }
 0x158   :  { %v4883_v44 = vpop.f32.mrf.mxu0 }
 0x159   :  { %v6100_v51 = vadd.f32 %v4882_v45, %v6097_v46 }
 0x15a   :  { %v4884_v47 = vpop.f32.mrf.mxu0 }
 0x15b   :  { %v4885_v48 = vadd.f32 %v4884_v47, %v4883_v44  ;;  %7482 = vst [vmem:[#allocation25_spill] sm:$0xff] %v6100_v51  ;;  %v4699_v44 = vcombine.low %v548_v25, %v556_v26  ;;  %v4682_v47 = vcombine.high %v531_v35, %v539_v38 }
 0x15c   :  { %v4886_v49 = vpop.f32.mrf.mxu0 }
 0x15d   :  { %v6103_v52 = vadd.f32 %v4885_v48, %v6097_v46 }
 0x15e   :  { %v4887_v56 = vpop.f32.mrf.mxu0 }
 0x15f   :  { %7483 = vst [vmem:[#allocation26_spill] sm:$0xff] %v6103_v52  ;;  %v6107_v57 = vpack.c.bf16 %v6103_v52, %v6100_v51  ;;  %v4888_v1 = vadd.f32 %v4887_v56, %v4886_v49  ;;  %v515_v49 = vld [vmem:[#allocation14 + $0x90] sm:$0xff] }
 0x160   :  { %v4889_v59 = vpop.f32.mrf.mxu0  ;;  %v4666_v62 = vcombine.high %v515_v49, %v523_v53 }
 0x161   :  { %1382 = vmatmul.mubr.bf16.vlgmr.msra.gmra.mxu1 %v6107_v57  ;;  %1495 = vmatmul.mubr.bf16.vlgmr.msra.gmra.mxu0 %v6107_v57  ;;  %v6114_v10 = vadd.f32 %v4888_v1, %v6097_v46 }
 0x162   :  { %1576 = vmatpush1.bf16.msra.mxu1 %v4761_v36  ;;  %v4890_v2 = vpop.f32.mrf.mxu0  ;;  %1689 = vmatpush1.bf16.msra.mxu0 %v4763_v40  ;;  %v540_v40 = vld [vmem:[#allocation14 + $0x158] sm:$0xff] }
 0x163   :  { %v4891_v5 = vadd.f32 %v4890_v2, %v4889_v59  ;;  %1391 = vmatprep.mubr.bf16.mxu1 %v7462_v33  ;;  %1504 = vmatprep.mubr.bf16.mxu0 %v7462_v33  ;;  %7484 = vst [vmem:[#allocation27_spill] sm:$0xff] %v6114_v10  ;;  %v4684_v48 = vcombine.high %v532_v39, %v540_v40 }
 0x164   :  { %v4892_v8 = vpop.f32.mrf.mxu0  ;;  %1577 = vmatprep.subr.bf16.mxu1 %v4746_v60  ;;  %1690 = vmatprep.subr.bf16.mxu0 %v4748_v61  ;;  %v4681_v59 = vcombine.low %v531_v35, %v539_v38  ;;  %v4683_v60 = vcombine.low %v532_v39, %v540_v40 }
 0x165   :  { %v6117_v11 = vadd.f32 %v4891_v5, %v6097_v46  ;;  %v508_v5 = vld [vmem:[#allocation14 + $0x58] sm:$0xff] }
 0x166   :  { %v4893_v15 = vpop.f32.mrf.mxu0  ;;  %1578 = vmatpush1.bf16.msra.mxu1 %v4745_v3  ;;  %1691 = vmatpush1.bf16.msra.mxu0 %v4747_v4  ;;  %v507_v3 = vld [vmem:[#allocation14 + $0x50] sm:$0xff]  ;;  %v500_v4 = vld [vmem:[#allocation14 + $0x18] sm:$0xff] }
 0x167   :  { %7485 = vst [vmem:[#allocation28_spill] sm:$0xff] %v6117_v11  ;;  %v6121_v16 = vpack.c.bf16 %v6117_v11, %v6114_v10  ;;  %1579 = vmatprep.subr.bf16.mxu1 %v4730_v6  ;;  %1692 = vmatprep.subr.bf16.mxu0 %v4732_v7  ;;  %v4894_v23 = vadd.f32 %v4893_v15, %v4892_v8  ;;  %v6151_v15 = vld [vmem:[#allocation14 + $0x3a0] sm:$0xff] }
 0x168   :  { %v4895_v19 = vpop.f32.mrf.mxu0  ;;  %v4665_v8 = vcombine.low %v515_v49, %v523_v53  ;;  %v4650_v13 = vcombine.high %v499_v0, %v507_v3  ;;  %v4652_v14 = vcombine.high %v500_v4, %v508_v5  ;;  %v4651_v24 = vcombine.low %v500_v4, %v508_v5  ;;  %v605_v4 = vld [vmem:[#allocation14 + $0x360] sm:$0xff]  ;;  %v598_v5 = vld [vmem:[#allocation14 + $0x328] sm:$0xff] }
 0x169   :  { %1392 = vmatmul.mubr.bf16.gmra.mxu1 %v6121_v16  ;;  %1505 = vmatmul.mubr.bf16.gmra.mxu0 %v6121_v16  ;;  %v6128_v36 = vadd.f32 %v4894_v23, %v6097_v46  ;;  %v4649_v23 = vcombine.low %v499_v0, %v507_v3  ;;  %v597_v3 = vld [vmem:[#allocation14 + $0x320] sm:$0xff] }
 0x16a   :  { %v4896_v27 = vpop.f32.mrf.mxu0  ;;  %1401 = vmatprep.mubr.bf16.mxu1 %v7462_v33  ;;  %1514 = vmatprep.mubr.bf16.mxu0 %v7462_v33 }
 0x16b   :  { %v4897_v28 = vadd.f32 %v4896_v27, %v4895_v19  ;;  %1580 = vmatpush1.bf16.msra.mxu1 %v4729_v17  ;;  %1693 = vmatpush1.bf16.msra.mxu0 %v4731_v18  ;;  %7486 = vst [vmem:[#allocation29_spill] sm:$0xff] %v6128_v36  ;;  %v6155_v18 = vld [vmem:[#allocation14 + $0x3e0] sm:$0xff]  ;;  %v6157_v19 = vld [vmem:[#allocation14 + $0x3a8] sm:$0xff] }
 0x16c   :  { %v4898_v31 = vpop.f32.mrf.mxu0  ;;  %1581 = vmatprep.subr.bf16.mxu1 %v4714_v20  ;;  %1694 = vmatprep.subr.bf16.mxu0 %v4716_v21  ;;  %v6159_v20 = vld [vmem:[#allocation14 + $0x3e8] sm:$0xff]  ;;  %v4766_v26 = vcombine.high %v6151_v15, %v6155_v18 }
 0x16d   :  { %v6131_v37 = vadd.f32 %v4897_v28, %v6097_v46  ;;  %v4768_v27 = vcombine.high %v6157_v19, %v6159_v20 }
 0x16e   :  { %v4899_v41 = vpop.f32.mrf.mxu0 }
 0x16f   :  { %7487 = vst [vmem:[#allocation30_spill] sm:$0xff] %v6131_v37  ;;  %v6135_v42 = vpack.c.bf16 %v6131_v37, %v6128_v36  ;;  %1582 = vmatpush1.bf16.msra.mxu1 %v4713_v29  ;;  %1695 = vmatpush1.bf16.msra.mxu0 %v4715_v30  ;;  %v4900_v50 = vadd.f32 %v4899_v41, %v4898_v31 }
 0x170   :  { %v4901_v45 = vpop.f32.mrf.mxu0  ;;  %1583 = vmatprep.subr.bf16.mxu1 %v4698_v32  ;;  %1696 = vmatprep.subr.bf16.mxu0 %v4700_v34 }
 0x171   :  { %1402 = vmatmul.mubr.bf16.gmra.mxu1 %v6135_v42  ;;  %1515 = vmatmul.mubr.bf16.gmra.mxu0 %v6135_v42  ;;  %v6142_v1 = vadd.f32 %v4900_v50, %v6097_v46 }
 0x172   :  { %v4902_v56 = vpop.f32.mrf.mxu0  ;;  %1411 = vmatprep.mubr.bf16.mxu1 %v7462_v33  ;;  %1524 = vmatprep.mubr.bf16.mxu0 %v7462_v33 }
 0x173   :  { %v4903_v58 = vadd.f32 %v4902_v56, %v4901_v45  ;;  %1584 = vmatpush1.bf16.msra.mxu1 %v4697_v43  ;;  %1697 = vmatpush1.bf16.msra.mxu0 %v4699_v44  ;;  %7488 = vst [vmem:[#allocation31_spill] sm:$0xff] %v6142_v1 }
 0x174   :  { %v4904_v61 = vpop.f32.mrf.mxu0  ;;  %1585 = vmatprep.subr.bf16.mxu1 %v4682_v47  ;;  %1698 = vmatprep.subr.bf16.mxu0 %v4684_v48 }
 0x175   :  { %v6145_v2 = vadd.f32 %v4903_v58, %v6097_v46 }
 0x176   :  { %v4905_v6 = vpop.f32.mrf.mxu0 }
 0x177   :  { %7489 = vst [vmem:[#allocation32_spill] sm:$0xff] %v6145_v2  ;;  %v6149_v7 = vpack.c.bf16 %v6145_v2, %v6142_v1  ;;  %1586 = vmatpush1.bf16.msra.mxu1 %v4681_v59  ;;  %1699 = vmatpush1.bf16.msra.mxu0 %v4683_v60  ;;  %v4906_v17 = vadd.f32 %v4905_v6, %v4904_v61  ;;  %v606_v6 = vld [vmem:[#allocation14 + $0x368] sm:$0xff] }
 0x178   :  { %v4907_v12 = vpop.f32.mrf.mxu0  ;;  %1587 = vmatprep.subr.bf16.mxu1 %v4666_v62  ;;  %1700 = vmatprep.subr.bf16.mxu0 %v4668_v63 }
 0x179   :  { %1412 = vmatmul.mubr.bf16.gmra.mxu1 %v6149_v7  ;;  %1525 = vmatmul.mubr.bf16.gmra.mxu0 %v6149_v7  ;;  %v6168_v28 = vadd.f32 %v4906_v17, %v6097_v46  ;;  %v582_v17 = vld [vmem:[#allocation14 + $0x2a8] sm:$0xff] }
 0x17a   :  { %v4908_v21 = vpop.f32.mrf.mxu0  ;;  %1421 = vmatprep.mubr.bf16.mxu1 %v7462_v33  ;;  %1534 = vmatprep.mubr.bf16.mxu0 %v7462_v33 }
 0x17b   :  { %v4909_v22 = vadd.f32 %v4908_v21, %v4907_v12  ;;  %1588 = vmatpush1.bf16.msra.mxu1 %v4665_v8  ;;  %1701 = vmatpush1.bf16.msra.mxu0 %v4667_v9  ;;  %7490 = vst [vmem:[#allocation33_spill] sm:$0xff] %v6168_v28  ;;  %v4767_v8 = vcombine.low %v6157_v19, %v6159_v20  ;;  %v581_v9 = vld [vmem:[#allocation14 + $0x2a0] sm:$0xff]  ;;  %v590_v21 = vld [vmem:[#allocation14 + $0x2e8] sm:$0xff] }
 0x17c   :  { %v4910_v25 = vpop.f32.mrf.mxu0  ;;  %1589 = vmatprep.subr.bf16.mxu1 %v4650_v13  ;;  %1702 = vmatprep.subr.bf16.mxu0 %v4652_v14  ;;  %v4750_v12 = vcombine.high %v597_v3, %v605_v4  ;;  %v4752_v13 = vcombine.high %v598_v5, %v606_v6  ;;  %v589_v14 = vld [vmem:[#allocation14 + $0x2e0] sm:$0xff] }
 0x17d   :  { %v6171_v29 = vadd.f32 %v4909_v22, %v6097_v46  ;;  %v4749_v22 = vcombine.low %v597_v3, %v605_v4  ;;  %v565_v19 = vld [vmem:[#allocation14 + $0x220] sm:$0xff] }
 0x17e   :  { %v4911_v30 = vpop.f32.mrf.mxu0  ;;  %v573_v20 = vld [vmem:[#allocation14 + $0x260] sm:$0xff] }
 0x17f   :  { %7491 = vst [vmem:[#allocation34_spill] sm:$0xff] %v6171_v29  ;;  %v6175_v31 = vpack.c.bf16 %v6171_v29, %v6168_v28  ;;  %1590 = vmatpush1.bf16.msra.mxu1 %v4649_v23  ;;  %1703 = vmatpush1.bf16.msra.mxu0 %v4651_v24  ;;  %v4912_v34 = vadd.f32 %v4911_v30, %v4910_v25  ;;  %v566_v24 = vld [vmem:[#allocation14 + $0x228] sm:$0xff]  ;;  %v517_v4 = vld [vmem:[#allocation14 + $0xa0] sm:$0xff] }
 0x180   :  { %v4913_v32 = vpop.f32.mrf.mxu0  ;;  %1801 = vmatprep.subr.bf16.mxu1 %v4766_v26  ;;  %1914 = vmatprep.subr.bf16.mxu0 %v4768_v27  ;;  %v4751_v23 = vcombine.low %v598_v5, %v606_v6  ;;  %v574_v25 = vld [vmem:[#allocation14 + $0x268] sm:$0xff]  ;;  %v4733_v26 = vcombine.low %v581_v9, %v589_v14  ;;  %v4735_v27 = vcombine.low %v582_v17, %v590_v21  ;;  %v525_v5 = vld [vmem:[#allocation14 + $0xe0] sm:$0xff] }
 0x181   :  { %1422 = vmatmul.mubr.bf16.gmra.mxu1 %v6175_v31  ;;  %1535 = vmatmul.mubr.bf16.gmra.mxu0 %v6175_v31  ;;  %v6182_v40 = vadd.f32 %v4912_v34, %v6097_v46  ;;  %v4718_v30 = vcombine.high %v565_v19, %v573_v20  ;;  %v549_v34 = vld [vmem:[#allocation14 + $0x1a0] sm:$0xff]  ;;  %v518_v6 = vld [vmem:[#allocation14 + $0xa8] sm:$0xff] }
 0x182   :  { %v4914_v35 = vpop.f32.mrf.mxu0  ;;  %1431 = vmatprep.mubr.bf16.mxu1 %v7462_v33  ;;  %1544 = vmatprep.mubr.bf16.mxu0 %v7462_v33 }
 0x183   :  { %v4915_v38 = vadd.f32 %v4914_v35, %v4913_v32  ;;  %7492 = vst [vmem:[#allocation35_spill] sm:$0xff] %v6182_v40  ;;  %v4720_v32 = vcombine.high %v566_v24, %v574_v25  ;;  %v557_v35 = vld [vmem:[#allocation14 + $0x1e0] sm:$0xff] }
 0x184   :  { %v4916_v39 = vpop.f32.mrf.mxu0 }
 0x185   :  { %v6185_v41 = vadd.f32 %v4915_v38, %v6097_v46  ;;  %v550_v38 = vld [vmem:[#allocation14 + $0x1a8] sm:$0xff] }
 0x186   :  { %v4917_v43 = vpop.f32.mrf.mxu0 }
 0x187   :  { %7493 = vst [vmem:[#allocation36_spill] sm:$0xff] %v6185_v41  ;;  %v6189_v44 = vpack.c.bf16 %v6185_v41, %v6182_v40  ;;  %v4918_v47 = vadd.f32 %v4917_v43, %v4916_v39  ;;  %v558_v39 = vld [vmem:[#allocation14 + $0x1e8] sm:$0xff]  ;;  %v4717_v43 = vcombine.low %v565_v19, %v573_v20  ;;  %v615_v20 = vld [vmem:[#allocation14 + $0x3b0] sm:$0xff] }
 0x188   :  { %v4919_v45 = vpop.f32.mrf.mxu0 }
 0x189   :  { %1432 = vmatmul.mubr.bf16.gmra.mxu1 %v6189_v44  ;;  %1545 = vmatmul.mubr.bf16.gmra.mxu0 %v6189_v44  ;;  %v6196_v53 = vadd.f32 %v4918_v47, %v6097_v46  ;;  %v4702_v47 = vcombine.high %v549_v34, %v557_v35 }
 0x18a   :  { %v4920_v48 = vpop.f32.mrf.mxu0  ;;  %1441 = vmatprep.mubr.bf16.mxu1 %v7462_v33  ;;  %1554 = vmatprep.mubr.bf16.mxu0 %v7462_v33 }
 0x18b   :  { %v4921_v49 = vadd.f32 %v4920_v48, %v4919_v45  ;;  %7494 = vst [vmem:[#allocation37_spill] sm:$0xff] %v6196_v53  ;;  %v4719_v45 = vcombine.low %v566_v24, %v574_v25  ;;  %v4704_v48 = vcombine.high %v550_v38, %v558_v39  ;;  %v623_v24 = vld [vmem:[#allocation14 + $0x3f0] sm:$0xff]  ;;  %v616_v25 = vld [vmem:[#allocation14 + $0x3b8] sm:$0xff] }
 0x18c   :  { %v4922_v50 = vpop.f32.mrf.mxu0 }
 0x18d   :  { %v6199_v54 = vadd.f32 %v4921_v49, %v6097_v46  ;;  %v533_v49 = vld [vmem:[#allocation14 + $0x120] sm:$0xff] }
 0x18e   :  { %v4923_v55 = vpop.f32.mrf.mxu0 }
 0x18f   :  { %7495 = vst [vmem:[#allocation38_spill] sm:$0xff] %v6199_v54  ;;  %v6203_v56 = vpack.c.bf16 %v6199_v54, %v6196_v53  ;;  %v4924_v59 = vadd.f32 %v4923_v55, %v4922_v50  ;;  %v541_v50 = vld [vmem:[#allocation14 + $0x160] sm:$0xff]  ;;  %v534_v55 = vld [vmem:[#allocation14 + $0x128] sm:$0xff] }
 0x190   :  { %v4925_v58 = vpop.f32.mrf.mxu0 }
 0x191   :  { %1442 = vmatmul.mubr.bf16.gmra.mxu1 %v6203_v56  ;;  %1555 = vmatmul.mubr.bf16.gmra.mxu0 %v6203_v56  ;;  %v6210_v62 = vadd.f32 %v4924_v59, %v6097_v46  ;;  %v4701_v59 = vcombine.low %v549_v34, %v557_v35  ;;  %v599_v35 = vld [vmem:[#allocation14 + $0x330] sm:$0xff] }
 0x192   :  { %v4926_v60 = vpop.f32.mrf.mxu0  ;;  %1451 = vmatprep.mubr.bf16.mxu1 %v7462_v33  ;;  %1564 = vmatprep.mubr.bf16.mxu0 %v7462_v33 }
 0x193   :  { %v4927_v61 = vadd.f32 %v4926_v60, %v4925_v58  ;;  %7496 = vst [vmem:[#allocation39_spill] sm:$0xff] %v6210_v62  ;;  %v542_v58 = vld [vmem:[#allocation14 + $0x168] sm:$0xff]  ;;  %v4703_v60 = vcombine.low %v550_v38, %v558_v39  ;;  %v607_v38 = vld [vmem:[#allocation14 + $0x370] sm:$0xff]  ;;  %v600_v39 = vld [vmem:[#allocation14 + $0x338] sm:$0xff] }
 0x194   :  { %v4688_v3 = vcombine.high %v534_v55, %v542_v58 }
 0x195   :  { %v6213_v63 = vadd.f32 %v4927_v61, %v6097_v46  ;;  %v4765_v46 = vcombine.low %v6151_v15, %v6155_v18  ;;  %v4734_v15 = vcombine.high %v581_v9, %v589_v14  ;;  %v4736_v18 = vcombine.high %v582_v17, %v590_v21  ;;  %v501_v14 = vld [vmem:[#allocation14 + $0x20] sm:$0xff]  ;;  %v502_v21 = vld [vmem:[#allocation14 + $0x28] sm:$0xff] }
 0x196   :  { %v4686_v61 = vcombine.high %v533_v49, %v541_v50  ;;  %v4687_v9 = vcombine.low %v534_v55, %v542_v58  ;;  %v509_v17 = vld [vmem:[#allocation14 + $0x60] sm:$0xff]  ;;  %v591_v55 = vld [vmem:[#allocation14 + $0x2f0] sm:$0xff]  ;;  %v584_v58 = vld [vmem:[#allocation14 + $0x2b8] sm:$0xff] }
 0x197   :  { %7497 = vst [vmem:[#allocation40_spill] sm:$0xff] %v6213_v63  ;;  %v6217_v0 = vpack.c.bf16 %v6213_v63, %v6210_v62 }
 0x199   :  { %1452 = vmatmul.mubr.bf16.gmra.mxu1 %v6217_v0  ;;  %1565 = vmatmul.mubr.bf16.gmra.mxu0 %v6217_v0 }
 0x19a   :  { %1607 = vmatprep.mubr.bf16.mxu1 %v7462_v33  ;;  %1720 = vmatprep.mubr.bf16.mxu0 %v7462_v33 }
 0x1a1   :  { %1608 = vmatmul.mubr.bf16.vlgmr.msra.gmra.mxu1 %v6107_v57  ;;  %1721 = vmatmul.mubr.bf16.vlgmr.msra.gmra.mxu0 %v6107_v57 }
 0x1a2   :  { %1802 = vmatpush1.bf16.msra.mxu1 %v4765_v46  ;;  %1915 = vmatpush1.bf16.msra.mxu0 %v4767_v8  ;;  %v526_v46 = vld [vmem:[#allocation14 + $0xe8] sm:$0xff]  ;;  %v4685_v8 = vcombine.low %v533_v49, %v541_v50  ;;  %v4754_v49 = vcombine.high %v599_v35, %v607_v38 }
 0x1a3   :  { %1617 = vmatprep.mubr.bf16.mxu1 %v7462_v33  ;;  %1730 = vmatprep.mubr.bf16.mxu0 %v7462_v33 }
 0x1a4   :  { %1803 = vmatprep.subr.bf16.mxu1 %v4750_v12  ;;  %1916 = vmatprep.subr.bf16.mxu0 %v4752_v13  ;;  %v4670_v12 = vcombine.high %v517_v4, %v525_v5  ;;  %v4672_v13 = vcombine.high %v518_v6, %v526_v46 }
 0x1a6   :  { %1804 = vmatpush1.bf16.msra.mxu1 %v4749_v22  ;;  %1917 = vmatpush1.bf16.msra.mxu0 %v4751_v23  ;;  %v510_v22 = vld [vmem:[#allocation14 + $0x68] sm:$0xff]  ;;  %v4669_v23 = vcombine.low %v517_v4, %v525_v5  ;;  %v567_v5 = vld [vmem:[#allocation14 + $0x230] sm:$0xff] }
 0x1a7   :  { %1805 = vmatprep.subr.bf16.mxu1 %v4734_v15  ;;  %1918 = vmatprep.subr.bf16.mxu0 %v4736_v18  ;;  %v4671_v15 = vcombine.low %v518_v6, %v526_v46  ;;  %v4654_v18 = vcombine.high %v501_v14, %v509_v17  ;;  %v4656_v19 = vcombine.high %v502_v21, %v510_v22  ;;  %v575_v6 = vld [vmem:[#allocation14 + $0x270] sm:$0xff]  ;;  %v568_v46 = vld [vmem:[#allocation14 + $0x238] sm:$0xff] }
 0x1a9   :  { %1618 = vmatmul.mubr.bf16.gmra.mxu1 %v6121_v16  ;;  %1731 = vmatmul.mubr.bf16.gmra.mxu0 %v6121_v16 }
 0x1aa   :  { %1627 = vmatprep.mubr.bf16.mxu1 %v7462_v33  ;;  %1740 = vmatprep.mubr.bf16.mxu0 %v7462_v33 }
 0x1ab   :  { %1806 = vmatpush1.bf16.msra.mxu1 %v4733_v26  ;;  %1919 = vmatpush1.bf16.msra.mxu0 %v4735_v27  ;;  %v624_v26 = vld [vmem:[#allocation14 + $0x3f8] sm:$0xff]  ;;  %v4653_v27 = vcombine.low %v501_v14, %v509_v17  ;;  %v551_v17 = vld [vmem:[#allocation14 + $0x1b0] sm:$0xff] }
 0x1ac   :  { %1807 = vmatprep.subr.bf16.mxu1 %v4718_v30  ;;  %1920 = vmatprep.subr.bf16.mxu0 %v4720_v32  ;;  %v4655_v30 = vcombine.low %v502_v21, %v510_v22  ;;  %v4770_v32 = vcombine.high %v615_v20, %v623_v24  ;;  %v4772_v34 = vcombine.high %v616_v25, %v624_v26  ;;  %v559_v21 = vld [vmem:[#allocation14 + $0x1f0] sm:$0xff]  ;;  %v552_v22 = vld [vmem:[#allocation14 + $0x1b8] sm:$0xff] }
 0x1af   :  { %1808 = vmatpush1.bf16.msra.mxu1 %v4717_v43  ;;  %1921 = vmatpush1.bf16.msra.mxu0 %v4719_v45  ;;  %v608_v43 = vld [vmem:[#allocation14 + $0x378] sm:$0xff]  ;;  %v4769_v45 = vcombine.low %v615_v20, %v623_v24  ;;  %v535_v24 = vld [vmem:[#allocation14 + $0x130] sm:$0xff] }
 0x1b0   :  { %1809 = vmatprep.subr.bf16.mxu1 %v4702_v47  ;;  %1922 = vmatprep.subr.bf16.mxu0 %v4704_v48  ;;  %v4771_v47 = vcombine.low %v616_v25, %v624_v26  ;;  %v583_v48 = vld [vmem:[#allocation14 + $0x2b0] sm:$0xff]  ;;  %v4756_v50 = vcombine.high %v600_v39, %v608_v43  ;;  %v536_v26 = vld [vmem:[#allocation14 + $0x138] sm:$0xff] }
 0x1b1   :  { %1628 = vmatmul.mubr.bf16.gmra.mxu1 %v6135_v42  ;;  %1741 = vmatmul.mubr.bf16.gmra.mxu0 %v6135_v42  ;;  %v543_v25 = vld [vmem:[#allocation14 + $0x170] sm:$0xff] }
 0x1b2   :  { %1637 = vmatprep.mubr.bf16.mxu1 %v7462_v33  ;;  %1750 = vmatprep.mubr.bf16.mxu0 %v7462_v33 }
 0x1b3   :  { %1810 = vmatpush1.bf16.msra.mxu1 %v4701_v59  ;;  %1923 = vmatpush1.bf16.msra.mxu0 %v4703_v60  ;;  %v592_v59 = vld [vmem:[#allocation14 + $0x2f8] sm:$0xff]  ;;  %v4753_v60 = vcombine.low %v599_v35, %v607_v38  ;;  %v519_v38 = vld [vmem:[#allocation14 + $0xb0] sm:$0xff] }
 0x1b4   :  { %1811 = vmatprep.subr.bf16.mxu1 %v4686_v61  ;;  %1924 = vmatprep.subr.bf16.mxu0 %v4688_v3  ;;  %v4755_v61 = vcombine.low %v600_v39, %v608_v43  ;;  %v4738_v3 = vcombine.high %v583_v48, %v591_v55  ;;  %v4740_v4 = vcombine.high %v584_v58, %v592_v59  ;;  %v527_v39 = vld [vmem:[#allocation14 + $0xf0] sm:$0xff]  ;;  %v520_v43 = vld [vmem:[#allocation14 + $0xb8] sm:$0xff] }
 0x1b7   :  { %1812 = vmatpush1.bf16.msra.mxu1 %v4685_v8  ;;  %1925 = vmatpush1.bf16.msra.mxu0 %v4687_v9  ;;  %v576_v8 = vld [vmem:[#allocation14 + $0x278] sm:$0xff]  ;;  %v4737_v9 = vcombine.low %v583_v48, %v591_v55  ;;  %v503_v55 = vld [vmem:[#allocation14 + $0x30] sm:$0xff] }
 0x1b8   :  { %1813 = vmatprep.subr.bf16.mxu1 %v4670_v12  ;;  %1926 = vmatprep.subr.bf16.mxu0 %v4672_v13  ;;  %v4739_v12 = vcombine.low %v584_v58, %v592_v59  ;;  %v4722_v13 = vcombine.high %v567_v5, %v575_v6  ;;  %v4724_v14 = vcombine.high %v568_v46, %v576_v8  ;;  %v511_v58 = vld [vmem:[#allocation14 + $0x70] sm:$0xff]  ;;  %v504_v59 = vld [vmem:[#allocation14 + $0x38] sm:$0xff] }
 0x1b9   :  { %1638 = vmatmul.mubr.bf16.gmra.mxu1 %v6149_v7  ;;  %1751 = vmatmul.mubr.bf16.gmra.mxu0 %v6149_v7 }
 0x1ba   :  { %1647 = vmatprep.mubr.bf16.mxu1 %v7462_v33  ;;  %1760 = vmatprep.mubr.bf16.mxu0 %v7462_v33 }
 0x1bb   :  { %1814 = vmatpush1.bf16.msra.mxu1 %v4669_v23  ;;  %1927 = vmatpush1.bf16.msra.mxu0 %v4671_v15  ;;  %v560_v23 = vld [vmem:[#allocation14 + $0x1f8] sm:$0xff]  ;;  %v4721_v15 = vcombine.low %v567_v5, %v575_v6  ;;  %v4657_v6 = vcombine.low %v503_v55, %v511_v58 }
 0x1bc   :  { %1815 = vmatprep.subr.bf16.mxu1 %v4654_v18  ;;  %1928 = vmatprep.subr.bf16.mxu0 %v4656_v19  ;;  %v4723_v18 = vcombine.low %v568_v46, %v576_v8  ;;  %v4706_v19 = vcombine.high %v551_v17, %v559_v21  ;;  %v4708_v20 = vcombine.high %v552_v22, %v560_v23  ;;  %v629_v8 = vlaneseq }
 0x1bf   :  { %1816 = vmatpush1.bf16.msra.mxu1 %v4653_v27  ;;  %1929 = vmatpush1.bf16.msra.mxu0 %v4655_v30  ;;  %v544_v27 = vld [vmem:[#allocation14 + $0x178] sm:$0xff]  ;;  %v4705_v30 = vcombine.low %v551_v17, %v559_v21 }
 0x1c0   :  { %2027 = vmatprep.subr.bf16.mxu1 %v4770_v32  ;;  %2140 = vmatprep.subr.bf16.mxu0 %v4772_v34  ;;  %v4707_v32 = vcombine.low %v552_v22, %v560_v23  ;;  %v4690_v34 = vcombine.high %v535_v24, %v543_v25  ;;  %v4692_v35 = vcombine.high %v536_v26, %v544_v27 }
 0x1c1   :  { %1648 = vmatmul.mubr.bf16.gmra.mxu1 %v6175_v31  ;;  %1761 = vmatmul.mubr.bf16.gmra.mxu0 %v6175_v31  ;;  %v4691_v48 = vcombine.low %v536_v26, %v544_v27 }
 0x1c2   :  { %1657 = vmatprep.mubr.bf16.mxu1 %v7462_v33  ;;  %1770 = vmatprep.mubr.bf16.mxu0 %v7462_v33 }
 0x1c9   :  { %1658 = vmatmul.mubr.bf16.gmra.mxu1 %v6189_v44  ;;  %1771 = vmatmul.mubr.bf16.gmra.mxu0 %v6189_v44 }
 0x1ca   :  { %1667 = vmatprep.mubr.bf16.mxu1 %v7462_v33  ;;  %1780 = vmatprep.mubr.bf16.mxu0 %v7462_v33 }
 0x1d1   :  { %1668 = vmatmul.mubr.bf16.gmra.mxu1 %v6203_v56  ;;  %1781 = vmatmul.mubr.bf16.gmra.mxu0 %v6203_v56 }
 0x1d2   :  { %1677 = vmatprep.mubr.bf16.mxu1 %v7462_v33  ;;  %1790 = vmatprep.mubr.bf16.mxu0 %v7462_v33 }
 0x1d9   :  { %1678 = vmatmul.mubr.bf16.gmra.mxu1 %v6217_v0  ;;  %1791 = vmatmul.mubr.bf16.gmra.mxu0 %v6217_v0 }
 0x1da   :  { %1833 = vmatprep.mubr.bf16.mxu1 %v7462_v33  ;;  %1946 = vmatprep.mubr.bf16.mxu0 %v7462_v33 }
 0x1e1   :  { %1834 = vmatmul.mubr.bf16.vlgmr.msra.gmra.mxu1 %v6107_v57  ;;  %1947 = vmatmul.mubr.bf16.vlgmr.msra.gmra.mxu0 %v6107_v57 }
 0x1e2   :  { %2028 = vmatpush1.bf16.msra.mxu1 %v4769_v45  ;;  %2141 = vmatpush1.bf16.msra.mxu0 %v4771_v47  ;;  %v528_v45 = vld [vmem:[#allocation14 + $0xf8] sm:$0xff]  ;;  %v4689_v47 = vcombine.low %v535_v24, %v543_v25 }
 0x1e3   :  { %1843 = vmatprep.mubr.bf16.mxu1 %v7462_v33  ;;  %1956 = vmatprep.mubr.bf16.mxu0 %v7462_v33 }
 0x1e4   :  { %2029 = vmatprep.subr.bf16.mxu1 %v4754_v49  ;;  %2142 = vmatprep.subr.bf16.mxu0 %v4756_v50  ;;  %v4674_v49 = vcombine.high %v519_v38, %v527_v39  ;;  %v4676_v50 = vcombine.high %v520_v43, %v528_v45 }
 0x1e6   :  { %2030 = vmatpush1.bf16.msra.mxu1 %v4753_v60  ;;  %2143 = vmatpush1.bf16.msra.mxu0 %v4755_v61  ;;  %v512_v60 = vld [vmem:[#allocation14 + $0x78] sm:$0xff]  ;;  %v4673_v61 = vcombine.low %v519_v38, %v527_v39 }
 0x1e7   :  { %2031 = vmatprep.subr.bf16.mxu1 %v4738_v3  ;;  %2144 = vmatprep.subr.bf16.mxu0 %v4740_v4  ;;  %v4675_v3 = vcombine.low %v520_v43, %v528_v45  ;;  %v4658_v4 = vcombine.high %v503_v55, %v511_v58  ;;  %v4660_v5 = vcombine.high %v504_v59, %v512_v60 }
 0x1e8   :  { %v4659_v46 = vcombine.low %v504_v59, %v512_v60  ;;  %v6344_v60 = vld [vmem:[%s7457_s8] sm:$0xff] }
 0x1e9   :  { %1844 = vmatmul.mubr.bf16.gmra.mxu1 %v6121_v16  ;;  %1957 = vmatmul.mubr.bf16.gmra.mxu0 %v6121_v16 }
 0x1ea   :  { %1853 = vmatprep.mubr.bf16.mxu1 %v7462_v33  ;;  %1966 = vmatprep.mubr.bf16.mxu0 %v7462_v33 }
 0x1eb   :  { %2032 = vmatpush1.bf16.msra.mxu1 %v4737_v9  ;;  %2145 = vmatpush1.bf16.msra.mxu0 %v4739_v12  ;;  %v6287_v9 = vshrl.u32 %v629_v8, 7 }
 0x1ec   :  { %2033 = vmatprep.subr.bf16.mxu1 %v4722_v13  ;;  %2146 = vmatprep.subr.bf16.mxu0 %v4724_v14  ;;  %v6299_v14 = vld [vmem:[#allocation15] sm:$0xff] }
 0x1ed   :  { %v6294_v12 = vsub.s32 0, %v6287_v9  ;;  %v6297_v13 = vsub.s32 2, %v6287_v9  ;;  %v6302_v17 = vsub.s32 1, %v6287_v9  ;;  %v6305_v21 = vsub.s32 3, %v6287_v9 }
 0x1ef   :  { %2034 = vmatpush1.bf16.msra.mxu1 %v4721_v15  ;;  %2147 = vmatpush1.bf16.msra.mxu0 %v4723_v18  ;;  %v6309_v22 = vrot.slane %v6299_v14, %v6294_v12  ;;  %v6313_v23 = vrot.slane %v6299_v14, %v6297_v13  ;;  %v6317_v15 = vrot.slane %v6299_v14, %v6302_v17 }
 0x1f0   :  { %2035 = vmatprep.subr.bf16.mxu1 %v4706_v19  ;;  %2148 = vmatprep.subr.bf16.mxu0 %v4708_v20  ;;  %v6321_v18 = vrot.slane %v6299_v14, %v6305_v21 }
 0x1f1   :  { %1854 = vmatmul.mubr.bf16.gmra.mxu1 %v6135_v42  ;;  %1967 = vmatmul.mubr.bf16.gmra.mxu0 %v6135_v42 }
 0x1f2   :  { %1863 = vmatprep.mubr.bf16.mxu1 %v7462_v33  ;;  %1976 = vmatprep.mubr.bf16.mxu0 %v7462_v33 }
 0x1f3   :  { %2036 = vmatpush1.bf16.msra.mxu1 %v4705_v30  ;;  %2149 = vmatpush1.bf16.msra.mxu0 %v4707_v32 }
 0x1f4   :  { %2037 = vmatprep.subr.bf16.mxu1 %v4690_v34  ;;  %2150 = vmatprep.subr.bf16.mxu0 %v4692_v35 }
 0x1f7   :  { %2038 = vmatpush1.bf16.msra.mxu1 %v4689_v47  ;;  %2151 = vmatpush1.bf16.msra.mxu0 %v4691_v48 }
 0x1f8   :  { %2039 = vmatprep.subr.bf16.mxu1 %v4674_v49  ;;  %2152 = vmatprep.subr.bf16.mxu0 %v4676_v50 }
 0x1f9   :  { %1864 = vmatmul.mubr.bf16.gmra.mxu1 %v6149_v7  ;;  %1977 = vmatmul.mubr.bf16.gmra.mxu0 %v6149_v7 }
 0x1fa   :  { %1873 = vmatprep.mubr.bf16.mxu1 %v7462_v33  ;;  %1986 = vmatprep.mubr.bf16.mxu0 %v7462_v33 }
 0x1fb   :  { %2040 = vmatpush1.bf16.msra.mxu1 %v4673_v61  ;;  %2153 = vmatpush1.bf16.msra.mxu0 %v4675_v3 }
 0x1fc   :  { %2041 = vmatprep.subr.bf16.mxu1 %v4658_v4  ;;  %2154 = vmatprep.subr.bf16.mxu0 %v4660_v5 }
 0x1ff   :  { %2042 = vmatpush1.bf16.msra.mxu1 %v4657_v6  ;;  %2155 = vmatpush1.bf16.msra.mxu0 %v4659_v46  ;;  %v6352_v46 = vrot.slane %v6344_v60, %v6294_v12 }
 0x201   :  { %1874 = vmatmul.mubr.bf16.gmra.mxu1 %v6175_v31  ;;  %1987 = vmatmul.mubr.bf16.gmra.mxu0 %v6175_v31 }
 0x202   :  { %1883 = vmatprep.mubr.bf16.mxu1 %v7462_v33  ;;  %1996 = vmatprep.mubr.bf16.mxu0 %v7462_v33 }
 0x209   :  { %1884 = vmatmul.mubr.bf16.gmra.mxu1 %v6189_v44  ;;  %1997 = vmatmul.mubr.bf16.gmra.mxu0 %v6189_v44 }
 0x20a   :  { %1893 = vmatprep.mubr.bf16.mxu1 %v7462_v33  ;;  %2006 = vmatprep.mubr.bf16.mxu0 %v7462_v33 }
 0x211   :  { %1894 = vmatmul.mubr.bf16.gmra.mxu1 %v6203_v56  ;;  %2007 = vmatmul.mubr.bf16.gmra.mxu0 %v6203_v56 }
 0x212   :  { %1903 = vmatprep.mubr.bf16.mxu1 %v7462_v33  ;;  %2016 = vmatprep.mubr.bf16.mxu0 %v7462_v33 }
 0x219   :  { %1904 = vmatmul.mubr.bf16.gmra.mxu1 %v6217_v0  ;;  %2017 = vmatmul.mubr.bf16.gmra.mxu0 %v6217_v0 }
 0x21a   :  { %2059 = vmatprep.mubr.bf16.mxu1 %v7462_v33  ;;  %2172 = vmatprep.mubr.bf16.mxu0 %v7462_v33 }
 0x221   :  { %v1383_v19 = vpop.f32.mrf.mxu1  ;;  %v1496_v20 = vpop.f32.mrf.mxu0  ;;  %2060 = vmatmul.mubr.bf16.vlgmr.msra.gmra.mxu1 %v6107_v57  ;;  %2173 = vmatmul.mubr.bf16.vlgmr.msra.gmra.mxu0 %v6107_v57 }
 0x222   :  { %v1384_v24 = vadd.f32 %v1383_v19, %v6309_v22  ;;  %v1497_v25 = vadd.f32 %v1496_v20, %v6313_v23  ;;  %2069 = vmatprep.mubr.bf16.mxu1 %v7462_v33  ;;  %2182 = vmatprep.mubr.bf16.mxu0 %v7462_v33  ;;  %v6356_v20 = vrot.slane %v6344_v60, %v6302_v17 }
 0x223   :  { %v1385_v26 = vpop.f32.mrf.mxu1  ;;  %v1498_v27 = vpop.f32.mrf.mxu0 }
 0x224   :  { %5178 = vtanh.f32 %v1384_v24  ;;  %v1386_v30 = vadd.f32 %v1385_v26, %v6317_v15  ;;  %v1499_v32 = vadd.f32 %v1498_v27, %v6321_v18 }
 0x225   :  { %5180 = vtanh.f32 %v1497_v25  ;;  %v1387_v34 = vpop.f32.mrf.mxu1  ;;  %v1500_v35 = vpop.f32.mrf.mxu0 }
 0x226   :  { %5182 = vtanh.f32 %v1386_v30  ;;  %v1388_v57 = vadd.f32 %v1387_v34, %v6309_v22  ;;  %v1501_v38 = vadd.f32 %v1500_v35, %v6313_v23  ;;  %v6364_v34 = vrot.slane %v6344_v60, %v6297_v13 }
 0x227   :  { %5184 = vtanh.f32 %v1499_v32  ;;  %v1389_v39 = vpop.f32.mrf.mxu1  ;;  %v1502_v43 = vpop.f32.mrf.mxu0 }
 0x228   :  { %5186 = vtanh.f32 %v1388_v57  ;;  %v1390_v45 = vadd.f32 %v1389_v39, %v6317_v15  ;;  %v1503_v47 = vadd.f32 %v1502_v43, %v6321_v18 }
 0x229   :  { %5188 = vtanh.f32 %v1501_v38  ;;  %v1393_v48 = vpop.f32.mrf.mxu1  ;;  %v1506_v49 = vpop.f32.mrf.mxu0  ;;  %2070 = vmatmul.mubr.bf16.gmra.mxu1 %v6121_v16  ;;  %2183 = vmatmul.mubr.bf16.gmra.mxu0 %v6121_v16 }
 0x22a   :  { %5190 = vtanh.f32 %v1390_v45  ;;  %v1394_v50 = vadd.f32 %v1393_v48, %v6309_v22  ;;  %v1507_v55 = vadd.f32 %v1506_v49, %v6313_v23  ;;  %2079 = vmatprep.mubr.bf16.mxu1 %v7462_v33  ;;  %2192 = vmatprep.mubr.bf16.mxu0 %v7462_v33 }
 0x22b   :  { %5192 = vtanh.f32 %v1503_v47  ;;  %v1395_v58 = vpop.f32.mrf.mxu1  ;;  %v1508_v59 = vpop.f32.mrf.mxu0 }
 0x22c   :  { %5194 = vtanh.f32 %v1394_v50  ;;  %v1396_v16 = vadd.f32 %v1395_v58, %v6317_v15  ;;  %v1509_v61 = vadd.f32 %v1508_v59, %v6321_v18 }
 0x22d   :  { %5196 = vtanh.f32 %v1507_v55  ;;  %v1397_v3 = vpop.f32.mrf.mxu1  ;;  %v1510_v4 = vpop.f32.mrf.mxu0 }
 0x22e   :  { %5198 = vtanh.f32 %v1396_v16  ;;  %v1398_v5 = vadd.f32 %v1397_v3, %v6309_v22  ;;  %v1511_v6 = vadd.f32 %v1510_v4, %v6313_v23  ;;  %v6379_v16 = vsub.s32 4, %v6287_v9 }
 0x22f   :  { %5200 = vtanh.f32 %v1509_v61  ;;  %v1399_v8 = vpop.f32.mrf.mxu1  ;;  %v1512_v19 = vpop.f32.mrf.mxu0 }
 0x230   :  { %5202 = vtanh.f32 %v1398_v5  ;;  %v1400_v24 = vadd.f32 %v1399_v8, %v6317_v15  ;;  %v1513_v25 = vadd.f32 %v1512_v19, %v6321_v18 }
 0x231   :  { %v5179_v26 = vpop.eup %5178  ;;  %5204 = vtanh.f32 %v1511_v6  ;;  %v1403_v27 = vpop.f32.mrf.mxu1  ;;  %2080 = vmatmul.mubr.bf16.gmra.mxu1 %v6135_v42  ;;  %2193 = vmatmul.mubr.bf16.gmra.mxu0 %v6135_v42  ;;  %v6373_v42 = vrot.slane %v6344_v60, %v6305_v21 }
 0x232   :  { %v1516_v30 = vpop.f32.mrf.mxu0  ;;  %v5181_v32 = vpop.eup %5180  ;;  %5206 = vtanh.f32 %v1400_v24  ;;  %v1404_v35 = vadd.f32 %v1403_v27, %v6309_v22  ;;  %2089 = vmatprep.mubr.bf16.mxu1 %v7462_v33  ;;  %2202 = vmatprep.mubr.bf16.mxu0 %v7462_v33  ;;  %v2593_v39 = vmul.f32 %v5179_v26, %v6352_v46 }
 0x233   :  { %v1517_v57 = vadd.f32 %v1516_v30, %v6313_v23  ;;  %v5183_v38 = vpop.eup %5182  ;;  %5208 = vtanh.f32 %v1513_v25  ;;  %v1405_v43 = vpop.f32.mrf.mxu1  ;;  %v2595_v3 = vmul.f32 %v5181_v32, %v6364_v34 }
 0x234   :  { %v1518_v45 = vpop.f32.mrf.mxu0  ;;  %v5185_v47 = vpop.eup %5184  ;;  %v2594_v48 = vmul.f32 %v5183_v38, %v6356_v20  ;;  %5210 = vtanh.f32 %v1404_v35  ;;  %v1406_v49 = vadd.f32 %v1405_v43, %v6317_v15 }
 0x235   :  { %v1519_v50 = vadd.f32 %v1518_v45, %v6321_v18  ;;  %v5187_v55 = vpop.eup %5186  ;;  %5212 = vtanh.f32 %v1517_v57  ;;  %v1407_v58 = vpop.f32.mrf.mxu1  ;;  %v2596_v8 = vmul.f32 %v5185_v47, %v6373_v42  ;;  %v6393_v47 = vsub.s32 6, %v6287_v9 }
 0x236   :  { %v1520_v59 = vpop.f32.mrf.mxu0  ;;  %v5189_v61 = vpop.eup %5188  ;;  %v2849_v4 = vadd.f32 %v2594_v48, %v2593_v39  ;;  %5214 = vtanh.f32 %v1406_v49  ;;  %v1408_v5 = vadd.f32 %v1407_v58, %v6309_v22  ;;  %v2609_v19 = vmul.f32 %v5187_v55, %v6352_v46 }
 0x237   :  { %v5191_v6 = vpop.eup %5190  ;;  %5216 = vtanh.f32 %v1519_v50  ;;  %v1521_v24 = vadd.f32 %v1520_v59, %v6313_v23  ;;  %v1409_v25 = vpop.f32.mrf.mxu1  ;;  %v2611_v38 = vmul.f32 %v5189_v61, %v6364_v34 }
 0x238   :  { %v1522_v26 = vpop.f32.mrf.mxu0  ;;  %v5193_v27 = vpop.eup %5192  ;;  %v2850_v30 = vadd.f32 %v2849_v4, %v2595_v3  ;;  %v2610_v35 = vmul.f32 %v5191_v6, %v6356_v20  ;;  %5218 = vtanh.f32 %v1408_v5  ;;  %v1410_v32 = vadd.f32 %v1409_v25, %v6317_v15 }
 0x239   :  { %v5195_v57 = vpop.eup %5194  ;;  %5220 = vtanh.f32 %v1521_v24  ;;  %v1523_v39 = vadd.f32 %v1522_v26, %v6321_v18  ;;  %v1413_v43 = vpop.f32.mrf.mxu1  ;;  %2090 = vmatmul.mubr.bf16.gmra.mxu1 %v6149_v7  ;;  %2203 = vmatmul.mubr.bf16.gmra.mxu0 %v6149_v7  ;;  %v2612_v55 = vmul.f32 %v5193_v27, %v6373_v42 }
 0x23a   :  { %v1526_v45 = vpop.f32.mrf.mxu0  ;;  %v5197_v48 = vpop.eup %5196  ;;  %v6395_v49 = vadd.f32 %v2850_v30, %v2596_v8  ;;  %v2866_v50 = vadd.f32 %v2610_v35, %v2609_v19  ;;  %5222 = vtanh.f32 %v1410_v32  ;;  %2099 = vmatprep.mubr.bf16.mxu1 %v7462_v33  ;;  %2212 = vmatprep.mubr.bf16.mxu0 %v7462_v33  ;;  %v2625_v59 = vmul.f32 %v5195_v57, %v6352_v46 }
 0x23b   :  { %v5199_v58 = vpop.eup %5198  ;;  %5224 = vtanh.f32 %v1523_v39  ;;  %v1414_v7 = vadd.f32 %v1413_v43, %v6309_v22  ;;  %v1527_v61 = vadd.f32 %v1526_v45, %v6313_v23  ;;  %v1415_v3 = vpop.f32.mrf.mxu1  ;;  %v2627_v26 = vmul.f32 %v5197_v48, %v6364_v34 }
 0x23c   :  { %v1528_v4 = vpop.f32.mrf.mxu0  ;;  %v5201_v5 = vpop.eup %5200  ;;  %v2867_v6 = vadd.f32 %v2866_v50, %v2611_v38  ;;  %v2626_v8 = vmul.f32 %v5199_v58, %v6356_v20  ;;  %v1416_v19 = vadd.f32 %v1415_v3, %v6317_v15  ;;  %v6409_v35 = vrot.slane %v6299_v14, %v6379_v16 }
 0x23d   :  { %v1529_v24 = vadd.f32 %v1528_v4, %v6321_v18  ;;  %v5203_v25 = vpop.eup %5202  ;;  %5226 = vtanh.f32 %v1414_v7  ;;  %v1417_v27 = vpop.f32.mrf.mxu1  ;;  %v6413_v32 = vrot.slane %v6299_v14, %v6393_v47  ;;  %v2628_v43 = vmul.f32 %v5201_v5, %v6373_v42 }
 0x23e   :  { %v1530_v30 = vpop.f32.mrf.mxu0  ;;  %v5205_v57 = vpop.eup %5204  ;;  %v6415_v38 = vadd.f32 %v2867_v6, %v2612_v55  ;;  %v2883_v39 = vadd.f32 %v2626_v8, %v2625_v59  ;;  %5228 = vtanh.f32 %v1527_v61  ;;  %v2641_v48 = vmul.f32 %v5203_v25, %v6352_v46 }
 0x23f   :  { %v5207_v45 = vpop.eup %5206  ;;  %5230 = vtanh.f32 %v1416_v19  ;;  %v1418_v50 = vadd.f32 %v1417_v27, %v6309_v22  ;;  %v1531_v58 = vadd.f32 %v1530_v30, %v6313_v23  ;;  %v1419_v7 = vpop.f32.mrf.mxu1  ;;  %v2643_v61 = vmul.f32 %v5205_v57, %v6364_v34 }
 0x240   :  { %v1532_v3 = vpop.f32.mrf.mxu0  ;;  %v5209_v4 = vpop.eup %5208  ;;  %v2884_v33 = vadd.f32 %v2883_v39, %v2627_v26  ;;  %v2642_v63 = vmul.f32 %v5207_v45, %v6356_v20  ;;  %5232 = vtanh.f32 %v1529_v24  ;;  %v1420_v55 = vadd.f32 %v1419_v7, %v6317_v15 }
 0x241   :  { %v5211_v59 = vpop.eup %5210  ;;  %5234 = vtanh.f32 %v1418_v50  ;;  %v1533_v5 = vadd.f32 %v1532_v3, %v6321_v18  ;;  %v1423_v6 = vpop.f32.mrf.mxu1  ;;  %2100 = vmatmul.mubr.bf16.gmra.mxu1 %v6175_v31  ;;  %2213 = vmatmul.mubr.bf16.gmra.mxu0 %v6175_v31  ;;  %v6428_v19 = vsub.s32 5, %v6287_v9  ;;  %v2644_v27 = vmul.f32 %v5209_v4, %v6373_v42 }
 0x242   :  { %v1536_v8 = vpop.f32.mrf.mxu0  ;;  %v5213_v25 = vpop.eup %5212  ;;  %v6430_v26 = vadd.f32 %v2884_v33, %v2628_v43  ;;  %v2900_v24 = vadd.f32 %v2642_v63, %v2641_v48  ;;  %5236 = vtanh.f32 %v1531_v58  ;;  %v7498_v30 = vmov 0  }
 0x243   :  { %2109 = vmatprep.mubr.bf16.mxu1 %v7498_v30  ;;  %2222 = vmatprep.mubr.bf16.mxu0 %v7498_v30  ;;  %v5215_v57 = vpop.eup %5214  ;;  %v2657_v39 = vmul.f32 %v5211_v59, %v6352_v46  ;;  %5238 = vtanh.f32 %v1420_v55  ;;  %v1424_v31 = vadd.f32 %v1423_v6, %v6309_v22  ;;  %v1537_v45 = vadd.f32 %v1536_v8, %v6313_v23  ;;  %v1425_v50 = vpop.f32.mrf.mxu1 }
 0x244   :  { %v1538_v7 = vpop.f32.mrf.mxu0  ;;  %v5217_v33 = vpop.eup %5216  ;;  %v2901_v43 = vadd.f32 %v2900_v24, %v2643_v61  ;;  %v2658_v63 = vmul.f32 %v5215_v57, %v6356_v20  ;;  %5240 = vtanh.f32 %v1533_v5  ;;  %v1426_v48 = vadd.f32 %v1425_v50, %v6317_v15 }
 0x245   :  { %v5219_v58 = vpop.eup %5218  ;;  %v2659_v3 = vmul.f32 %v5213_v25, %v6364_v34  ;;  %5242 = vtanh.f32 %v1424_v31  ;;  %v1539_v4 = vadd.f32 %v1538_v7, %v6321_v18  ;;  %v1427_v55 = vpop.f32.mrf.mxu1  ;;  %v6443_v6 = vsub.s32 7, %v6287_v9 }
 0x246   :  { %v1540_v59 = vpop.f32.mrf.mxu0  ;;  %v5221_v8 = vpop.eup %5220  ;;  %v6445_v2 = vadd.f32 %v2901_v43, %v2644_v27  ;;  %v2917_v61 = vadd.f32 %v2658_v63, %v2657_v39  ;;  %v2660_v24 = vmul.f32 %v5217_v33, %v6373_v42  ;;  %5244 = vtanh.f32 %v1537_v45 }
 0x247   :  { %v5223_v5 = vpop.eup %5222  ;;  %v2673_v57 = vmul.f32 %v5219_v58, %v6352_v46  ;;  %5246 = vtanh.f32 %v1426_v48  ;;  %v1428_v25 = vadd.f32 %v1427_v55, %v6309_v22  ;;  %v1541_v31 = vadd.f32 %v1540_v59, %v6313_v23  ;;  %v1429_v50 = vpop.f32.mrf.mxu1 }
 0x248   :  { %v1542_v7 = vpop.f32.mrf.mxu0  ;;  %v5225_v62 = vpop.eup %5224  ;;  %v2918_v9 = vadd.f32 %v2917_v61, %v2659_v3  ;;  %v2674_v41 = vmul.f32 %v5223_v5, %v6356_v20  ;;  %5248 = vtanh.f32 %v1539_v4  ;;  %v1430_v27 = vadd.f32 %v1429_v50, %v6317_v15 }
 0x249   :  { %v2675_v39 = vmul.f32 %v5221_v8, %v6364_v34  ;;  %5250 = vtanh.f32 %v1428_v25  ;;  %v1543_v45 = vadd.f32 %v1542_v7, %v6321_v18  ;;  %v1433_v33 = vpop.f32.mrf.mxu1  ;;  %2110 = vmatmul.mubr.bf16.gmra.mxu1 %v6189_v44  ;;  %2223 = vmatmul.mubr.bf16.gmra.mxu0 %v6189_v44  ;;  %v6459_v63 = vrot.slane %v6299_v14, %v6428_v19 }
 0x24a   :  { %v1546_v43 = vpop.f32.mrf.mxu0  ;;  %v5227_v48 = vpop.eup %5226  ;;  %v6461_v58 = vadd.f32 %v2918_v9, %v2660_v24  ;;  %v2934_v3 = vadd.f32 %v2674_v41, %v2673_v57  ;;  %5252 = vtanh.f32 %v1541_v31  ;;  %v1434_v4 = vadd.f32 %v1433_v33, %v6309_v22  ;;  %2119 = vmatprep.mubr.bf16.mxu1 %v7498_v30  ;;  %2232 = vmatprep.mubr.bf16.mxu0 %v7498_v30 }
 0x24b   :  { %v5229_v55 = vpop.eup %5228  ;;  %5254 = vtanh.f32 %v1430_v27  ;;  %v1547_v59 = vadd.f32 %v1546_v43, %v6313_v23  ;;  %v1435_v44 = vpop.f32.mrf.mxu1  ;;  %v6469_v61 = vrot.slane %v6344_v60, %v6379_v16  ;;  %v6473_v41 = vrot.slane %v6299_v14, %v6443_v6 }
 0x24c   :  { %v1548_v8 = vpop.f32.mrf.mxu0  ;;  %v5231_v24 = vpop.eup %5230  ;;  %v2676_v5 = vmul.f32 %v5225_v62, %v6373_v42  ;;  %v2935_v57 = vadd.f32 %v2934_v3, %v2675_v39  ;;  %5256 = vtanh.f32 %v1543_v45  ;;  %v1436_v25 = vadd.f32 %v1435_v44, %v6317_v15 }
 0x24d   :  { %v5233_v31 = vpop.eup %5232  ;;  %v2689_v50 = vmul.f32 %v5227_v48, %v6352_v46  ;;  %v2690_v7 = vmul.f32 %v5231_v24, %v6356_v20  ;;  %5258 = vtanh.f32 %v1434_v4  ;;  %v1549_v9 = vadd.f32 %v1548_v8, %v6321_v18  ;;  %v1437_v27 = vpop.f32.mrf.mxu1 }
 0x24e   :  { %v1550_v33 = vpop.f32.mrf.mxu0  ;;  %v5235_v43 = vpop.eup %5234  ;;  %v6480_v14 = vadd.f32 %v2935_v57, %v2676_v5  ;;  %5260 = vtanh.f32 %v1547_v59  ;;  %v1438_v62 = vadd.f32 %v1437_v27, %v6309_v22  ;;  %v6485_v39 = vrot.slane %v6344_v60, %v6393_v47 }
 0x24f   :  { %v5237_v45 = vpop.eup %5236  ;;  %v2691_v48 = vmul.f32 %v5229_v55, %v6364_v34  ;;  %v2951_v3 = vadd.f32 %v2690_v7, %v2689_v50  ;;  %5262 = vtanh.f32 %v1436_v25  ;;  %v1551_v4 = vadd.f32 %v1550_v33, %v6313_v23  ;;  %v1439_v44 = vpop.f32.mrf.mxu1 }
 0x250   :  { %v1552_v8 = vpop.f32.mrf.mxu0  ;;  %v5239_v24 = vpop.eup %5238  ;;  %v2692_v5 = vmul.f32 %v5233_v31, %v6373_v42  ;;  %5264 = vtanh.f32 %v1549_v9  ;;  %v1440_v59 = vadd.f32 %v1439_v44, %v6317_v15  ;;  %v2705_v40 = vmul.f32 %v5235_v43, %v6352_v46 }
 0x251   :  { %v1553_v57 = vadd.f32 %v1552_v8, %v6321_v18  ;;  %v5241_v27 = vpop.eup %5240  ;;  %v2952_v54 = vadd.f32 %v2951_v3, %v2691_v48  ;;  %v2706_v55 = vmul.f32 %v5239_v24, %v6356_v20  ;;  %5266 = vtanh.f32 %v1438_v62  ;;  %v1443_v25 = vpop.f32.mrf.mxu1  ;;  %2120 = vmatmul.mubr.bf16.gmra.mxu1 %v6203_v56  ;;  %2233 = vmatmul.mubr.bf16.gmra.mxu0 %v6203_v56 }
 0x252   :  { %v1556_v50 = vpop.f32.mrf.mxu0  ;;  %v5243_v7 = vpop.eup %5242  ;;  %5268 = vtanh.f32 %v1551_v4  ;;  %v1444_v31 = vadd.f32 %v1443_v25, %v6309_v22  ;;  %2129 = vmatprep.mubr.bf16.mxu1 %v7498_v30  ;;  %2242 = vmatprep.mubr.bf16.mxu0 %v7498_v30  ;;  %v6502_v33 = vrot.slane %v6344_v60, %v6428_v19  ;;  %v2707_v48 = vmul.f32 %v5237_v45, %v6364_v34 }
 0x253   :  { %v1557_v9 = vadd.f32 %v1556_v50, %v6313_v23  ;;  %v5245_v43 = vpop.eup %5244  ;;  %v6504_v62 = vadd.f32 %v2952_v54, %v2692_v5  ;;  %v2968_v56 = vadd.f32 %v2706_v55, %v2705_v40  ;;  %5270 = vtanh.f32 %v1440_v59  ;;  %v1445_v3 = vpop.f32.mrf.mxu1 }
 0x254   :  { %v1558_v4 = vpop.f32.mrf.mxu0  ;;  %v5247_v44 = vpop.eup %5246  ;;  %v2708_v8 = vmul.f32 %v5241_v27, %v6373_v42  ;;  %5272 = vtanh.f32 %v1553_v57  ;;  %v1446_v24 = vadd.f32 %v1445_v3, %v6317_v15  ;;  %v2721_v53 = vmul.f32 %v5243_v7, %v6352_v46 }
 0x255   :  { %v1559_v30 = vadd.f32 %v1558_v4, %v6321_v18  ;;  %v5249_v25 = vpop.eup %5248  ;;  %v2969_v50 = vadd.f32 %v2968_v56, %v2707_v48  ;;  %v2722_v54 = vmul.f32 %v5247_v44, %v6356_v20  ;;  %5274 = vtanh.f32 %v1444_v31  ;;  %v1447_v45 = vpop.f32.mrf.mxu1  ;;  %v6521_v4 = vld [vmem:[#allocation15 + $0x8] sm:$0xff] }
 0x256   :  { %v1560_v40 = vpop.f32.mrf.mxu0  ;;  %v5251_v5 = vpop.eup %5250  ;;  %5276 = vtanh.f32 %v1557_v9  ;;  %v1448_v59 = vadd.f32 %v1447_v45, %v6309_v22  ;;  %v6516_v57 = vrot.slane %v6344_v60, %v6443_v6  ;;  %v2723_v7 = vmul.f32 %v5245_v43, %v6364_v34 }
 0x257   :  { %v1561_v27 = vadd.f32 %v1560_v40, %v6313_v23  ;;  %v5253_v55 = vpop.eup %5252  ;;  %v6518_v3 = vadd.f32 %v2969_v50, %v2708_v8  ;;  %v2985_v48 = vadd.f32 %v2722_v54, %v2721_v53  ;;  %5278 = vtanh.f32 %v1446_v24  ;;  %v1449_v31 = vpop.f32.mrf.mxu1 }
 0x258   :  { %v1562_v56 = vpop.f32.mrf.mxu0  ;;  %v5255_v9 = vpop.eup %5254  ;;  %v2724_v44 = vmul.f32 %v5249_v25, %v6373_v42  ;;  %5280 = vtanh.f32 %v1559_v30  ;;  %v1450_v45 = vadd.f32 %v1449_v31, %v6317_v15  ;;  %v2737_v50 = vmul.f32 %v5251_v5, %v6352_v46 }
 0x259   :  { %v1563_v60 = vadd.f32 %v1562_v56, %v6321_v18  ;;  %v6526_v40 = vpop.eup %5256  ;;  %v2986_v8 = vadd.f32 %v2985_v48, %v2723_v7  ;;  %v2738_v53 = vmul.f32 %v5255_v9, %v6356_v20  ;;  %5282 = vtanh.f32 %v1448_v59  ;;  %v1453_v43 = vpop.f32.mrf.mxu1  ;;  %2130 = vmatmul.mubr.bf16.gmra.mxu1 %v6217_v0  ;;  %2243 = vmatmul.mubr.bf16.gmra.mxu0 %v6217_v0 }
 0x25a   :  { %v1566_v24 = vpop.f32.mrf.mxu0  ;;  %v5259_v25 = vpop.eup %5258  ;;  %5284 = vtanh.f32 %v1561_v27  ;;  %v1454_v30 = vadd.f32 %v1453_v43, %v6309_v22  ;;  %v6536_v7 = vrot.slane %v6521_v4, %v6294_v12  ;;  %v2739_v59 = vmul.f32 %v5253_v55, %v6364_v34 }
 0x25b   :  { %v1567_v54 = vadd.f32 %v1566_v24, %v6313_v23  ;;  %v5261_v5 = vpop.eup %5260  ;;  %v6538_v48 = vadd.f32 %v2986_v8, %v2724_v44  ;;  %v3002_v31 = vadd.f32 %v2738_v53, %v2737_v50  ;;  %5286 = vtanh.f32 %v1450_v45  ;;  %v1455_v56 = vpop.f32.mrf.mxu1 }
 0x25c   :  { %v1568_v9 = vpop.f32.mrf.mxu0  ;;  %v5263_v0 = vpop.eup %5262  ;;  %5288 = vtanh.f32 %v1563_v60  ;;  %v1456_v27 = vadd.f32 %v1455_v56, %v6317_v15  ;;  %v6545_v24 = vrot.slane %v6521_v4, %v6297_v13  ;;  %v2753_v44 = vmul.f32 %v5259_v25, %v6352_v46 }
 0x25d   :  { %v1569_v43 = vadd.f32 %v1568_v9, %v6321_v18  ;;  %v5265_v29 = vpop.eup %5264  ;;  %v6547_v1 = vadd.f32 %v3002_v31, %v2739_v59  ;;  %v2754_v55 = vmul.f32 %v5263_v0, %v6356_v20  ;;  %5290 = vtanh.f32 %v1454_v30  ;;  %v1457_v45 = vpop.f32.mrf.mxu1  ;;  %v2510_v30 = vld [vmem:[%s7457_s8 + $0x8] sm:$0xff] }
 0x25e   :  { %v1570_v8 = vpop.f32.mrf.mxu0  ;;  %v5267_v50 = vpop.eup %5266  ;;  %5292 = vtanh.f32 %v1567_v54  ;;  %v1458_v60 = vadd.f32 %v1457_v45, %v6309_v22  ;;  %v6555_v56 = vrot.slane %v6521_v4, %v6302_v17  ;;  %v2755_v59 = vmul.f32 %v5261_v5, %v6364_v34 }
 0x25f   :  { %v1571_v53 = vadd.f32 %v1570_v8, %v6313_v23  ;;  %v5269_v9 = vpop.eup %5268  ;;  %v3019_v31 = vadd.f32 %v2754_v55, %v2753_v44  ;;  %5294 = vtanh.f32 %v1456_v27  ;;  %v1459_v25 = vpop.f32.mrf.mxu1  ;;  %v6563_v22 = vrot.slane %v6521_v4, %v6305_v21 }
 0x260   :  { %v1572_v0 = vpop.f32.mrf.mxu0  ;;  %v5271_v23 = vpop.eup %5270  ;;  %v2756_v54 = vmul.f32 %v5265_v29, %v6373_v42  ;;  %5296 = vtanh.f32 %v1569_v43  ;;  %v1460_v45 = vadd.f32 %v1459_v25, %v6317_v15  ;;  %v2769_v55 = vmul.f32 %v5267_v50, %v6352_v46 }
 0x261   :  { %v1573_v5 = vadd.f32 %v1572_v0, %v6321_v18  ;;  %v6568_v44 = vpop.eup %5272  ;;  %v3020_v27 = vadd.f32 %v3019_v31, %v2755_v59  ;;  %v2770_v8 = vmul.f32 %v5271_v23, %v6356_v20  ;;  %5298 = vtanh.f32 %v1458_v60  ;;  %v1609_v28 = vpop.f32.mrf.mxu1 }
 0x262   :  { %v1722_v37 = vpop.f32.mrf.mxu0  ;;  %v5275_v36 = vpop.eup %5274  ;;  %5300 = vtanh.f32 %v1571_v53  ;;  %v1610_v11 = vadd.f32 %v1609_v28, %v6409_v35  ;;  %v6575_v15 = vrot.slane %v2510_v30, %v6294_v12  ;;  %v2771_v59 = vmul.f32 %v5269_v9, %v6364_v34 }
 0x263   :  { %v1723_v29 = vadd.f32 %v1722_v37, %v6413_v32  ;;  %v5277_v18 = vpop.eup %5276  ;;  %v6577_v43 = vadd.f32 %v3020_v27, %v2756_v54  ;;  %v3036_v50 = vadd.f32 %v2770_v8, %v2769_v55  ;;  %5302 = vtanh.f32 %v1460_v45  ;;  %v1611_v31 = vpop.f32.mrf.mxu1 }
 0x264   :  { %v1724_v60 = vpop.f32.mrf.mxu0  ;;  %v5279_v25 = vpop.eup %5278  ;;  %5304 = vtanh.f32 %v1573_v5  ;;  %v1612_v53 = vadd.f32 %v1611_v31, %v6459_v63  ;;  %v6583_v37 = vrot.slane %v2510_v30, %v6297_v13  ;;  %v2785_v23 = vmul.f32 %v5275_v36, %v6352_v46 }
 0x265   :  { %v1725_v28 = vadd.f32 %v1724_v60, %v6473_v41  ;;  %v5281_v12 = vpop.eup %5280  ;;  %v6585_v0 = vadd.f32 %v3036_v50, %v2771_v59  ;;  %v2786_v9 = vmul.f32 %v5279_v25, %v6356_v20  ;;  %5306 = vtanh.f32 %v1610_v11  ;;  %v1613_v54 = vpop.f32.mrf.mxu1 }
 0x266   :  { %v1726_v45 = vpop.f32.mrf.mxu0  ;;  %v5283_v27 = vpop.eup %5282  ;;  %5308 = vtanh.f32 %v1723_v29  ;;  %v1614_v5 = vadd.f32 %v1613_v54, %v6409_v35  ;;  %v6592_v8 = vrot.slane %v2510_v30, %v6302_v17  ;;  %v2787_v59 = vmul.f32 %v5277_v18, %v6364_v34 }
 0x267   :  { %v1727_v55 = vadd.f32 %v1726_v45, %v6413_v32  ;;  %v5285_v13 = vpop.eup %5284  ;;  %v3053_v50 = vadd.f32 %v2786_v9, %v2785_v23  ;;  %5310 = vtanh.f32 %v1612_v53  ;;  %v1615_v36 = vpop.f32.mrf.mxu1  ;;  %v6596_v11 = vrot.slane %v2510_v30, %v6305_v21 }
 0x268   :  { %v1728_v31 = vpop.f32.mrf.mxu0  ;;  %v5287_v60 = vpop.eup %5286  ;;  %v2788_v29 = vmul.f32 %v5281_v12, %v6373_v42  ;;  %5312 = vtanh.f32 %v1725_v28  ;;  %v1616_v25 = vadd.f32 %v1615_v36, %v6459_v63  ;;  %v2801_v10 = vmul.f32 %v5283_v27, %v6352_v46 }
 0x269   :  { %v1729_v54 = vadd.f32 %v1728_v31, %v6473_v41  ;;  %v5289_v17 = vpop.eup %5288  ;;  %v3054_v45 = vadd.f32 %v3053_v50, %v2787_v59  ;;  %v2802_v18 = vmul.f32 %v5287_v60, %v6356_v20  ;;  %5314 = vtanh.f32 %v1614_v5  ;;  %v1619_v53 = vpop.f32.mrf.mxu1 }
 0x26a   :  { %v1732_v23 = vpop.f32.mrf.mxu0  ;;  %v5291_v9 = vpop.eup %5290  ;;  %v2740_v21 = vmul.f32 %v6526_v40, %v6373_v42  ;;  %5316 = vtanh.f32 %v1727_v55  ;;  %v1620_v30 = vadd.f32 %v1619_v53, %v6409_v35  ;;  %v2803_v59 = vmul.f32 %v5285_v13, %v6364_v34 }
 0x26b   :  { %v1733_v28 = vadd.f32 %v1732_v23, %v6413_v32  ;;  %v5293_v12 = vpop.eup %5292  ;;  %v6607_v36 = vadd.f32 %v3054_v45, %v2788_v29  ;;  %v3070_v27 = vadd.f32 %v2802_v18, %v2801_v10  ;;  %5318 = vtanh.f32 %v1616_v25  ;;  %v1621_v50 = vpop.f32.mrf.mxu1 }
 0x26c   :  { %v1734_v5 = vpop.f32.mrf.mxu0  ;;  %v5295_v31 = vpop.eup %5294  ;;  %v2804_v60 = vmul.f32 %v5289_v17, %v6373_v42  ;;  %5320 = vtanh.f32 %v1729_v54  ;;  %v1622_v40 = vadd.f32 %v1621_v50, %v6459_v63  ;;  %v2817_v23 = vmul.f32 %v5291_v9, %v6352_v46 }
 0x26d   :  { %v1735_v55 = vadd.f32 %v1734_v5, %v6473_v41  ;;  %v5297_v53 = vpop.eup %5296  ;;  %v3071_v52 = vadd.f32 %v3070_v27, %v2803_v59  ;;  %v2818_v29 = vmul.f32 %v5295_v31, %v6356_v20  ;;  %5322 = vtanh.f32 %v1620_v30  ;;  %v1623_v13 = vpop.f32.mrf.mxu1 }
 0x26e   :  { %v1736_v10 = vpop.f32.mrf.mxu0  ;;  %v5299_v25 = vpop.eup %5298  ;;  %v6616_v45 = vadd.f32 %v6547_v1, %v2740_v21  ;;  %5324 = vtanh.f32 %v1733_v28  ;;  %v1624_v54 = vadd.f32 %v1623_v13, %v6409_v35  ;;  %v2819_v59 = vmul.f32 %v5293_v12, %v6364_v34 }
 0x26f   :  { %v1737_v17 = vadd.f32 %v1736_v10, %v6413_v32  ;;  %v5301_v18 = vpop.eup %5300  ;;  %v6620_v50 = vadd.f32 %v3071_v52, %v2804_v60  ;;  %v3087_v9 = vadd.f32 %v2818_v29, %v2817_v23  ;;  %5326 = vtanh.f32 %v1622_v40  ;;  %v1625_v27 = vpop.f32.mrf.mxu1 }
 0x270   :  { %v1738_v30 = vpop.f32.mrf.mxu0  ;;  %v5303_v5 = vpop.eup %5302  ;;  %v2820_v31 = vmul.f32 %v5297_v53, %v6373_v42  ;;  %5328 = vtanh.f32 %v1735_v55  ;;  %v1626_v1 = vadd.f32 %v1625_v27, %v6459_v63  ;;  %v2833_v10 = vmul.f32 %v5299_v25, %v6352_v46 }
 0x271   :  { %v1739_v21 = vadd.f32 %v1738_v30, %v6473_v41  ;;  %v5305_v28 = vpop.eup %5304  ;;  %v3088_v13 = vadd.f32 %v3087_v9, %v2819_v59  ;;  %v2834_v52 = vmul.f32 %v5303_v5, %v6356_v20  ;;  %5330 = vtanh.f32 %v1624_v54  ;;  %v1629_v12 = vpop.f32.mrf.mxu1 }
 0x272   :  { %v1742_v60 = vpop.f32.mrf.mxu0  ;;  %v5307_v40 = vpop.eup %5306  ;;  %v2835_v23 = vmul.f32 %v5301_v18, %v6364_v34  ;;  %5332 = vtanh.f32 %v1737_v17  ;;  %v1630_v53 = vadd.f32 %v1629_v12, %v6409_v35  ;;  %v2836_v9 = vmul.f32 %v5305_v28, %v6373_v42 }
 0x273   :  { %v1743_v55 = vadd.f32 %v1742_v60, %v6413_v32  ;;  %v6631_v29 = vpop.eup %5308  ;;  %v6633_v27 = vadd.f32 %v3088_v13, %v2820_v31  ;;  %v3104_v59 = vadd.f32 %v2834_v52, %v2833_v10  ;;  %v2597_v46 = vmul.f32 %v5307_v40, %v6469_v61  ;;  %v1631_v20 = vpop.f32.mrf.mxu1 }
 0x274   :  { %5334 = vtanh.f32 %v1626_v1  ;;  %v1744_v25 = vpop.f32.mrf.mxu0  ;;  %v5311_v54 = vpop.eup %5310  ;;  %v1632_v34 = vadd.f32 %v1631_v20, %v6459_v63  ;;  %v2772_v52 = vmul.f32 %v6568_v44, %v6373_v42  ;;  %v6656_v44 = vrot.slane %v6521_v4, %v6379_v16 }
 0x275   :  { %5336 = vtanh.f32 %v1739_v21  ;;  %v1745_v17 = vadd.f32 %v1744_v25, %v6473_v41  ;;  %v6639_v18 = vpop.eup %5312  ;;  %v3105_v30 = vadd.f32 %v3104_v59, %v2835_v23  ;;  %v2852_v5 = vadd.f32 %v6395_v49, %v2597_v46  ;;  %v1633_v13 = vpop.f32.mrf.mxu1 }
 0x276   :  { %v2598_v31 = vmul.f32 %v5311_v54, %v6502_v33  ;;  %5338 = vtanh.f32 %v1630_v53  ;;  %v1746_v1 = vpop.f32.mrf.mxu0  ;;  %v5315_v10 = vpop.eup %5314  ;;  %v1634_v21 = vadd.f32 %v1633_v13, %v6409_v35  ;;  %v6659_v20 = vadd.f32 %v6585_v0, %v2772_v52 }
 0x277   :  { %5340 = vtanh.f32 %v1743_v55  ;;  %v1747_v28 = vadd.f32 %v1746_v1, %v6413_v32  ;;  %v5317_v12 = vpop.eup %5316  ;;  %v6647_v60 = vadd.f32 %v3105_v30, %v2836_v9  ;;  %v2613_v49 = vmul.f32 %v5315_v10, %v6469_v61  ;;  %v1635_v23 = vpop.f32.mrf.mxu1 }
 0x278   :  { %v6649_v40 = vadd.f32 %v2852_v5, %v2598_v31  ;;  %5342 = vtanh.f32 %v1632_v34  ;;  %v1748_v53 = vpop.f32.mrf.mxu0  ;;  %v5319_v59 = vpop.eup %5318  ;;  %v1636_v46 = vadd.f32 %v1635_v23, %v6459_v63  ;;  %v6667_v31 = vrot.slane %v6521_v4, %v6393_v47 }
 0x279   :  { %5344 = vtanh.f32 %v1745_v17  ;;  %v1749_v42 = vadd.f32 %v1748_v53, %v6473_v41  ;;  %v5321_v55 = vpop.eup %5320  ;;  %v2869_v25 = vadd.f32 %v6415_v38, %v2613_v49  ;;  %v2614_v54 = vmul.f32 %v5319_v59, %v6502_v33  ;;  %v1639_v9 = vpop.f32.mrf.mxu1 }
 0x27a   :  { %5346 = vtanh.f32 %v1634_v21  ;;  %v1752_v34 = vpop.f32.mrf.mxu0  ;;  %v5323_v17 = vpop.eup %5322  ;;  %v1640_v30 = vadd.f32 %v1639_v9, %v6409_v35  ;;  %v2615_v0 = vmul.f32 %v5317_v12, %v6485_v39 }
 0x27b   :  { %5348 = vtanh.f32 %v1747_v28  ;;  %v1753_v5 = vadd.f32 %v1752_v34, %v6413_v32  ;;  %v5325_v13 = vpop.eup %5324  ;;  %v2870_v1 = vadd.f32 %v2869_v25, %v2614_v54  ;;  %v2629_v38 = vmul.f32 %v5323_v17, %v6469_v61  ;;  %v1641_v10 = vpop.f32.mrf.mxu1 }
 0x27c   :  { %5350 = vtanh.f32 %v1636_v46  ;;  %v1754_v52 = vpop.f32.mrf.mxu0  ;;  %v5327_v21 = vpop.eup %5326  ;;  %v2616_v28 = vmul.f32 %v5321_v55, %v6516_v57  ;;  %v1642_v49 = vadd.f32 %v1641_v10, %v6459_v63  ;;  %v2631_v34 = vmul.f32 %v5325_v13, %v6485_v39 }
 0x27d   :  { %5352 = vtanh.f32 %v1749_v42  ;;  %v1755_v23 = vadd.f32 %v1754_v52, %v6473_v41  ;;  %v5329_v53 = vpop.eup %5328  ;;  %v2871_v59 = vadd.f32 %v2870_v1, %v2615_v0  ;;  %v2886_v9 = vadd.f32 %v6430_v26, %v2629_v38  ;;  %v1643_v25 = vpop.f32.mrf.mxu1 }
 0x27e   :  { %v2630_v12 = vmul.f32 %v5327_v21, %v6502_v33  ;;  %5354 = vtanh.f32 %v1640_v30  ;;  %v1756_v54 = vpop.f32.mrf.mxu0  ;;  %v5331_v46 = vpop.eup %5330  ;;  %v1644_v55 = vadd.f32 %v1643_v25, %v6409_v35  ;;  %v2632_v38 = vmul.f32 %v5329_v53, %v6516_v57 }
 0x27f   :  { %5356 = vtanh.f32 %v1753_v5  ;;  %v1757_v42 = vadd.f32 %v1756_v54, %v6413_v32  ;;  %v5333_v17 = vpop.eup %5332  ;;  %v6679_v10 = vadd.f32 %v2871_v59, %v2616_v28  ;;  %v2645_v0 = vmul.f32 %v5331_v46, %v6469_v61  ;;  %v1645_v26 = vpop.f32.mrf.mxu1 }
 0x280   :  { %v2887_v52 = vadd.f32 %v2886_v9, %v2630_v12  ;;  %5358 = vtanh.f32 %v1642_v49  ;;  %v1758_v1 = vpop.f32.mrf.mxu0  ;;  %v1646_v13 = vadd.f32 %v1645_v26, %v6459_v63  ;;  %v2647_v12 = vmul.f32 %v5333_v17, %v6485_v39 }
 0x281   :  { %v5335_v30 = vpop.eup %5334  ;;  %5360 = vtanh.f32 %v1755_v23  ;;  %v1759_v5 = vadd.f32 %v1758_v1, %v6473_v41  ;;  %v2903_v54 = vadd.f32 %v6445_v2, %v2645_v0  ;;  %v1649_v59 = vpop.f32.mrf.mxu1 }
 0x282   :  { %v5337_v21 = vpop.eup %5336  ;;  %v2888_v25 = vadd.f32 %v2887_v52, %v2631_v34  ;;  %v2646_v28 = vmul.f32 %v5335_v30, %v6502_v33  ;;  %5362 = vtanh.f32 %v1644_v55  ;;  %v1762_v9 = vpop.f32.mrf.mxu0  ;;  %v1650_v53 = vadd.f32 %v1649_v59, %v6409_v35 }
 0x283   :  { %v5339_v49 = vpop.eup %5338  ;;  %5364 = vtanh.f32 %v1757_v42  ;;  %v1763_v23 = vadd.f32 %v1762_v9, %v6413_v32  ;;  %v1651_v2 = vpop.f32.mrf.mxu1  ;;  %v2648_v0 = vmul.f32 %v5337_v21, %v6516_v57 }
 0x284   :  { %v5341_v46 = vpop.eup %5340  ;;  %v6690_v26 = vadd.f32 %v2888_v25, %v2632_v38  ;;  %v2904_v1 = vadd.f32 %v2903_v54, %v2646_v28  ;;  %v2661_v34 = vmul.f32 %v5339_v49, %v6469_v61  ;;  %5366 = vtanh.f32 %v1646_v13  ;;  %v1764_v52 = vpop.f32.mrf.mxu0 }
 0x285   :  { %v5343_v55 = vpop.eup %5342  ;;  %5368 = vtanh.f32 %v1759_v5  ;;  %v1652_v17 = vadd.f32 %v1651_v2, %v6459_v63  ;;  %v1765_v42 = vadd.f32 %v1764_v52, %v6473_v41  ;;  %v1653_v25 = vpop.f32.mrf.mxu1  ;;  %v2663_v28 = vmul.f32 %v5341_v46, %v6485_v39 }
 0x286   :  { %v5345_v30 = vpop.eup %5344  ;;  %v2905_v59 = vadd.f32 %v2904_v1, %v2647_v12  ;;  %v2920_v9 = vadd.f32 %v6461_v58, %v2661_v34  ;;  %v2662_v38 = vmul.f32 %v5343_v55, %v6502_v33  ;;  %5370 = vtanh.f32 %v1650_v53  ;;  %v1766_v54 = vpop.f32.mrf.mxu0 }
 0x287   :  { %v5347_v13 = vpop.eup %5346  ;;  %5372 = vtanh.f32 %v1763_v23  ;;  %v1654_v21 = vadd.f32 %v1653_v25, %v6409_v35  ;;  %v1767_v5 = vadd.f32 %v1766_v54, %v6413_v32  ;;  %v1655_v58 = vpop.f32.mrf.mxu1  ;;  %v2664_v34 = vmul.f32 %v5345_v30, %v6516_v57 }
 0x288   :  { %v5349_v49 = vpop.eup %5348  ;;  %v6701_v2 = vadd.f32 %v2905_v59, %v2648_v0  ;;  %v2921_v52 = vadd.f32 %v2920_v9, %v2662_v38  ;;  %v2677_v12 = vmul.f32 %v5347_v13, %v6469_v61  ;;  %5374 = vtanh.f32 %v1652_v17  ;;  %v1768_v1 = vpop.f32.mrf.mxu0 }
 0x289   :  { %v5351_v53 = vpop.eup %5350  ;;  %5376 = vtanh.f32 %v1765_v42  ;;  %v1656_v46 = vadd.f32 %v1655_v58, %v6459_v63  ;;  %v1769_v23 = vadd.f32 %v1768_v1, %v6473_v41  ;;  %v1659_v59 = vpop.f32.mrf.mxu1  ;;  %v2679_v38 = vmul.f32 %v5349_v49, %v6485_v39 }
 0x28a   :  { %v5353_v55 = vpop.eup %5352  ;;  %v2922_v25 = vadd.f32 %v2921_v52, %v2663_v28  ;;  %v2937_v54 = vadd.f32 %v6480_v14, %v2677_v12  ;;  %v2678_v0 = vmul.f32 %v5351_v53, %v6502_v33  ;;  %5378 = vtanh.f32 %v1654_v21  ;;  %v1772_v9 = vpop.f32.mrf.mxu0 }
 0x28b   :  { %v5355_v17 = vpop.eup %5354  ;;  %5380 = vtanh.f32 %v1767_v5  ;;  %v1660_v30 = vadd.f32 %v1659_v59, %v6409_v35  ;;  %v1773_v42 = vadd.f32 %v1772_v9, %v6413_v32  ;;  %v1661_v14 = vpop.f32.mrf.mxu1  ;;  %v2680_v12 = vmul.f32 %v5353_v55, %v6516_v57 }
 0x28c   :  { %v5357_v13 = vpop.eup %5356  ;;  %v6712_v58 = vadd.f32 %v2922_v25, %v2664_v34  ;;  %v2938_v1 = vadd.f32 %v2937_v54, %v2678_v0  ;;  %v2693_v28 = vmul.f32 %v5355_v17, %v6469_v61  ;;  %5382 = vtanh.f32 %v1656_v46  ;;  %v1774_v52 = vpop.f32.mrf.mxu0 }
 0x28d   :  { %v5359_v21 = vpop.eup %5358  ;;  %5384 = vtanh.f32 %v1769_v23  ;;  %v1662_v49 = vadd.f32 %v1661_v14, %v6459_v63  ;;  %v1775_v5 = vadd.f32 %v1774_v52, %v6473_v41  ;;  %v1663_v25 = vpop.f32.mrf.mxu1  ;;  %v2695_v0 = vmul.f32 %v5357_v13, %v6485_v39 }
 0x28e   :  { %v5361_v53 = vpop.eup %5360  ;;  %v2939_v59 = vadd.f32 %v2938_v1, %v2679_v38  ;;  %v2954_v9 = vadd.f32 %v6504_v62, %v2693_v28  ;;  %v2694_v34 = vmul.f32 %v5359_v21, %v6502_v33  ;;  %5386 = vtanh.f32 %v1660_v30  ;;  %v1776_v54 = vpop.f32.mrf.mxu0 }
 0x28f   :  { %v5363_v46 = vpop.eup %5362  ;;  %5388 = vtanh.f32 %v1773_v42  ;;  %v1664_v55 = vadd.f32 %v1663_v25, %v6409_v35  ;;  %v1777_v23 = vadd.f32 %v1776_v54, %v6413_v32  ;;  %v1665_v62 = vpop.f32.mrf.mxu1  ;;  %v2696_v28 = vmul.f32 %v5361_v53, %v6516_v57 }
 0x290   :  { %v5365_v17 = vpop.eup %5364  ;;  %v6723_v14 = vadd.f32 %v2939_v59, %v2680_v12  ;;  %v2955_v52 = vadd.f32 %v2954_v9, %v2694_v34  ;;  %v2709_v38 = vmul.f32 %v5363_v46, %v6469_v61  ;;  %5390 = vtanh.f32 %v1662_v49  ;;  %v1778_v1 = vpop.f32.mrf.mxu0 }
 0x291   :  { %v5367_v30 = vpop.eup %5366  ;;  %5392 = vtanh.f32 %v1775_v5  ;;  %v1666_v13 = vadd.f32 %v1665_v62, %v6459_v63  ;;  %v1779_v42 = vadd.f32 %v1778_v1, %v6473_v41  ;;  %v1669_v59 = vpop.f32.mrf.mxu1  ;;  %v2711_v34 = vmul.f32 %v5365_v17, %v6485_v39 }
 0x292   :  { %v5369_v21 = vpop.eup %5368  ;;  %v2956_v25 = vadd.f32 %v2955_v52, %v2695_v0  ;;  %v2971_v54 = vadd.f32 %v6518_v3, %v2709_v38  ;;  %v2710_v12 = vmul.f32 %v5367_v30, %v6502_v33  ;;  %5394 = vtanh.f32 %v1664_v55  ;;  %v1782_v9 = vpop.f32.mrf.mxu0 }
 0x293   :  { %v5371_v49 = vpop.eup %5370  ;;  %5396 = vtanh.f32 %v1777_v23  ;;  %v1670_v53 = vadd.f32 %v1669_v59, %v6409_v35  ;;  %v1783_v5 = vadd.f32 %v1782_v9, %v6413_v32  ;;  %v1671_v52 = vpop.f32.mrf.mxu1  ;;  %v2712_v1 = vmul.f32 %v5369_v21, %v6516_v57 }
 0x294   :  { %v6734_v46 = vpop.eup %5372  ;;  %v6736_v62 = vadd.f32 %v2956_v25, %v2696_v28  ;;  %v2972_v0 = vadd.f32 %v2971_v54, %v2710_v12  ;;  %v2725_v3 = vmul.f32 %v5371_v49, %v6469_v61  ;;  %5398 = vtanh.f32 %v1666_v13  ;;  %v1784_v55 = vpop.f32.mrf.mxu0 }
 0x295   :  { %v5375_v38 = vpop.eup %5374  ;;  %5400 = vtanh.f32 %v1779_v42  ;;  %v1672_v23 = vadd.f32 %v1671_v52, %v6459_v63  ;;  %v1785_v17 = vadd.f32 %v1784_v55, %v6473_v41  ;;  %v1673_v54 = vpop.f32.mrf.mxu1  ;;  %v6750_v21 = vrot.slane %v6521_v4, %v6428_v19 }
 0x296   :  { %v6742_v30 = vpop.eup %5376  ;;  %v2973_v59 = vadd.f32 %v2972_v0, %v2711_v34  ;;  %v2988_v28 = vadd.f32 %v6538_v48, %v2725_v3  ;;  %v2726_v25 = vmul.f32 %v5375_v38, %v6502_v33  ;;  %5402 = vtanh.f32 %v1670_v53  ;;  %v1786_v13 = vpop.f32.mrf.mxu0 }
 0x297   :  { %v5379_v12 = vpop.eup %5378  ;;  %5404 = vtanh.f32 %v1783_v5  ;;  %v1674_v9 = vadd.f32 %v1673_v54, %v6409_v35  ;;  %v1787_v42 = vadd.f32 %v1786_v13, %v6413_v32  ;;  %7499 = vst [vmem:[#allocation41_spill] sm:$0xff] %v6750_v21  ;;  %v1675_v53 = vpop.f32.mrf.mxu1  ;;  %v6761_v38 = vrot.slane %v6521_v4, %v6443_v6 }
 0x298   :  { %v5381_v49 = vpop.eup %5380  ;;  %v6752_v52 = vadd.f32 %v2973_v59, %v2712_v1  ;;  %v6754_v34 = vadd.f32 %v2988_v28, %v2726_v25  ;;  %v2741_v48 = vmul.f32 %v5379_v12, %v6469_v61  ;;  %5406 = vtanh.f32 %v1672_v23  ;;  %v1788_v0 = vpop.f32.mrf.mxu0 }
 0x299   :  { %v5383_v3 = vpop.eup %5382  ;;  %5408 = vtanh.f32 %v1785_v17  ;;  %v1676_v5 = vadd.f32 %v1675_v53, %v6459_v63  ;;  %v1789_v55 = vadd.f32 %v1788_v0, %v6473_v41  ;;  %7500 = vst [vmem:[#allocation42_spill] sm:$0xff] %v6761_v38  ;;  %v6765_v1 = vmul.f32 %v6631_v29, %v6485_v39  ;;  %v1679_v28 = vpop.f32.mrf.mxu1 }
 0x29a   :  { %v5385_v54 = vpop.eup %5384  ;;  %v3005_v59 = vadd.f32 %v6616_v45, %v2741_v48  ;;  %v2742_v23 = vmul.f32 %v5383_v3, %v6502_v33  ;;  %5410 = vtanh.f32 %v1674_v9  ;;  %v1792_v17 = vpop.f32.mrf.mxu0  ;;  %v6771_v13 = vmul.f32 %v6639_v18, %v6516_v57 }
 0x29b   :  { %v5387_v25 = vpop.eup %5386  ;;  %5412 = vtanh.f32 %v1787_v42  ;;  %v1680_v4 = vadd.f32 %v1679_v28, %v6409_v35  ;;  %v1793_v12 = vadd.f32 %v1792_v17, %v6413_v32  ;;  %v2743_v29 = vmul.f32 %v5381_v49, %v6485_v39  ;;  %v1681_v9 = vpop.f32.mrf.mxu1 }
 0x29c   :  { %v5389_v53 = vpop.eup %5388  ;;  %v3006_v0 = vadd.f32 %v3005_v59, %v2742_v23  ;;  %v2757_v45 = vmul.f32 %v5387_v25, %v6469_v61  ;;  %5414 = vtanh.f32 %v1676_v5  ;;  %v1794_v48 = vpop.f32.mrf.mxu0  ;;  %v2744_v51 = vmul.f32 %v5385_v54, %v6516_v57 }
 0x29d   :  { %v5391_v3 = vpop.eup %5390  ;;  %5416 = vtanh.f32 %v1789_v55  ;;  %v1682_v18 = vadd.f32 %v1681_v9, %v6459_v63  ;;  %v1795_v42 = vadd.f32 %v1794_v48, %v6473_v41  ;;  %v1683_v59 = vpop.f32.mrf.mxu1  ;;  %v2759_v25 = vmul.f32 %v5389_v53, %v6485_v39 }
 0x29e   :  { %v5393_v28 = vpop.eup %5392  ;;  %v3007_v38 = vadd.f32 %v3006_v0, %v2743_v29  ;;  %v3022_v17 = vadd.f32 %v6577_v43, %v2757_v45  ;;  %v2758_v49 = vmul.f32 %v5391_v3, %v6502_v33  ;;  %5418 = vtanh.f32 %v1680_v4  ;;  %v1796_v23 = vpop.f32.mrf.mxu0 }
 0x29f   :  { %v5395_v5 = vpop.eup %5394  ;;  %5420 = vtanh.f32 %v1793_v12  ;;  %v1684_v54 = vadd.f32 %v1683_v59, %v6409_v35  ;;  %v1797_v55 = vadd.f32 %v1796_v23, %v6413_v32  ;;  %v1685_v43 = vpop.f32.mrf.mxu1  ;;  %v2760_v45 = vmul.f32 %v5393_v28, %v6516_v57 }
 0x2a0   :  { %v5397_v9 = vpop.eup %5396  ;;  %v6785_v21 = vadd.f32 %v3007_v38, %v2744_v51  ;;  %v3023_v48 = vadd.f32 %v3022_v17, %v2758_v49  ;;  %v2773_v29 = vmul.f32 %v5395_v5, %v6469_v61  ;;  %5422 = vtanh.f32 %v1682_v18  ;;  %v1798_v0 = vpop.f32.mrf.mxu0 }
 0x2a1   :  { %v5399_v4 = vpop.eup %5398  ;;  %5424 = vtanh.f32 %v1795_v42  ;;  %v1686_v53 = vadd.f32 %v1685_v43, %v6459_v63  ;;  %v1799_v12 = vadd.f32 %v1798_v0, %v6473_v41  ;;  %v1835_v38 = vpop.f32.mrf.mxu1  ;;  %v2775_v49 = vmul.f32 %v5397_v9, %v6485_v39 }
 0x2a2   :  { %v5401_v35 = vpop.eup %5400  ;;  %v3024_v3 = vadd.f32 %v3023_v48, %v2759_v25  ;;  %v3039_v32 = vadd.f32 %v6659_v20, %v2773_v29  ;;  %v2774_v51 = vmul.f32 %v5399_v4, %v6502_v33  ;;  %5426 = vtanh.f32 %v1684_v54  ;;  %v1948_v17 = vpop.f32.mrf.mxu0  ;;  %v5098_v48 = vld [vmem:[#allocation11 + $0x78] sm:$0xff]  }
 0x2a3   :  { %v5403_v18 = vpop.eup %5402  ;;  %5428 = vtanh.f32 %v1797_v55  ;;  %v1836_v28 = vadd.f32 %v1835_v38, %v6536_v7  ;;  %v1949_v42 = vadd.f32 %v1948_v17, %v6545_v24  ;;  %v1837_v20 = vpop.f32.mrf.mxu1  ;;  %v2776_v54 = vmul.f32 %v5401_v35, %v6516_v57  ;;  %v5099_v29 = vld [vmem:[#allocation11 + $0x38] sm:$0xff]   ;;  %4928 = vmatprep.subr.bf16.mxu1 %v5098_v48 }
 0x2a4   :  { %v5405_v63 = vpop.eup %5404  ;;  %v6796_v59 = vadd.f32 %v3024_v3, %v2760_v45  ;;  %v3040_v41 = vadd.f32 %v3039_v32, %v2774_v51  ;;  %v2789_v23 = vmul.f32 %v5403_v18, %v6469_v61  ;;  %5430 = vtanh.f32 %v1686_v53  ;;  %v1950_v5 = vpop.f32.mrf.mxu0  ;;  %v5100_v32 = vld [vmem:[#allocation11 + $0x70] sm:$0xff]   ;;  %4929 = vmatpush3.bf16.msra.mxu1 %v5099_v29  ;;  %v5102_v29 = vld [vmem:[#allocation11 + $0x68] sm:$0xff]  }
 0x2a5   :  { %v5407_v25 = vpop.eup %5406  ;;  %5432 = vtanh.f32 %v1799_v12  ;;  %v1838_v9 = vadd.f32 %v1837_v20, %v6555_v56  ;;  %v1951_v55 = vadd.f32 %v1950_v5, %v6563_v22  ;;  %v1839_v53 = vpop.f32.mrf.mxu1  ;;  %v2791_v35 = vmul.f32 %v5405_v63, %v6485_v39  ;;  %4930 = vmatprep.subr.bf16.mxu1 %v5100_v32 }
 0x2a6   :  { %v5409_v43 = vpop.eup %5408  ;;  %v3041_v0 = vadd.f32 %v3040_v41, %v2775_v49  ;;  %v3056_v4 = vadd.f32 %v6607_v36, %v2789_v23  ;;  %v2790_v45 = vmul.f32 %v5407_v25, %v6502_v33  ;;  %5434 = vtanh.f32 %v1836_v28  ;;  %v1952_v3 = vpop.f32.mrf.mxu0  ;;  %v5101_v23 = vld [vmem:[#allocation11 + $0x30] sm:$0xff]  }
 0x2a7   :  { %v5411_v51 = vpop.eup %5410  ;;  %5436 = vtanh.f32 %v1949_v42  ;;  %v1840_v12 = vadd.f32 %v1839_v53, %v6536_v7  ;;  %v1953_v38 = vadd.f32 %v1952_v3, %v6545_v24  ;;  %v1841_v28 = vpop.f32.mrf.mxu1  ;;  %v2792_v63 = vmul.f32 %v5409_v43, %v6516_v57 }
 0x2a8   :  { %v5413_v17 = vpop.eup %5412  ;;  %v6807_v18 = vadd.f32 %v3041_v0, %v2776_v54  ;;  %v3057_v49 = vadd.f32 %v3056_v4, %v2790_v45  ;;  %v2805_v36 = vmul.f32 %v5411_v51, %v6469_v61  ;;  %5438 = vtanh.f32 %v1838_v9  ;;  %v1954_v41 = vpop.f32.mrf.mxu0  ;;  %4931 = vmatpush3.bf16.msra.mxu1 %v5101_v23  ;;  %v5104_v23 = vld [vmem:[#allocation11 + $0x60] sm:$0xff]  }
 0x2a9   :  { %v5415_v20 = vpop.eup %5414  ;;  %5440 = vtanh.f32 %v1951_v55  ;;  %v1842_v42 = vadd.f32 %v1841_v28, %v6555_v56  ;;  %v1955_v5 = vadd.f32 %v1954_v41, %v6563_v22  ;;  %v1845_v9 = vpop.f32.mrf.mxu1  ;;  %v2807_v53 = vmul.f32 %v5413_v17, %v6485_v39  ;;  %4932 = vmatprep.subr.bf16.mxu1 %v5102_v29 }
 0x2aa   :  { %v5417_v25 = vpop.eup %5416  ;;  %v3058_v54 = vadd.f32 %v3057_v49, %v2791_v35  ;;  %v3073_v48 = vadd.f32 %v6620_v50, %v2805_v36  ;;  %v2806_v0 = vmul.f32 %v5415_v20, %v6502_v33  ;;  %5442 = vtanh.f32 %v1840_v12  ;;  %v1958_v4 = vpop.f32.mrf.mxu0  ;;  %v5103_v49 = vld [vmem:[#allocation11 + $0x28] sm:$0xff]  }
 0x2ab   :  { %v5419_v45 = vpop.eup %5418  ;;  %5444 = vtanh.f32 %v1953_v38  ;;  %v1846_v55 = vadd.f32 %v1845_v9, %v6536_v7  ;;  %v1959_v43 = vadd.f32 %v1958_v4, %v6545_v24  ;;  %v1847_v35 = vpop.f32.mrf.mxu1  ;;  %v2808_v28 = vmul.f32 %v5417_v25, %v6516_v57 }
 0x2ac   :  { %v5421_v3 = vpop.eup %5420  ;;  %v6818_v32 = vadd.f32 %v3058_v54, %v2792_v63  ;;  %v3074_v51 = vadd.f32 %v3073_v48, %v2806_v0  ;;  %v2821_v50 = vmul.f32 %v5419_v45, %v6469_v61  ;;  %5446 = vtanh.f32 %v1842_v42  ;;  %v1960_v12 = vpop.f32.mrf.mxu0  ;;  %4933 = vmatpush3.bf16.msra.mxu1 %v5103_v49  ;;  %v5106_v49 = vld [vmem:[#allocation11 + $0x58] sm:$0xff]  }
 0x2ad   :  { %v5423_v36 = vpop.eup %5422  ;;  %5448 = vtanh.f32 %v1955_v5  ;;  %v1848_v38 = vadd.f32 %v1847_v35, %v6555_v56  ;;  %v1961_v17 = vadd.f32 %v1960_v12, %v6563_v22  ;;  %v1849_v42 = vpop.f32.mrf.mxu1  ;;  %v2823_v9 = vmul.f32 %v5421_v3, %v6485_v39  ;;  %4934 = vmatprep.subr.bf16.mxu1 %v5104_v23 }
 0x2ae   :  { %v5425_v41 = vpop.eup %5424  ;;  %v3075_v20 = vadd.f32 %v3074_v51, %v2807_v53  ;;  %v3090_v63 = vadd.f32 %v6633_v27, %v2821_v50  ;;  %v2822_v54 = vmul.f32 %v5423_v36, %v6502_v33  ;;  %5450 = vtanh.f32 %v1846_v55  ;;  %v1962_v48 = vpop.f32.mrf.mxu0  ;;  %v5105_v51 = vld [vmem:[#allocation11 + $0x20] sm:$0xff]  }
 0x2af   :  { %v5427_v0 = vpop.eup %5426  ;;  %5452 = vtanh.f32 %v1959_v43  ;;  %v1850_v5 = vadd.f32 %v1849_v42, %v6536_v7  ;;  %v1963_v25 = vadd.f32 %v1962_v48, %v6545_v24  ;;  %v1851_v53 = vpop.f32.mrf.mxu1  ;;  %v2824_v35 = vmul.f32 %v5425_v41, %v6516_v57 }
 0x2b0   :  { %v5429_v4 = vpop.eup %5428  ;;  %v6829_v29 = vadd.f32 %v3075_v20, %v2808_v28  ;;  %v3091_v45 = vadd.f32 %v3090_v63, %v2822_v54  ;;  %v2837_v27 = vmul.f32 %v5427_v0, %v6469_v61  ;;  %5454 = vtanh.f32 %v1848_v38  ;;  %v1964_v55 = vpop.f32.mrf.mxu0  ;;  %v6842_v54 = vld [vmem:[%s7457_s8 + $0x8] sm:$0xff]  ;;  %4935 = vmatpush3.bf16.msra.mxu1 %v5105_v51 }
 0x2b1   :  { %v5431_v50 = vpop.eup %5430  ;;  %5456 = vtanh.f32 %v1961_v17  ;;  %v1852_v43 = vadd.f32 %v1851_v53, %v6555_v56  ;;  %v1965_v3 = vadd.f32 %v1964_v55, %v6563_v22  ;;  %v1855_v38 = vpop.f32.mrf.mxu1  ;;  %v2839_v48 = vmul.f32 %v5429_v4, %v6485_v39  ;;  %4936 = vmatprep.subr.bf16.mxu1 %v5106_v49 }
 0x2b2   :  { %v5433_v12 = vpop.eup %5432  ;;  %v3092_v36 = vadd.f32 %v3091_v45, %v2823_v9  ;;  %v3107_v28 = vadd.f32 %v6647_v60, %v2837_v27  ;;  %v2838_v61 = vmul.f32 %v5431_v50, %v6502_v33  ;;  %5458 = vtanh.f32 %v1850_v5  ;;  %v1968_v20 = vpop.f32.mrf.mxu0  ;;  %v5107_v5 = vld [vmem:[#allocation11 + $0x18] sm:$0xff]  }
 0x2b3   :  { %v5435_v63 = vpop.eup %5434  ;;  %5460 = vtanh.f32 %v1963_v25  ;;  %v1856_v41 = vadd.f32 %v1855_v38, %v6536_v7  ;;  %v1969_v17 = vadd.f32 %v1968_v20, %v6545_v24  ;;  %v6846_v60 = vrot.slane %v6842_v54, %v6379_v16  ;;  %v1857_v0 = vpop.f32.mrf.mxu1 }
 0x2b4   :  { %v6848_v33 = vpop.eup %5436  ;;  %v6850_v42 = vadd.f32 %v3092_v36, %v2824_v35  ;;  %v3108_v23 = vadd.f32 %v3107_v28, %v2838_v61  ;;  %5462 = vtanh.f32 %v1852_v43  ;;  %v1970_v9 = vpop.f32.mrf.mxu0  ;;  %v2840_v45 = vmul.f32 %v5433_v12, %v6516_v57  ;;  %v5108_v43 = vld [vmem:[#allocation11 + $0x50] sm:$0xff]   ;;  %4937 = vmatpush3.bf16.msra.mxu1 %v5107_v5 }
 0x2b5   :  { %v5439_v25 = vpop.eup %5438  ;;  %5464 = vtanh.f32 %v1965_v3  ;;  %v1858_v27 = vadd.f32 %v1857_v0, %v6555_v56  ;;  %v1971_v16 = vadd.f32 %v1970_v9, %v6563_v22  ;;  %v2601_v50 = vmul.f32 %v5435_v63, %v6575_v15  ;;  %v1859_v4 = vpop.f32.mrf.mxu1  ;;  %4938 = vmatprep.subr.bf16.mxu1 %v5108_v43 }
 0x2b6   :  { %v5441_v53 = vpop.eup %5440  ;;  %v3109_v55 = vadd.f32 %v3108_v23, %v2839_v48  ;;  %5466 = vtanh.f32 %v1856_v41  ;;  %v1972_v35 = vpop.f32.mrf.mxu0  ;;  %v2854_v51 = vadd.f32 %v6649_v40, %v6765_v1  ;;  %v1860_v3 = vadd.f32 %v1859_v4, %v6536_v7  ;;  %v5109_v1 = vld [vmem:[#allocation11 + $0x10] sm:$0xff]  }
 0x2b7   :  { %v5443_v36 = vpop.eup %5442  ;;  %5468 = vtanh.f32 %v1969_v17  ;;  %v1973_v12 = vadd.f32 %v1972_v35, %v6545_v24  ;;  %v6863_v28 = vrot.slane %v6842_v54, %v6428_v19  ;;  %v1861_v49 = vpop.f32.mrf.mxu1  ;;  %v6871_v17 = vmul.f32 %v6734_v46, %v6485_v39  ;;  %v5110_v39 = vld [vmem:[#allocation11 + $0x48] sm:$0xff]  }
 0x2b8   :  { %v5445_v61 = vpop.eup %5444  ;;  %v6865_v38 = vadd.f32 %v3109_v55, %v2840_v45  ;;  %v2617_v20 = vmul.f32 %v5443_v36, %v6575_v15  ;;  %5470 = vtanh.f32 %v1858_v27  ;;  %v1974_v63 = vpop.f32.mrf.mxu0  ;;  %v2855_v40 = vadd.f32 %v2854_v51, %v6771_v13  ;;  %4939 = vmatpush3.bf16.msra.mxu1 %v5109_v1  ;;  %v5111_v51 = vld [vmem:[#allocation11 + $0x8] sm:$0xff]  }
 0x2b9   :  { %v5447_v41 = vpop.eup %5446  ;;  %5472 = vtanh.f32 %v1971_v16  ;;  %v1862_v19 = vadd.f32 %v1861_v49, %v6555_v56  ;;  %v1975_v48 = vadd.f32 %v1974_v63, %v6563_v22  ;;  %v6879_v0 = vmul.f32 %v6742_v30, %v6516_v57  ;;  %v1865_v13 = vpop.f32.mrf.mxu1  ;;  %4940 = vmatprep.subr.bf16.mxu1 %v5110_v39 }
 0x2ba   :  { %v6875_v23 = vpop.eup %5448  ;;  %5474 = vtanh.f32 %v1860_v3  ;;  %v1978_v9 = vpop.f32.mrf.mxu0  ;;  %v2602_v5 = vmul.f32 %v5439_v25, %v6592_v8  ;;  %v2856_v45 = vadd.f32 %v2855_v40, %v2601_v50  ;;  %v1866_v27 = vadd.f32 %v1865_v13, %v6536_v7 }
 0x2bb   :  { %v5451_v46 = vpop.eup %5450  ;;  %5476 = vtanh.f32 %v1973_v12  ;;  %v1979_v16 = vadd.f32 %v1978_v9, %v6545_v24  ;;  %v6886_v55 = vrot.slane %v6842_v54, %v6393_v47  ;;  %v2618_v57 = vmul.f32 %v5447_v41, %v6592_v8  ;;  %v1867_v30 = vpop.f32.mrf.mxu1  ;;  %v5112_v12 = vld [vmem:[#allocation11 + $0x40] sm:$0xff]  }
 0x2bc   :  { %v5453_v4 = vpop.eup %5452  ;;  %5478 = vtanh.f32 %v1862_v19  ;;  %v1980_v35 = vpop.f32.mrf.mxu0  ;;  %v6891_v25 = vrot.slane %v6842_v54, %v6443_v6  ;;  %v2873_v50 = vadd.f32 %v6679_v10, %v2617_v20  ;;  %v2633_v36 = vmul.f32 %v5451_v46, %v6575_v15  ;;  %4941 = vmatpush3.bf16.msra.mxu1 %v5111_v51 }
 0x2bd   :  { %v5455_v43 = vpop.eup %5454  ;;  %5480 = vtanh.f32 %v1975_v48  ;;  %v1868_v47 = vadd.f32 %v1867_v30, %v6555_v56  ;;  %v1981_v3 = vadd.f32 %v1980_v35, %v6563_v22  ;;  %v1869_v63 = vpop.f32.mrf.mxu1  ;;  %v2603_v6 = vmul.f32 %v6848_v33, %v6583_v37  ;;  %4942 = vmatprep.subr.bf16.mxu1 %v5112_v12 }
 0x2be   :  { %v5457_v49 = vpop.eup %5456  ;;  %5482 = vtanh.f32 %v1866_v27  ;;  %v1982_v40 = vpop.f32.mrf.mxu0  ;;  %v2604_v10 = vmul.f32 %v5441_v53, %v6596_v11  ;;  %v2857_v54 = vadd.f32 %v2856_v45, %v2602_v5  ;;  %v1870_v1 = vadd.f32 %v1869_v63, %v6536_v7  ;;  %v5113_v53 = vld [vmem:[#allocation11] sm:$0xff]  }
 0x2bf   :  { %v5459_v20 = vpop.eup %5458  ;;  %5484 = vtanh.f32 %v1979_v16  ;;  %v1983_v41 = vadd.f32 %v1982_v40, %v6545_v24  ;;  %v2619_v19 = vmul.f32 %v5445_v61, %v6583_v37  ;;  %v2634_v13 = vmul.f32 %v5455_v43, %v6592_v8  ;;  %v1871_v39 = vpop.f32.mrf.mxu1  ;;  %v5114_v61 = vld [vmem:[#allocation11 + $0xf8] sm:$0xff]  }
 0x2c0   :  { %v5461_v48 = vpop.eup %5460  ;;  %v2649_v9 = vmul.f32 %v5459_v20, %v6575_v15  ;;  %5486 = vtanh.f32 %v1868_v47  ;;  %v1984_v46 = vpop.f32.mrf.mxu0  ;;  %v2874_v33 = vadd.f32 %v2873_v50, %v2618_v57  ;;  %v1872_v45 = vadd.f32 %v1871_v39, %v6555_v56  ;;  %4943 = vmatpush3.bf16.msra.mxu1 %v5113_v53 }
 0x2c1   :  { %v5463_v5 = vpop.eup %5462  ;;  %5488 = vtanh.f32 %v1981_v3  ;;  %v1985_v27 = vadd.f32 %v1984_v46, %v6563_v22  ;;  %v2890_v16 = vadd.f32 %v6690_v26, %v2633_v36  ;;  %v1875_v43 = vpop.f32.mrf.mxu1  ;;  %v2858_v57 = vadd.f32 %v2857_v54, %v2603_v6  ;;  %4950 = vmatprep.subr.bf16.mxu1 %v5114_v61 }
 0x2c2   :  { %v6908_v30 = vpop.eup %5464  ;;  %v2650_v35 = vmul.f32 %v5463_v5, %v6592_v8  ;;  %5490 = vtanh.f32 %v1870_v1  ;;  %v1988_v47 = vpop.f32.mrf.mxu0  ;;  %v2907_v50 = vadd.f32 %v6701_v2, %v2649_v9  ;;  %v1876_v3 = vadd.f32 %v1875_v43, %v6536_v7  ;;  %v5130_v9 = vld [vmem:[#allocation11 + $0x178] sm:$0xff]  }
 0x2c3   :  { %v5467_v51 = vpop.eup %5466  ;;  %5492 = vtanh.f32 %v1983_v41  ;;  %v1989_v63 = vadd.f32 %v1988_v47, %v6545_v24  ;;  %v2620_v26 = vmul.f32 %v6875_v23, %v6596_v11  ;;  %v1877_v12 = vpop.f32.mrf.mxu1  ;;  %v2875_v20 = vadd.f32 %v2874_v33, %v2619_v19  ;;  %v5131_v23 = vld [vmem:[#allocation11 + $0x138] sm:$0xff]   ;;  %4972 = vmatprep.subr.bf16.mxu0 %v5130_v9 }
 0x2c4   :  { %v5469_v36 = vpop.eup %5468  ;;  %5494 = vtanh.f32 %v1872_v45  ;;  %v1990_v40 = vpop.f32.mrf.mxu0  ;;  %v2635_v1 = vmul.f32 %v5453_v4, %v6583_v37  ;;  %v2891_v39 = vadd.f32 %v2890_v16, %v2634_v13  ;;  %v2665_v2 = vmul.f32 %v5467_v51, %v6575_v15  ;;  %4973 = vmatpush3.bf16.msra.mxu0 %v5131_v23 }
 0x2c5   :  { %v5471_v6 = vpop.eup %5470  ;;  %5496 = vtanh.f32 %v1985_v27  ;;  %v1878_v54 = vadd.f32 %v1877_v12, %v6555_v56  ;;  %v1991_v41 = vadd.f32 %v1990_v40, %v6563_v22  ;;  %v1879_v5 = vpop.f32.mrf.mxu1  ;;  %v6922_v33 = vadd.f32 %v2858_v57, %v2604_v10 }
 0x2c6   :  { %v6920_v46 = vpop.eup %5472  ;;  %5498 = vtanh.f32 %v1876_v3  ;;  %v1992_v19 = vpop.f32.mrf.mxu0  ;;  %v2636_v4 = vmul.f32 %v5457_v49, %v6596_v11  ;;  %v2908_v13 = vadd.f32 %v2907_v50, %v2650_v35  ;;  %v1880_v45 = vadd.f32 %v1879_v5, %v6536_v7 }
 0x2c7   :  { %v5475_v53 = vpop.eup %5474  ;;  %5500 = vtanh.f32 %v1989_v63  ;;  %v1993_v27 = vadd.f32 %v1992_v19, %v6545_v24  ;;  %v2651_v16 = vmul.f32 %v5461_v48, %v6583_v37  ;;  %v2666_v43 = vmul.f32 %v5471_v6, %v6592_v8  ;;  %v1881_v10 = vpop.f32.mrf.mxu1  ;;  %v5134_v48 = vld [vmem:[#allocation11 + $0x170] sm:$0xff]  }
 0x2c8   :  { %v5477_v61 = vpop.eup %5476  ;;  %v2681_v47 = vmul.f32 %v5475_v53, %v6575_v15  ;;  %5502 = vtanh.f32 %v1878_v54  ;;  %v1994_v57 = vpop.f32.mrf.mxu0  ;;  %v2892_v51 = vadd.f32 %v2891_v39, %v2635_v1  ;;  %v1882_v35 = vadd.f32 %v1881_v10, %v6555_v56  ;;  %v5135_v63 = vld [vmem:[#allocation11 + $0x130] sm:$0xff]   ;;  %4974 = vmatprep.subr.bf16.mxu0 %v5134_v48 }
 0x2c9   :  { %v5479_v49 = vpop.eup %5478  ;;  %5504 = vtanh.f32 %v1991_v41  ;;  %v1995_v50 = vadd.f32 %v1994_v57, %v6563_v22  ;;  %v2924_v3 = vadd.f32 %v6712_v58, %v2665_v2  ;;  %v1885_v6 = vpop.f32.mrf.mxu1  ;;  %v2909_v9 = vadd.f32 %v2908_v13, %v2651_v16  ;;  %4975 = vmatpush3.bf16.msra.mxu0 %v5135_v63 }
 0x2ca   :  { %v5481_v12 = vpop.eup %5480  ;;  %v2682_v40 = vmul.f32 %v5479_v49, %v6592_v8  ;;  %5506 = vtanh.f32 %v1880_v45  ;;  %v1998_v54 = vpop.f32.mrf.mxu0  ;;  %v2941_v1 = vadd.f32 %v6723_v14, %v2681_v47  ;;  %v1886_v41 = vadd.f32 %v1885_v6, %v6536_v7  ;;  %v5139_v47 = vld [vmem:[#allocation11 + $0x128] sm:$0xff]  }
 0x2cb   :  { %v5483_v39 = vpop.eup %5482  ;;  %5508 = vtanh.f32 %v1993_v27  ;;  %v1999_v23 = vadd.f32 %v1998_v54, %v6545_v24  ;;  %v6937_v5 = vadd.f32 %v2875_v20, %v2620_v26  ;;  %v1887_v2 = vpop.f32.mrf.mxu1  ;;  %v2652_v53 = vmul.f32 %v6908_v30, %v6596_v11  ;;  %v5138_v20 = vld [vmem:[#allocation11 + $0x168] sm:$0xff]  }
 0x2cc   :  { %v5485_v58 = vpop.eup %5484  ;;  %5510 = vtanh.f32 %v1882_v35  ;;  %v2000_v19 = vpop.f32.mrf.mxu0  ;;  %v2667_v13 = vmul.f32 %v5469_v36, %v6583_v37  ;;  %v2925_v45 = vadd.f32 %v2924_v3, %v2666_v43  ;;  %v1888_v27 = vadd.f32 %v1887_v2, %v6555_v56  ;;  %4976 = vmatprep.subr.bf16.mxu0 %v5138_v20 }
 0x2cd   :  { %v5487_v14 = vpop.eup %5486  ;;  %5512 = vtanh.f32 %v1995_v50  ;;  %v2001_v16 = vadd.f32 %v2000_v19, %v6563_v22  ;;  %v2942_v26 = vadd.f32 %v2941_v1, %v2682_v40  ;;  %v2697_v57 = vmul.f32 %v5483_v39, %v6575_v15  ;;  %v1889_v49 = vpop.f32.mrf.mxu1  ;;  %4977 = vmatpush3.bf16.msra.mxu0 %v5139_v47 }
 0x2ce   :  { %v5489_v10 = vpop.eup %5488  ;;  %5514 = vtanh.f32 %v1886_v41  ;;  %v2002_v35 = vpop.f32.mrf.mxu0  ;;  %v6945_v30 = vadd.f32 %v2892_v51, %v2636_v4  ;;  %v6947_v36 = vadd.f32 %v2909_v9, %v2652_v53  ;;  %v1890_v50 = vadd.f32 %v1889_v49, %v6536_v7 }
 0x2cf   :  { %v5491_v43 = vpop.eup %5490  ;;  %5516 = vtanh.f32 %v1999_v23  ;;  %v2003_v3 = vadd.f32 %v2002_v35, %v6545_v24  ;;  %v2683_v48 = vmul.f32 %v5477_v61, %v6583_v37  ;;  %v1891_v6 = vpop.f32.mrf.mxu1  ;;  %v2668_v4 = vmul.f32 %v6920_v46, %v6596_v11  ;;  %v5142_v61 = vld [vmem:[#allocation11 + $0x160] sm:$0xff]  }
 0x2d0   :  { %v5493_v63 = vpop.eup %5492  ;;  %v2713_v40 = vmul.f32 %v5491_v43, %v6575_v15  ;;  %5518 = vtanh.f32 %v1888_v27  ;;  %v2004_v54 = vpop.f32.mrf.mxu0  ;;  %v2926_v51 = vadd.f32 %v2925_v45, %v2667_v13  ;;  %v1892_v1 = vadd.f32 %v1891_v6, %v6555_v56  ;;  %v5143_v23 = vld [vmem:[#allocation11 + $0x120] sm:$0xff]   ;;  %4978 = vmatprep.subr.bf16.mxu0 %v5142_v61 }
 0x2d1   :  { %v5495_v9 = vpop.eup %5494  ;;  %5520 = vtanh.f32 %v2001_v16  ;;  %v2005_v39 = vadd.f32 %v2004_v54, %v6563_v22  ;;  %v2943_v41 = vadd.f32 %v2942_v26, %v2683_v48  ;;  %v2698_v19 = vmul.f32 %v5487_v14, %v6592_v8  ;;  %v1895_v53 = vpop.f32.mrf.mxu1  ;;  %4979 = vmatpush3.bf16.msra.mxu0 %v5143_v23  ;;  %v5147_v48 = vld [vmem:[#allocation11 + $0x118] sm:$0xff]  }
 0x2d2   :  { %v5497_v2 = vpop.eup %5496  ;;  %5522 = vtanh.f32 %v1890_v50  ;;  %v2008_v27 = vpop.f32.mrf.mxu0  ;;  %v2684_v20 = vmul.f32 %v5481_v12, %v6596_v11  ;;  %v2958_v46 = vadd.f32 %v6736_v62, %v2697_v57  ;;  %v1896_v45 = vadd.f32 %v1895_v53, %v6536_v7 }
 0x2d3   :  { %v5499_v13 = vpop.eup %5498  ;;  %5524 = vtanh.f32 %v2003_v3  ;;  %v2009_v16 = vadd.f32 %v2008_v27, %v6545_v24  ;;  %v2699_v26 = vmul.f32 %v5485_v58, %v6583_v37  ;;  %v2714_v14 = vmul.f32 %v5495_v9, %v6592_v8  ;;  %v1897_v49 = vpop.f32.mrf.mxu1  ;;  %v5146_v3 = vld [vmem:[#allocation11 + $0x158] sm:$0xff]  }
 0x2d4   :  { %v6963_v47 = vpop.eup %5500  ;;  %5526 = vtanh.f32 %v1892_v1  ;;  %v2010_v35 = vpop.f32.mrf.mxu0  ;;  %v6966_v43 = vadd.f32 %v2926_v51, %v2668_v4  ;;  %v2975_v62 = vadd.f32 %v6752_v52, %v2713_v40  ;;  %v1898_v57 = vadd.f32 %v1897_v49, %v6555_v56  ;;  %4980 = vmatprep.subr.bf16.mxu0 %v5146_v3 }
 0x2d5   :  { %v5503_v12 = vpop.eup %5502  ;;  %5528 = vtanh.f32 %v2005_v39  ;;  %v2011_v50 = vadd.f32 %v2010_v35, %v6563_v22  ;;  %v6971_v58 = vadd.f32 %v2943_v41, %v2684_v20  ;;  %v1899_v54 = vpop.f32.mrf.mxu1  ;;  %v6976_v4 = vmul.f32 %v5489_v10, %v6596_v11  ;;  %4981 = vmatpush3.bf16.msra.mxu0 %v5147_v48 }
 0x2d6   :  { %v6973_v6 = vpop.eup %5504  ;;  %5530 = vtanh.f32 %v1896_v45  ;;  %v2012_v9 = vpop.f32.mrf.mxu0  ;;  %v2959_v52 = vadd.f32 %v2958_v46, %v2698_v19  ;;  %v2715_v40 = vmul.f32 %v5493_v63, %v6583_v37  ;;  %v2729_v1 = vmul.f32 %v5499_v13, %v6575_v15  ;;  %v5150_v45 = vld [vmem:[#allocation11 + $0x150] sm:$0xff]  }
 0x2d7   :  { %v5507_v51 = vpop.eup %5506  ;;  %5532 = vtanh.f32 %v2009_v16  ;;  %v1900_v39 = vadd.f32 %v1899_v54, %v6536_v7  ;;  %v2013_v41 = vadd.f32 %v2012_v9, %v6545_v24  ;;  %v1901_v53 = vpop.f32.mrf.mxu1  ;;  %v2716_v10 = vmul.f32 %v5497_v2, %v6596_v11  ;;  %v5151_v16 = vld [vmem:[#allocation11 + $0x110] sm:$0xff]   ;;  %4982 = vmatprep.subr.bf16.mxu0 %v5150_v45 }
 0x2d8   :  { %v5509_v61 = vpop.eup %5508  ;;  %v2745_v23 = vmul.f32 %v5507_v51, %v6575_v15  ;;  %5534 = vtanh.f32 %v1898_v57  ;;  %v2014_v27 = vpop.f32.mrf.mxu0  ;;  %v2976_v19 = vadd.f32 %v2975_v62, %v2714_v14  ;;  %v1902_v20 = vadd.f32 %v1901_v53, %v6555_v56 }
 0x2d9   :  { %v5511_v63 = vpop.eup %5510  ;;  %5536 = vtanh.f32 %v2011_v50  ;;  %v2015_v46 = vadd.f32 %v2014_v27, %v6563_v22  ;;  %v2990_v13 = vadd.f32 %v6754_v34, %v6871_v17  ;;  %v1905_v57 = vpop.f32.mrf.mxu1  ;;  %v2960_v2 = vadd.f32 %v2959_v52, %v2699_v26  ;;  %4983 = vmatpush3.bf16.msra.mxu0 %v5151_v16 }
 0x2da   :  { %v5513_v49 = vpop.eup %5512  ;;  %v2746_v35 = vmul.f32 %v5511_v63, %v6592_v8  ;;  %5538 = vtanh.f32 %v1900_v39  ;;  %v2018_v3 = vpop.f32.mrf.mxu0  ;;  %v3009_v14 = vadd.f32 %v6785_v21, %v2745_v23  ;;  %v1906_v50 = vadd.f32 %v1905_v57, %v6536_v7  ;;  %v5155_v23 = vld [vmem:[#allocation11 + $0x108] sm:$0xff]  }
 0x2db   :  { %v5515_v62 = vpop.eup %5514  ;;  %5540 = vtanh.f32 %v2013_v41  ;;  %v2019_v48 = vadd.f32 %v2018_v3, %v6545_v24  ;;  %v2991_v54 = vadd.f32 %v2990_v13, %v6879_v0  ;;  %v1907_v17 = vpop.f32.mrf.mxu1  ;;  %v2977_v51 = vadd.f32 %v2976_v19, %v2715_v40  ;;  %v5154_v0 = vld [vmem:[#allocation11 + $0x148] sm:$0xff]  }
 0x2dc   :  { %v5517_v34 = vpop.eup %5516  ;;  %5542 = vtanh.f32 %v1902_v20  ;;  %v2020_v9 = vpop.f32.mrf.mxu0  ;;  %v2730_v39 = vmul.f32 %v5503_v12, %v6592_v8  ;;  %v3010_v53 = vadd.f32 %v3009_v14, %v2746_v35  ;;  %v1908_v21 = vadd.f32 %v1907_v17, %v6555_v56  ;;  %4984 = vmatprep.subr.bf16.mxu0 %v5154_v0 }
 0x2dd   :  { %v5519_v26 = vpop.eup %5518  ;;  %5544 = vtanh.f32 %v2015_v46  ;;  %v2021_v52 = vadd.f32 %v2020_v9, %v6563_v22  ;;  %v2731_v41 = vmul.f32 %v6963_v47, %v6583_v37  ;;  %v2761_v63 = vmul.f32 %v5515_v62, %v6575_v15  ;;  %v1909_v40 = vpop.f32.mrf.mxu1  ;;  %4985 = vmatpush3.bf16.msra.mxu0 %v5155_v23  ;;  %v7501_v23 = vld [vmem:[#allocation41_spill] sm:$0xff] }
 0x2de   :  { %v6998_v27 = vpop.eup %5520  ;;  %5546 = vtanh.f32 %v1906_v50  ;;  %v2022_v12 = vpop.f32.mrf.mxu0  ;;  %v2992_v19 = vadd.f32 %v2991_v54, %v2729_v1  ;;  %v2747_v20 = vmul.f32 %v5509_v61, %v6583_v37  ;;  %v1910_v13 = vadd.f32 %v1909_v40, %v6536_v7  ;;  %v7502_v40 = vld [vmem:[#allocation42_spill] sm:$0xff] }
 0x2df   :  { %v5523_v46 = vpop.eup %5522  ;;  %5548 = vtanh.f32 %v2019_v48  ;;  %v2023_v45 = vadd.f32 %v2022_v12, %v6545_v24  ;;  %v7005_v47 = vadd.f32 %v2960_v2, %v6976_v4  ;;  %v1911_v35 = vpop.f32.mrf.mxu1  ;;  %v7007_v3 = vadd.f32 %v2977_v51, %v2716_v10  ;;  %v5158_v4 = vld [vmem:[#allocation11 + $0x140] sm:$0xff]  }
 0x2e0   :  { %v5525_v16 = vpop.eup %5524  ;;  %5550 = vtanh.f32 %v1908_v21  ;;  %v2024_v57 = vpop.f32.mrf.mxu0  ;;  %v2748_v1 = vmul.f32 %v5513_v49, %v6596_v11  ;;  %v3011_v14 = vadd.f32 %v3010_v53, %v2747_v20  ;;  %v2777_v62 = vmul.f32 %v5523_v46, %v6575_v15  ;;  %v5159_v2 = vld [vmem:[#allocation11 + $0x100] sm:$0xff]   ;;  %4986 = vmatprep.subr.bf16.mxu0 %v5158_v4 }
 0x2e1   :  { %v5527_v61 = vpop.eup %5526  ;;  %5552 = vtanh.f32 %v2021_v52  ;;  %v1912_v7 = vadd.f32 %v1911_v35, %v6555_v56  ;;  %v2025_v24 = vadd.f32 %v2024_v57, %v6563_v22  ;;  %v2762_v48 = vmul.f32 %v5519_v26, %v6592_v8  ;;  %v2061_v10 = vpop.f32.mrf.mxu1  ;;  %4987 = vmatpush3.bf16.msra.mxu0 %v5159_v2 }
 0x2e2   :  { %v5529_v50 = vpop.eup %5528  ;;  %5554 = vtanh.f32 %v1910_v13  ;;  %v2174_v54 = vpop.f32.mrf.mxu0  ;;  %v2993_v17 = vadd.f32 %v2992_v19, %v2730_v39  ;;  %v3026_v49 = vadd.f32 %v6796_v59, %v2761_v63  ;;  %v2062_v51 = vadd.f32 %v2061_v10, %v6656_v44 }
 0x2e3   :  { %v5531_v9 = vpop.eup %5530  ;;  %5556 = vtanh.f32 %v2023_v45  ;;  %v2175_v53 = vadd.f32 %v2174_v54, %v6667_v31  ;;  %v2732_v56 = vmul.f32 %v6973_v6, %v6596_v11  ;;  %v2778_v26 = vmul.f32 %v5527_v61, %v6592_v8  ;;  %v2063_v21 = vpop.f32.mrf.mxu1 }
 0x2e4   :  { %v7019_v22 = vpop.eup %5532  ;;  %5558 = vtanh.f32 %v1912_v7  ;;  %v2176_v52 = vpop.f32.mrf.mxu0  ;;  %v7022_v39 = vadd.f32 %v3011_v14, %v2748_v1  ;;  %v2763_v59 = vmul.f32 %v5517_v34, %v6583_v37  ;;  %v2064_v63 = vadd.f32 %v2063_v21, %v7501_v23 }
 0x2e5   :  { %v5535_v0 = vpop.eup %5534  ;;  %5560 = vtanh.f32 %v2025_v24  ;;  %v2177_v12 = vadd.f32 %v2176_v52, %v7502_v40  ;;  %v3043_v6 = vadd.f32 %v6807_v18, %v2777_v62  ;;  %v2793_v20 = vmul.f32 %v5531_v9, %v6575_v15  ;;  %v2065_v46 = vpop.f32.mrf.mxu1 }
 0x2e6   :  { %v5537_v19 = vpop.eup %5536  ;;  %5562 = vtanh.f32 %v2062_v51  ;;  %v2178_v13 = vpop.f32.mrf.mxu0  ;;  %v2994_v45 = vadd.f32 %v2993_v17, %v2731_v41  ;;  %v3027_v35 = vadd.f32 %v3026_v49, %v2762_v48  ;;  %v2066_v34 = vadd.f32 %v2065_v46, %v6656_v44 }
 0x2e7   :  { %v5539_v57 = vpop.eup %5538  ;;  %5564 = vtanh.f32 %v2175_v53  ;;  %v2179_v1 = vadd.f32 %v2178_v13, %v6667_v31  ;;  %v2764_v14 = vmul.f32 %v6998_v27, %v6596_v11  ;;  %v2794_v18 = vmul.f32 %v5535_v0, %v6592_v8  ;;  %v2067_v62 = vpop.f32.mrf.mxu1 }
 0x2e8   :  { %v5541_v61 = vpop.eup %5540  ;;  %5566 = vtanh.f32 %v2064_v63  ;;  %v2180_v7 = vpop.f32.mrf.mxu0  ;;  %v2779_v24 = vmul.f32 %v5525_v16, %v6583_v37  ;;  %v3044_v4 = vadd.f32 %v3043_v6, %v2778_v26  ;;  %v2809_v2 = vmul.f32 %v5539_v57, %v6575_v15 }
 0x2e9   :  { %v5543_v41 = vpop.eup %5542  ;;  %5568 = vtanh.f32 %v2177_v12  ;;  %v2068_v48 = vadd.f32 %v2067_v62, %v7501_v23  ;;  %v2181_v10 = vadd.f32 %v2180_v7, %v7502_v40  ;;  %v2071_v27 = vpop.f32.mrf.mxu1  ;;  %v7038_v49 = vadd.f32 %v2994_v45, %v2732_v56 }
 0x2ea   :  { %v5545_v54 = vpop.eup %5544  ;;  %5570 = vtanh.f32 %v2066_v34  ;;  %v2184_v17 = vpop.f32.mrf.mxu0  ;;  %v3028_v9 = vadd.f32 %v3027_v35, %v2763_v59  ;;  %v3060_v51 = vadd.f32 %v6818_v32, %v2793_v20  ;;  %v2072_v16 = vadd.f32 %v2071_v27, %v6656_v44 }
 0x2eb   :  { %v5547_v53 = vpop.eup %5546  ;;  %5572 = vtanh.f32 %v2179_v1  ;;  %v2185_v26 = vadd.f32 %v2184_v17, %v6667_v31  ;;  %v2780_v21 = vmul.f32 %v5529_v50, %v6596_v11  ;;  %v2810_v0 = vmul.f32 %v5543_v41, %v6592_v8  ;;  %v2073_v63 = vpop.f32.mrf.mxu1 }
 0x2ec   :  { %v5549_v52 = vpop.eup %5548  ;;  %5574 = vtanh.f32 %v2068_v48  ;;  %v2186_v12 = vpop.f32.mrf.mxu0  ;;  %v3045_v6 = vadd.f32 %v3044_v4, %v2779_v24  ;;  %v3061_v56 = vadd.f32 %v3060_v51, %v2794_v18  ;;  %v2074_v32 = vadd.f32 %v2073_v63, %v7501_v23 }
 0x2ed   :  { %v5551_v46 = vpop.eup %5550  ;;  %5576 = vtanh.f32 %v2181_v10  ;;  %v2187_v59 = vadd.f32 %v2186_v12, %v7502_v40  ;;  %v3077_v20 = vadd.f32 %v6829_v29, %v2809_v2  ;;  %v2075_v50 = vpop.f32.mrf.mxu1  ;;  %v7050_v35 = vadd.f32 %v3028_v9, %v2764_v14 }
 0x2ee   :  { %v7048_v13 = vpop.eup %5552  ;;  %5578 = vtanh.f32 %v2072_v16  ;;  %v2188_v45 = vpop.f32.mrf.mxu0  ;;  %v2795_v57 = vmul.f32 %v7019_v22, %v6583_v37  ;;  %v2796_v34 = vmul.f32 %v5537_v19, %v6596_v11  ;;  %v2825_v18 = vmul.f32 %v5547_v53, %v6575_v15 }
 0x2ef   :  { %v5555_v1 = vpop.eup %5554  ;;  %5580 = vtanh.f32 %v2185_v26  ;;  %v2076_v62 = vadd.f32 %v2075_v50, %v6656_v44  ;;  %v2189_v29 = vadd.f32 %v2188_v45, %v6667_v31  ;;  %v2077_v24 = vpop.f32.mrf.mxu1  ;;  %v7060_v14 = vadd.f32 %v3045_v6, %v2780_v21 }
 0x2f0   :  { %v7058_v7 = vpop.eup %5556  ;;  %5582 = vtanh.f32 %v2074_v32  ;;  %v2190_v4 = vpop.f32.mrf.mxu0  ;;  %v3062_v41 = vadd.f32 %v3061_v56, %v2795_v57  ;;  %v2811_v22 = vmul.f32 %v5541_v61, %v6583_v37  ;;  %v2078_v19 = vadd.f32 %v2077_v24, %v7501_v23 }
 0x2f1   :  { %v5559_v2 = vpop.eup %5558  ;;  %5584 = vtanh.f32 %v2187_v59  ;;  %v2191_v48 = vadd.f32 %v2190_v4, %v7502_v40  ;;  %v3078_v10 = vadd.f32 %v3077_v20, %v2810_v0  ;;  %v2826_v17 = vmul.f32 %v5551_v46, %v6592_v8  ;;  %v2081_v9 = vpop.f32.mrf.mxu1 }
 0x2f2   :  { %v7065_v27 = vpop.eup %5560  ;;  %5586 = vtanh.f32 %v2076_v62  ;;  %v2194_v51 = vpop.f32.mrf.mxu0  ;;  %v7069_v53 = vmul.f32 %v5545_v54, %v6596_v11  ;;  %v7072_v16 = vmul.f32 %v5549_v52, %v6583_v37  ;;  %v2082_v26 = vadd.f32 %v2081_v9, %v6656_v44 }
 0x2f3   :  { %v5563_v61 = vpop.eup %5562  ;;  %5588 = vtanh.f32 %v2189_v29  ;;  %v2195_v21 = vadd.f32 %v2194_v51, %v6667_v31  ;;  %v3094_v0 = vadd.f32 %v6850_v42, %v2825_v18  ;;  %v7078_v12 = vmul.f32 %v5555_v1, %v6575_v15  ;;  %v2083_v6 = vpop.f32.mrf.mxu1 }
 0x2f4   :  { %v5565_v63 = vpop.eup %5564  ;;  %5590 = vtanh.f32 %v2078_v19  ;;  %v2196_v56 = vpop.f32.mrf.mxu0  ;;  %v2605_v54 = vmul.f32 %v5563_v61, %v6846_v60  ;;  %v7081_v46 = vadd.f32 %v3062_v41, %v2796_v34  ;;  %v2084_v32 = vadd.f32 %v2083_v6, %v7501_v23 }
 0x2f5   :  { %v5567_v52 = vpop.eup %5566  ;;  %5592 = vtanh.f32 %v2191_v48  ;;  %v2197_v59 = vadd.f32 %v2196_v56, %v7502_v40  ;;  %v7085_v20 = vadd.f32 %v3078_v10, %v2811_v22  ;;  %v7088_v50 = vmul.f32 %v5559_v2, %v6592_v8  ;;  %v2085_v15 = vpop.f32.mrf.mxu1 }
 0x2f6   :  { %v5569_v42 = vpop.eup %5568  ;;  %5594 = vtanh.f32 %v2082_v26  ;;  %v2198_v45 = vpop.f32.mrf.mxu0  ;;  %v2606_v57 = vmul.f32 %v5567_v52, %v6863_v28  ;;  %v2860_v34 = vadd.f32 %v6922_v33, %v2605_v54  ;;  %v2086_v18 = vadd.f32 %v2085_v15, %v6656_v44 }
 0x2f7   :  { %v5571_v1 = vpop.eup %5570  ;;  %5596 = vtanh.f32 %v2195_v21  ;;  %v2199_v62 = vadd.f32 %v2198_v45, %v6667_v31  ;;  %v7094_v29 = vadd.f32 %v3094_v0, %v2826_v17  ;;  %v2087_v4 = vpop.f32.mrf.mxu1  ;;  %v2607_v41 = vmul.f32 %v5565_v63, %v6886_v55 }
 0x2f8   :  { %v5573_v24 = vpop.eup %5572  ;;  %5598 = vtanh.f32 %v2084_v32  ;;  %v2200_v8 = vpop.f32.mrf.mxu0  ;;  %v2861_v22 = vadd.f32 %v2860_v34, %v2606_v57  ;;  %v2621_v2 = vmul.f32 %v5571_v1, %v6846_v60  ;;  %v2088_v33 = vadd.f32 %v2087_v4, %v7501_v23 }
 0x2f9   :  { %v5575_v19 = vpop.eup %5574  ;;  %5600 = vtanh.f32 %v2197_v59  ;;  %v2201_v48 = vadd.f32 %v2200_v8, %v7502_v40  ;;  %v2608_v10 = vmul.f32 %v5569_v42, %v6891_v25  ;;  %v2091_v17 = vpop.f32.mrf.mxu1  ;;  %v2623_v56 = vmul.f32 %v5573_v24, %v6886_v55 }
 0x2fa   :  { %v5577_v9 = vpop.eup %5576  ;;  %5602 = vtanh.f32 %v2086_v18  ;;  %v2204_v51 = vpop.f32.mrf.mxu0  ;;  %v2862_v61 = vadd.f32 %v2861_v22, %v2607_v41  ;;  %v2622_v26 = vmul.f32 %v5575_v19, %v6863_v28  ;;  %v2877_v21 = vadd.f32 %v6937_v5, %v2621_v2 }
 0x2fb   :  { %v5579_v0 = vpop.eup %5578  ;;  %5604 = vtanh.f32 %v2199_v62  ;;  %v2092_v63 = vadd.f32 %v2091_v17, %v6656_v44  ;;  %v2205_v6 = vadd.f32 %v2204_v51, %v6667_v31  ;;  %v2093_v52 = vpop.f32.mrf.mxu1  ;;  %v2624_v34 = vmul.f32 %v5577_v9, %v6891_v25 }
 0x2fc   :  { %v5581_v54 = vpop.eup %5580  ;;  %5606 = vtanh.f32 %v2088_v33  ;;  %v2206_v32 = vpop.f32.mrf.mxu0  ;;  %v2863_v59 = vadd.f32 %v2862_v61, %v2608_v10  ;;  %v2878_v42 = vadd.f32 %v2877_v21, %v2622_v26  ;;  %v2637_v15 = vmul.f32 %v5579_v0, %v6846_v60 }
 0x2fd   :  { %v5583_v45 = vpop.eup %5582  ;;  %5608 = vtanh.f32 %v2201_v48  ;;  %v2094_v5 = vadd.f32 %v2093_v52, %v7501_v23  ;;  %v2207_v57 = vadd.f32 %v2206_v32, %v7502_v40  ;;  %v2095_v18 = vpop.f32.mrf.mxu1  ;;  %v2639_v19 = vmul.f32 %v5581_v54, %v6886_v55 }
 0x2fe   :  { %v5585_v1 = vpop.eup %5584  ;;  %5610 = vtanh.f32 %v2092_v63  ;;  %2864 = vadd.xlane.f32.xlu0 %v2863_v59  ;;  %v2208_v62 = vpop.f32.mrf.mxu0  ;;  %v2879_v24 = vadd.f32 %v2878_v42, %v2623_v56  ;;  %v2638_v4 = vmul.f32 %v5583_v45, %v6863_v28  ;;  %v2894_v8 = vadd.f32 %v6945_v30, %v2637_v15 }
 0x2ff   :  { %v5587_v41 = vpop.eup %5586  ;;  %5612 = vtanh.f32 %v2205_v6  ;;  %v2096_v22 = vadd.f32 %v2095_v18, %v6656_v44  ;;  %v2209_v2 = vadd.f32 %v2208_v62, %v6667_v31  ;;  %v2097_v48 = vpop.f32.mrf.mxu1  ;;  %v2640_v21 = vmul.f32 %v5585_v1, %v6891_v25 }
 0x300   :  { %v5589_v33 = vpop.eup %5588  ;;  %5614 = vtanh.f32 %v2094_v5  ;;  %v2210_v10 = vpop.f32.mrf.mxu0  ;;  %v2880_v9 = vadd.f32 %v2879_v24, %v2624_v34  ;;  %v2895_v17 = vadd.f32 %v2894_v8, %v2638_v4  ;;  %v2653_v51 = vmul.f32 %v5587_v41, %v6846_v60 }
 0x301   :  { %v5591_v61 = vpop.eup %5590  ;;  %5616 = vtanh.f32 %v2207_v57  ;;  %v2098_v30 = vadd.f32 %v2097_v48, %v7501_v23  ;;  %v2211_v26 = vadd.f32 %v2210_v10, %v7502_v40  ;;  %v2101_v63 = vpop.f32.mrf.mxu1  ;;  %v2655_v15 = vmul.f32 %v5589_v33, %v6886_v55 }
 0x302   :  { %v5593_v0 = vpop.eup %5592  ;;  %5618 = vtanh.f32 %v2096_v22  ;;  %2881 = vadd.xlane.f32.xlu0 %v2880_v9  ;;  %v2214_v6 = vpop.f32.mrf.mxu0  ;;  %v2896_v56 = vadd.f32 %v2895_v17, %v2639_v19  ;;  %v2654_v54 = vmul.f32 %v5591_v61, %v6863_v28  ;;  %v2911_v52 = vadd.f32 %v6947_v36, %v2653_v51 }
 0x303   :  { %v5595_v32 = vpop.eup %5594  ;;  %5620 = vtanh.f32 %v2209_v2  ;;  %v2102_v59 = vadd.f32 %v2101_v63, %v6656_v44  ;;  %v2215_v42 = vadd.f32 %v2214_v6, %v6667_v31  ;;  %v2103_v5 = vpop.f32.mrf.mxu1  ;;  %v2656_v4 = vmul.f32 %v5593_v0, %v6891_v25 }
 0x304   :  { %v5597_v45 = vpop.eup %5596  ;;  %5622 = vtanh.f32 %v2098_v30  ;;  %v2216_v57 = vpop.f32.mrf.mxu0  ;;  %v2897_v34 = vadd.f32 %v2896_v56, %v2640_v21  ;;  %v2912_v1 = vadd.f32 %v2911_v52, %v2654_v54  ;;  %v2669_v18 = vmul.f32 %v5595_v32, %v6846_v60 }
 0x305   :  { %v5599_v62 = vpop.eup %5598  ;;  %5624 = vtanh.f32 %v2211_v26  ;;  %v2104_v36 = vadd.f32 %v2103_v5, %v7501_v23  ;;  %v2217_v24 = vadd.f32 %v2216_v57, %v7502_v40  ;;  %v2105_v41 = vpop.f32.mrf.mxu1  ;;  %v2671_v17 = vmul.f32 %v5597_v45, %v6886_v55 }
 0x306   :  { %v5601_v8 = vpop.eup %5600  ;;  %5626 = vtanh.f32 %v2102_v59  ;;  %2898 = vadd.xlane.f32.xlu0 %v2897_v34  ;;  %v2218_v22 = vpop.f32.mrf.mxu0  ;;  %v2913_v2 = vadd.f32 %v2912_v1, %v2655_v15  ;;  %v2670_v19 = vmul.f32 %v5599_v62, %v6863_v28  ;;  %v2928_v33 = vadd.f32 %v6966_v43, %v2669_v18 }
 0x307   :  { %v5603_v48 = vpop.eup %5602  ;;  %5628 = vtanh.f32 %v2215_v42  ;;  %v2106_v10 = vadd.f32 %v2105_v41, %v6656_v44  ;;  %v2219_v9 = vadd.f32 %v2218_v22, %v6667_v31  ;;  %v2107_v61 = vpop.f32.mrf.mxu1  ;;  %v2672_v56 = vmul.f32 %v5601_v8, %v6891_v25 }
 0x308   :  { %v5605_v51 = vpop.eup %5604  ;;  %5630 = vtanh.f32 %v2104_v36  ;;  %v2220_v30 = vpop.f32.mrf.mxu0  ;;  %v2914_v26 = vadd.f32 %v2913_v2, %v2656_v4  ;;  %v2929_v21 = vadd.f32 %v2928_v33, %v2670_v19  ;;  %v2685_v0 = vmul.f32 %v5603_v48, %v6846_v60 }
 0x309   :  { %v5607_v63 = vpop.eup %5606  ;;  %5632 = vtanh.f32 %v2217_v24  ;;  %v2108_v43 = vadd.f32 %v2107_v61, %v7501_v23  ;;  %v2221_v6 = vadd.f32 %v2220_v30, %v7502_v40  ;;  %v2111_v52 = vpop.f32.mrf.mxu1  ;;  %v2687_v34 = vmul.f32 %v5605_v51, %v6886_v55 }
 0x30a   :  { %v5609_v54 = vpop.eup %5608  ;;  %5634 = vtanh.f32 %v2106_v10  ;;  %2915 = vadd.xlane.f32.xlu0 %v2914_v26  ;;  %v2224_v32 = vpop.f32.mrf.mxu0  ;;  %v2930_v59 = vadd.f32 %v2929_v21, %v2671_v17  ;;  %v2686_v42 = vmul.f32 %v5607_v63, %v6863_v28  ;;  %v2945_v15 = vadd.f32 %v6971_v58, %v2685_v0 }
 0x30b   :  { %v5611_v45 = vpop.eup %5610  ;;  %5636 = vtanh.f32 %v2219_v9  ;;  %v2112_v5 = vadd.f32 %v2111_v52, %v6656_v44  ;;  %v2225_v57 = vadd.f32 %v2224_v32, %v6667_v31  ;;  %v2113_v18 = vpop.f32.mrf.mxu1  ;;  %v2688_v22 = vmul.f32 %v5609_v54, %v6891_v25 }
 0x30c   :  { %v5613_v1 = vpop.eup %5612  ;;  %5638 = vtanh.f32 %v2108_v43  ;;  %v2226_v62 = vpop.f32.mrf.mxu0  ;;  %v2931_v36 = vadd.f32 %v2930_v59, %v2672_v56  ;;  %v2946_v24 = vadd.f32 %v2945_v15, %v2686_v42  ;;  %v2701_v4 = vmul.f32 %v5611_v45, %v6846_v60 }
 0x30d   :  { %v5615_v8 = vpop.eup %5614  ;;  %5640 = vtanh.f32 %v2221_v6  ;;  %v2114_v58 = vadd.f32 %v2113_v18, %v7501_v23  ;;  %v2227_v41 = vadd.f32 %v2226_v62, %v7502_v40  ;;  %v2115_v19 = vpop.f32.mrf.mxu1  ;;  %v2703_v30 = vmul.f32 %v5613_v1, %v6886_v55 }
 0x30e   :  { %v5617_v2 = vpop.eup %5616  ;;  %5642 = vtanh.f32 %v2112_v5  ;;  %2932 = vadd.xlane.f32.xlu0 %v2931_v36  ;;  %v2228_v33 = vpop.f32.mrf.mxu0  ;;  %v2947_v48 = vadd.f32 %v2946_v24, %v2687_v34  ;;  %v2702_v10 = vmul.f32 %v5615_v8, %v6863_v28  ;;  %v2962_v9 = vadd.f32 %v7005_v47, %v2701_v4 }
 0x30f   :  { %v5619_v17 = vpop.eup %5618  ;;  %5644 = vtanh.f32 %v2225_v57  ;;  %v2116_v51 = vadd.f32 %v2115_v19, %v6656_v44  ;;  %v2229_v61 = vadd.f32 %v2228_v33, %v6667_v31  ;;  %v2117_v21 = vpop.f32.mrf.mxu1  ;;  %v2704_v52 = vmul.f32 %v5617_v2, %v6891_v25 }
 0x310   :  { %v5621_v26 = vpop.eup %5620  ;;  %5646 = vtanh.f32 %v2114_v58  ;;  %v2230_v0 = vpop.f32.mrf.mxu0  ;;  %v2948_v63 = vadd.f32 %v2947_v48, %v2688_v22  ;;  %v2963_v43 = vadd.f32 %v2962_v9, %v2702_v10  ;;  %v2717_v6 = vmul.f32 %v5619_v17, %v6846_v60 }
 0x311   :  { %v5623_v56 = vpop.eup %5622  ;;  %5648 = vtanh.f32 %v2227_v41  ;;  %v2118_v47 = vadd.f32 %v2117_v21, %v7501_v23  ;;  %v2231_v54 = vadd.f32 %v2230_v0, %v7502_v40  ;;  %v2121_v59 = vpop.f32.mrf.mxu1  ;;  %v2719_v18 = vmul.f32 %v5621_v26, %v6886_v55 }
 0x312   :  { %v5625_v32 = vpop.eup %5624  ;;  %5650 = vtanh.f32 %v2116_v51  ;;  %2949 = vadd.xlane.f32.xlu0 %v2948_v63  ;;  %v2234_v42 = vpop.f32.mrf.mxu0  ;;  %v2964_v15 = vadd.f32 %v2963_v43, %v2703_v30  ;;  %v2718_v45 = vmul.f32 %v5623_v56, %v6863_v28  ;;  %v2979_v5 = vadd.f32 %v7007_v3, %v2717_v6 }
 0x313   :  { %v5627_v57 = vpop.eup %5626  ;;  %5652 = vtanh.f32 %v2229_v61  ;;  %v2122_v34 = vadd.f32 %v2121_v59, %v6656_v44  ;;  %v2235_v1 = vadd.f32 %v2234_v42, %v6667_v31  ;;  %v2123_v36 = vpop.f32.mrf.mxu1  ;;  %v2720_v2 = vmul.f32 %v5625_v32, %v6891_v25 }
 0x314   :  { %v5629_v62 = vpop.eup %5628  ;;  %5654 = vtanh.f32 %v2118_v47  ;;  %v2236_v24 = vpop.f32.mrf.mxu0  ;;  %v2965_v4 = vadd.f32 %v2964_v15, %v2704_v52  ;;  %v2980_v8 = vadd.f32 %v2979_v5, %v2718_v45  ;;  %v2733_v58 = vmul.f32 %v5627_v57, %v6846_v60 }
 0x315   :  { %v5631_v41 = vpop.eup %5630  ;;  %5656 = vtanh.f32 %v2231_v54  ;;  %v2124_v3 = vadd.f32 %v2123_v36, %v7501_v23  ;;  %v2237_v22 = vadd.f32 %v2236_v24, %v7502_v40  ;;  %v2125_v33 = vpop.f32.mrf.mxu1  ;;  %v2735_v26 = vmul.f32 %v5629_v62, %v6886_v55 }
 0x316   :  { %v5633_v19 = vpop.eup %5632  ;;  %5658 = vtanh.f32 %v2122_v34  ;;  %2966 = vadd.xlane.f32.xlu0 %v2965_v4  ;;  %v2238_v48 = vpop.f32.mrf.mxu0  ;;  %v2981_v10 = vadd.f32 %v2980_v8, %v2719_v18  ;;  %v2734_v9 = vmul.f32 %v5631_v41, %v6863_v28  ;;  %v2996_v17 = vadd.f32 %v7038_v49, %v2733_v58 }
 0x317   :  { %v5635_v51 = vpop.eup %5634  ;;  %5660 = vtanh.f32 %v2235_v1  ;;  %v2126_v61 = vadd.f32 %v2125_v33, %v6656_v44  ;;  %v2239_v30 = vadd.f32 %v2238_v48, %v6667_v31  ;;  %v2127_v0 = vpop.f32.mrf.mxu1  ;;  %v2736_v52 = vmul.f32 %v5633_v19, %v6891_v25 }
 0x318   :  { %v5637_v21 = vpop.eup %5636  ;;  %5662 = vtanh.f32 %v2124_v3  ;;  %v2240_v63 = vpop.f32.mrf.mxu0  ;;  %v2982_v43 = vadd.f32 %v2981_v10, %v2720_v2  ;;  %v2997_v6 = vadd.f32 %v2996_v17, %v2734_v9  ;;  %v2749_v56 = vmul.f32 %v5635_v51, %v6846_v60 }
 0x319   :  { %v5639_v47 = vpop.eup %5638  ;;  %5664 = vtanh.f32 %v2237_v22  ;;  %v2128_v49 = vadd.f32 %v2127_v0, %v7501_v23  ;;  %v2241_v54 = vadd.f32 %v2240_v63, %v7502_v40  ;;  %v2131_v59 = vpop.f32.mrf.mxu1  ;;  %v2751_v18 = vmul.f32 %v5637_v21, %v6886_v55 }
 0x31a   :  { %v5641_v32 = vpop.eup %5640  ;;  %5666 = vtanh.f32 %v2126_v61  ;;  %2983 = vadd.xlane.f32.xlu0 %v2982_v43  ;;  %v2244_v42 = vpop.f32.mrf.mxu0  ;;  %v2998_v15 = vadd.f32 %v2997_v6, %v2735_v26  ;;  %v2750_v45 = vmul.f32 %v5639_v47, %v6863_v28  ;;  %v3013_v5 = vadd.f32 %v7022_v39, %v2749_v56  ;;  %v3641_v56 = vld [vmem:[#allocation6] sm:$0xff] }
 0x31b   :  { %v5643_v57 = vpop.eup %5642  ;;  %5668 = vtanh.f32 %v2239_v30  ;;  %v2132_v34 = vadd.f32 %v2131_v59, %v6656_v44  ;;  %v2245_v1 = vadd.f32 %v2244_v42, %v6667_v31  ;;  %v2133_v36 = vpop.f32.mrf.mxu1  ;;  %v2752_v22 = vmul.f32 %v5641_v32, %v6891_v25  ;;  %v3645_v47 = vld [vmem:[#allocation6 + $0x20] sm:$0xff] }
 0x31c   :  { %v5645_v62 = vpop.eup %5644  ;;  %5670 = vtanh.f32 %v2128_v49  ;;  %v2246_v24 = vpop.f32.mrf.mxu0  ;;  %v2999_v4 = vadd.f32 %v2998_v15, %v2736_v52  ;;  %v3014_v8 = vadd.f32 %v3013_v5, %v2750_v45  ;;  %v2765_v58 = vmul.f32 %v5643_v57, %v6846_v60  ;;  %v7196_v5 = vld [vmem:[#allocation6 + $0x8] sm:$0xff] }
 0x31d   :  { %v5647_v41 = vpop.eup %5646  ;;  %5672 = vtanh.f32 %v2241_v54  ;;  %v2134_v39 = vadd.f32 %v2133_v36, %v7501_v23  ;;  %v2247_v3 = vadd.f32 %v2246_v24, %v7502_v40  ;;  %v2135_v19 = vpop.f32.mrf.mxu1  ;;  %v2767_v30 = vmul.f32 %v5645_v62, %v6886_v55  ;;  %v3643_v62 = vld [vmem:[#allocation6 + $0x10] sm:$0xff] }
 0x31e   :  { %v5649_v2 = vpop.eup %5648  ;;  %5674 = vtanh.f32 %v2132_v34  ;;  %3000 = vadd.xlane.f32.xlu1 %v2999_v4  ;;  %v2248_v33 = vpop.f32.mrf.mxu0  ;;  %v3015_v48 = vadd.f32 %v3014_v8, %v2751_v18  ;;  %v2766_v10 = vmul.f32 %v5647_v41, %v6863_v28  ;;  %v3030_v9 = vadd.f32 %v7050_v35, %v2765_v58  ;;  %v7199_v18 = vld [vmem:[#allocation6 + $0x28] sm:$0xff]  ;;  %v5115_v8 = vld [vmem:[#allocation11 + $0xb8] sm:$0xff]  }
 0x31f   :  { %v5651_v17 = vpop.eup %5650  ;;  %5676 = vtanh.f32 %v2245_v1  ;;  %v2136_v51 = vadd.f32 %v2135_v19, %v6656_v44  ;;  %v2249_v61 = vadd.f32 %v2248_v33, %v6667_v31  ;;  %v2137_v21 = vpop.f32.mrf.mxu1  ;;  %v2768_v31 = vmul.f32 %v5649_v2, %v6891_v25 }
 0x320   :  { %v5653_v26 = vpop.eup %5652  ;;  %5678 = vtanh.f32 %v2134_v39  ;;  %v2250_v0 = vpop.f32.mrf.mxu0  ;;  %v3016_v63 = vadd.f32 %v3015_v48, %v2752_v22  ;;  %v3031_v43 = vadd.f32 %v3030_v9, %v2766_v10  ;;  %v2781_v6 = vmul.f32 %v5651_v17, %v6846_v60  ;;  %v5116_v22 = vld [vmem:[#allocation11 + $0xf0] sm:$0xff]  }
 0x321   :  { %v5655_v49 = vpop.eup %5654  ;;  %5680 = vtanh.f32 %v2247_v3  ;;  %v2138_v35 = vadd.f32 %v2137_v21, %v7501_v23  ;;  %v2251_v44 = vadd.f32 %v2250_v0, %v7502_v40  ;;  %v2783_v15 = vmul.f32 %v5653_v26, %v6886_v55 }
 0x322   :  { %v5657_v54 = vpop.eup %5656  ;;  %5682 = vtanh.f32 %v2136_v51  ;;  %3017 = vadd.xlane.f32.xlu1 %v3016_v63  ;;  %v3032_v52 = vadd.f32 %v3031_v43, %v2767_v30  ;;  %v2782_v32 = vmul.f32 %v5655_v49, %v6863_v28  ;;  %v3047_v59 = vadd.f32 %v7060_v14, %v2781_v6  ;;  %v3647_v14 = vld [vmem:[#allocation6 + $0x30] sm:$0xff] }
 0x323   :  { %v5659_v42 = vpop.eup %5658  ;;  %5684 = vtanh.f32 %v2249_v61  ;;  %v3111_v45 = vadd.f32 %v6865_v38, %v7078_v12  ;;  %v4775_v23 = vcombine.low %v3641_v56, %v3645_v47  ;;  %v2784_v24 = vmul.f32 %v5657_v54, %v6891_v25  ;;  %v5117_v61 = vld [vmem:[#allocation11 + $0xb0] sm:$0xff]   ;;  %v5118_v63 = vld [vmem:[#allocation11 + $0xe8] sm:$0xff]  }
 0x324   :  { %v5661_v40 = vpop.eup %5660  ;;  %5686 = vtanh.f32 %v2138_v35  ;;  %v3033_v57 = vadd.f32 %v3032_v52, %v2768_v31  ;;  %v3048_v34 = vadd.f32 %v3047_v59, %v2782_v32  ;;  %v2797_v1 = vmul.f32 %v5659_v42, %v6846_v60  ;;  %v5119_v54 = vld [vmem:[#allocation11 + $0xa8] sm:$0xff]  }
 0x325   :  { %v5663_v36 = vpop.eup %5662  ;;  %v3080_v4 = vadd.f32 %v7085_v20, %v7069_v53  ;;  %v3096_v38 = vadd.f32 %v7094_v29, %v7072_v16  ;;  %v4776_v12 = vcombine.high %v3641_v56, %v3645_v47  ;;  %5688 = vtanh.f32 %v2251_v44 }
 0x326   :  { %v5665_v58 = vpop.eup %5664  ;;  %3034 = vadd.xlane.f32.xlu1 %v3033_v57  ;;  %v3049_v41 = vadd.f32 %v3048_v34, %v2783_v15  ;;  %v2798_v39 = vmul.f32 %v5663_v36, %v6863_v28  ;;  %v3064_v3 = vadd.f32 %v7081_v46, %v2797_v1  ;;  %v2799_v19 = vmul.f32 %v5661_v40, %v6886_v55  ;;  %v5120_v15 = vld [vmem:[#allocation11 + $0xe0] sm:$0xff]  }
 0x327   :  { %v5667_v2 = vpop.eup %5666  ;;  %v3112_v33 = vadd.f32 %v3111_v45, %v7088_v50  ;;  %4240 = vmatprep.mubr.bf16.mxu1 %v4776_v12  ;;  %v4778_v53 = vcombine.high %v7196_v5, %v7199_v18  ;;  %v4779_v16 = vcombine.low %v3643_v62, %v3647_v14  ;;  %v4780_v9 = vcombine.high %v3643_v62, %v3647_v14  ;;  %v5121_v14 = vld [vmem:[#allocation11 + $0xa0] sm:$0xff]  }
 0x328   :  { %v5669_v20 = vpop.eup %5668  ;;  %v3050_v29 = vadd.f32 %v3049_v41, %v2784_v24  ;;  %v3065_v48 = vadd.f32 %v3064_v3, %v2798_v39  ;;  %v2813_v10 = vmul.f32 %v5667_v2, %v6846_v60  ;;  %4241 = vmatmul.mubr.bf16.vlgmr.msra.gmra.mxu1 %v4775_v23  ;;  %v2800_v46 = vmul.f32 %v5665_v58, %v6891_v25  ;;  %v5123_v39 = vld [vmem:[#allocation11 + $0x98] sm:$0xff]  }
 0x329   :  { %v5671_v17 = vpop.eup %5670  ;;  %v2828_v51 = vmul.f32 %v7048_v13, %v6596_v11  ;;  %v2843_v50 = vmul.f32 %v7058_v7, %v6583_v37  ;;  %4951 = vmatpush3.bf16.msra.mxu1 %v5115_v8  ;;  %4281 = vmatprep.mubr.bf16.mxu1 %v4778_v53  ;;  %v2815_v49 = vmul.f32 %v5669_v20, %v6886_v55  ;;  %v5128_v53 = vld [vmem:[#allocation11 + $0xc0] sm:$0xff]   ;;  %v3644_v20 = vld [vmem:[#allocation6 + $0x18] sm:$0xff] }
 0x32a   :  { %v5673_v30 = vpop.eup %5672  ;;  %3051 = vadd.xlane.f32.xlu1 %v3050_v29  ;;  %v3066_v26 = vadd.f32 %v3065_v48, %v2799_v19  ;;  %v2814_v21 = vmul.f32 %v5671_v17, %v6863_v28  ;;  %v3081_v0 = vadd.f32 %v3080_v4, %v2813_v10  ;;  %4952 = vmatprep.subr.bf16.mxu1 %v5116_v22  ;;  %v5124_v22 = vld [vmem:[#allocation11 + $0xd0] sm:$0xff]   ;;  %v5133_v48 = vld [vmem:[#allocation11 + $0x1b8] sm:$0xff]  }
 0x32b   :  { %v5675_v43 = vpop.eup %5674  ;;  %v3097_v6 = vadd.f32 %v3096_v38, %v2828_v51  ;;  %v3113_v56 = vadd.f32 %v3112_v33, %v2843_v50  ;;  %4322 = vmatprep.mubr.bf16.mxu0 %v4780_v9  ;;  %v2816_v44 = vmul.f32 %v5673_v30, %v6891_v25  ;;  %v2844_v31 = vmul.f32 %v7065_v27, %v6596_v11  ;;  %v5122_v38 = vld [vmem:[#allocation11 + $0xd8] sm:$0xff]   ;;  %v5125_v19 = vld [vmem:[#allocation11 + $0x90] sm:$0xff]   ;;  %v5127_v33 = vld [vmem:[#allocation11 + $0x88] sm:$0xff]  }
 0x32c   :  { %v5677_v47 = vpop.eup %5676  ;;  %v3067_v13 = vadd.f32 %v3066_v26, %v2800_v46  ;;  %v3082_v37 = vadd.f32 %v3081_v0, %v2814_v21  ;;  %v2829_v7 = vmul.f32 %v5675_v43, %v6846_v60  ;;  %4323 = vmatmul.mubr.bf16.vlgmr.msra.gmra.mxu0 %v4779_v16  ;;  %v5132_v16 = vld [vmem:[#allocation11 + $0x1f8] sm:$0xff]   ;;  %v5136_v9 = vld [vmem:[#allocation11 + $0x1f0] sm:$0xff]   ;;  %v5140_v46 = vld [vmem:[#allocation11 + $0x1e8] sm:$0xff]  }
 0x32d   :  { %v5679_v35 = vpop.eup %5678  ;;  %4953 = vmatpush3.bf16.msra.mxu1 %v5117_v61  ;;  %v3114_v23 = vadd.f32 %v3113_v56, %v2844_v31  ;;  %v2831_v34 = vmul.f32 %v5677_v47, %v6886_v55  ;;  %v3648_v29 = vld [vmem:[#allocation6 + $0x38] sm:$0xff]  ;;  %v5141_v51 = vld [vmem:[#allocation11 + $0x1a8] sm:$0xff]   ;;  %v5144_v50 = vld [vmem:[#allocation11 + $0x1e0] sm:$0xff]  }
 0x32e   :  { %v5681_v52 = vpop.eup %5680  ;;  %3068 = vadd.xlane.f32.xlu1 %v3067_v13  ;;  %v3083_v32 = vadd.f32 %v3082_v37, %v2815_v49  ;;  %v2830_v59 = vmul.f32 %v5679_v35, %v6863_v28  ;;  %v3098_v42 = vadd.f32 %v3097_v6, %v2829_v7  ;;  %4954 = vmatprep.subr.bf16.mxu1 %v5118_v63  ;;  %v5137_v17 = vld [vmem:[#allocation11 + $0x1b0] sm:$0xff]   ;;  %v5145_v61 = vld [vmem:[#allocation11 + $0x1a0] sm:$0xff]   ;;  %v5148_v30 = vld [vmem:[#allocation11 + $0x1d8] sm:$0xff]  }
 0x32f   :  { %v5683_v45 = vpop.eup %5682  ;;  %v2832_v27 = vmul.f32 %v5681_v52, %v6891_v25  ;;  %v4782_v10 = vcombine.high %v3644_v20, %v3648_v29  ;;  %v5153_v26 = vld [vmem:[#allocation11 + $0x190] sm:$0xff]   ;;  %v5156_v21 = vld [vmem:[#allocation11 + $0x1c8] sm:$0xff]   ;;  %v5160_v63 = vld [vmem:[#allocation11 + $0x1c0] sm:$0xff]   ;;  %v4781_v6 = vcombine.low %v3644_v20, %v3648_v29 }
 0x330   :  { %v5685_v40 = vpop.eup %5684  ;;  %v3084_v57 = vadd.f32 %v3083_v32, %v2816_v44  ;;  %v3099_v1 = vadd.f32 %v3098_v42, %v2830_v59  ;;  %v2845_v62 = vmul.f32 %v5683_v45, %v6846_v60  ;;  %v5157_v0 = vld [vmem:[#allocation11 + $0x188] sm:$0xff]   ;;  %v5161_v43 = vld [vmem:[#allocation11 + $0x180] sm:$0xff]   ;;  %v7233_v56 = vld [vmem:[#allocation2] ss:$0 sm:$0xff] }
 0x331   :  { %v5687_v11 = vpop.eup %5686  ;;  %4955 = vmatpush3.bf16.msra.mxu1 %v5119_v54  ;;  %v2847_v58 = vmul.f32 %v5685_v40, %v6886_v55  ;;  %v5129_v55 = vld [vmem:[#allocation11 + $0x80] sm:$0xff]  }
 0x332   :  { %3085 = vadd.xlane.f32.xlu1 %v3084_v57  ;;  %v3100_v36 = vadd.f32 %v3099_v1, %v2831_v34  ;;  %v2846_v24 = vmul.f32 %v5687_v11, %v6863_v28  ;;  %v3115_v4 = vadd.f32 %v3114_v23, %v2845_v62  ;;  %4956 = vmatprep.subr.bf16.mxu1 %v5120_v15  ;;  %v5689_v12 = vpop.eup %5688  ;;  %v5126_v28 = vld [vmem:[#allocation11 + $0xc8] sm:$0xff]  }
 0x333   :  { %v2848_v60 = vmul.f32 %v5689_v12, %v6891_v25  ;;  %v4777_v25 = vcombine.low %v7196_v5, %v7199_v18  ;;  %v5149_v5 = vld [vmem:[#allocation11 + $0x198] sm:$0xff]   ;;  %v5152_v18 = vld [vmem:[#allocation11 + $0x1d0] sm:$0xff]  }
 0x334   :  { %v3101_v8 = vadd.f32 %v3100_v36, %v2832_v27  ;;  %v3116_v41 = vadd.f32 %v3115_v4, %v2846_v24 }
 0x335   :  { %4957 = vmatpush3.bf16.msra.mxu1 %v5121_v14 }
 0x336   :  { %3102 = vadd.xlane.f32.xlu1 %v3101_v8  ;;  %v3117_v3 = vadd.f32 %v3116_v41, %v2847_v58  ;;  %4958 = vmatprep.subr.bf16.mxu1 %v5122_v38 }
 0x338   :  { %v3118_v2 = vadd.f32 %v3117_v3, %v2848_v60 }
 0x339   :  { %4959 = vmatpush3.bf16.msra.mxu1 %v5123_v39 }
 0x33a   :  { %3119 = vadd.xlane.f32.xlu1 %v3118_v2  ;;  %4960 = vmatprep.subr.bf16.mxu1 %v5124_v22 }
 0x33d   :  { %4961 = vmatpush3.bf16.msra.mxu1 %v5125_v19 }
 0x33e   :  { %4962 = vmatprep.subr.bf16.mxu1 %v5126_v28 }
 0x341   :  { %4963 = vmatpush3.bf16.msra.mxu1 %v5127_v33 }
 0x342   :  { %4964 = vmatprep.subr.bf16.mxu1 %v5128_v53 }
 0x345   :  { %4965 = vmatpush3.bf16.msra.mxu1 %v5129_v55 }
 0x346   :  { %4994 = vmatprep.subr.bf16.mxu1 %v5132_v16 }
 0x348   :  { %4282 = vmatmul.mubr.bf16.vlgmr.msra.gmra.mxu1 %v4777_v25 }
 0x349   :  { %4995 = vmatpush3.bf16.msra.mxu1 %v5133_v48  ;;  %4363 = vmatprep.mubr.bf16.mxu1 %v4782_v10 }
 0x34a   :  { %4996 = vmatprep.subr.bf16.mxu1 %v5136_v9 }
 0x34d   :  { %4997 = vmatpush3.bf16.msra.mxu1 %v5137_v17 }
 0x34e   :  { %4998 = vmatprep.subr.bf16.mxu1 %v5140_v46 }
 0x351   :  { %4999 = vmatpush3.bf16.msra.mxu1 %v5141_v51 }
 0x352   :  { %5000 = vmatprep.subr.bf16.mxu1 %v5144_v50 }
 0x355   :  { %5001 = vmatpush3.bf16.msra.mxu1 %v5145_v61 }
 0x356   :  { %5002 = vmatprep.subr.bf16.mxu1 %v5148_v30 }
 0x359   :  { %5003 = vmatpush3.bf16.msra.mxu1 %v5149_v5 }
 0x35a   :  { %5004 = vmatprep.subr.bf16.mxu1 %v5152_v18 }
 0x35d   :  { %5005 = vmatpush3.bf16.msra.mxu1 %v5153_v26 }
 0x35e   :  { %5006 = vmatprep.subr.bf16.mxu1 %v5156_v21 }
 0x361   :  { %5007 = vmatpush3.bf16.msra.mxu1 %v5157_v0 }
 0x362   :  { %5008 = vmatprep.subr.bf16.mxu1 %v5160_v63 }
 0x365   :  { %5009 = vmatpush3.bf16.msra.mxu1 %v5161_v43 }
 0x368   :  { %4364 = vmatmul.mubr.bf16.vlgmr.msra.gmra.mxu1 %v4781_v6 }
 0x387   :  { %v2865_v47 = vpop.xlane.xlu0 %2864 }
 0x388   :  { %v3128_v13 = vadd.f32 %v7233_v56, %v2865_v47 }
 0x38a   :  { %v3145_v49 = vsel %vm3144_vm0, %v3128_v13, -inf }
 0x38b   :  { %v3146_v37 = vrot.slane %v3145_v49, 4  ;;  %v2882_v7 = vpop.xlane.xlu0 %2881 }
 0x38c   :  { %v3129_v35 = vadd.f32 %v7233_v56, %v2882_v7 }
 0x38d   :  { %v3147_v44 = vmax.f32 %v3145_v49, %v3146_v37 }
 0x38e   :  { %v3152_v31 = vsel %vm3144_vm0, %v3129_v35, -inf }
 0x38f   :  { %v3148_v54 = vrot.slane %v3147_v44, 2  ;;  %v3153_v52 = vrot.slane %v3152_v31, 4  ;;  %v2899_v32 = vpop.xlane.xlu0 %2898 }
 0x390   :  { %v3130_v59 = vadd.f32 %v7233_v56, %v2899_v32 }
 0x391   :  { %v3149_v42 = vmax.f32 %v3147_v44, %v3148_v54  ;;  %v3154_v15 = vmax.f32 %v3152_v31, %v3153_v52 }
 0x392   :  { %v3159_v45 = vsel %vm3144_vm0, %v3130_v59, -inf }
 0x393   :  { %v3150_v23 = vrot.slane %v3149_v42, 1  ;;  %v3155_v40 = vrot.slane %v3154_v15, 2  ;;  %v3160_v57 = vrot.slane %v3159_v45, 4  ;;  %v2916_v34 = vpop.xlane.xlu0 %2915 }
 0x394   :  { %v3131_v1 = vadd.f32 %v7233_v56, %v2916_v34 }
 0x395   :  { %v3151_v62 = vmax.f32 %v3149_v42, %v3150_v23  ;;  %v3156_v11 = vmax.f32 %v3154_v15, %v3155_v40  ;;  %v3161_v27 = vmax.f32 %v3159_v45, %v3160_v57 }
 0x396   :  { %v3166_v14 = vsel %vm3144_vm0, %v3131_v1, -inf }
 0x397   :  { %v3257_v36 = vsub.f32 %v3128_v13, %v3151_v62  ;;  %v3157_v24 = vrot.slane %v3156_v11, 1  ;;  %v3162_v4 = vrot.slane %v3161_v27, 2  ;;  %v3167_v38 = vrot.slane %v3166_v14, 4  ;;  %v2933_v12 = vpop.xlane.xlu0 %2932 }
 0x398   :  { %v3132_v8 = vadd.f32 %v7233_v56, %v2933_v12 }
 0x399   :  { %v3273_v58 = vmul.f32 1.442695, %v3257_v36  ;;  %v3158_v41 = vmax.f32 %v3156_v11, %v3157_v24  ;;  %v3163_v39 = vmax.f32 %v3161_v27, %v3162_v4  ;;  %v3168_v60 = vmax.f32 %v3166_v14, %v3167_v38 }
 0x39a   :  { %v3173_v3 = vsel %vm3144_vm0, %v3132_v8, -inf }
 0x39b   :  { %5690 = vpow2.f32 %v3273_v58  ;;  %v3258_v22 = vsub.f32 %v3129_v35, %v3158_v41  ;;  %v3164_v2 = vrot.slane %v3163_v39, 1  ;;  %v3169_v19 = vrot.slane %v3168_v60, 2  ;;  %v2950_v28 = vpop.xlane.xlu0 %2949 }
 0x39c   :  { %v3174_v33 = vrot.slane %v3173_v3, 4  ;;  %v3133_v53 = vadd.f32 %v7233_v56, %v2950_v28 }
 0x39d   :  { %v3275_v55 = vmul.f32 1.442695, %v3258_v22  ;;  %v3165_v16 = vmax.f32 %v3163_v39, %v3164_v2  ;;  %v3170_v20 = vmax.f32 %v3168_v60, %v3169_v19 }
 0x39e   :  { %v3175_v29 = vmax.f32 %v3173_v3, %v3174_v33  ;;  %v3180_v25 = vsel %vm3144_vm0, %v3133_v53, -inf }
 0x39f   :  { %5692 = vpow2.f32 %v3275_v55  ;;  %v3259_v48 = vsub.f32 %v3130_v59, %v3165_v16  ;;  %v3171_v10 = vrot.slane %v3170_v20, 1  ;;  %v3181_v9 = vrot.slane %v3180_v25, 4  ;;  %v2967_v17 = vpop.xlane.xlu0 %2966 }
 0x3a0   :  { %v3176_v46 = vrot.slane %v3175_v29, 2  ;;  %v3134_v51 = vadd.f32 %v7233_v56, %v2967_v17 }
 0x3a1   :  { %v3277_v50 = vmul.f32 1.442695, %v3259_v48  ;;  %v3172_v61 = vmax.f32 %v3170_v20, %v3171_v10  ;;  %v3182_v30 = vmax.f32 %v3180_v25, %v3181_v9 }
 0x3a2   :  { %v3177_v5 = vmax.f32 %v3175_v29, %v3176_v46  ;;  %v3187_v18 = vsel %vm3144_vm0, %v3134_v51, -inf }
 0x3a3   :  { %5694 = vpow2.f32 %v3277_v50  ;;  %v3260_v26 = vsub.f32 %v3131_v1, %v3172_v61  ;;  %v3183_v21 = vrot.slane %v3182_v30, 2  ;;  %v3188_v0 = vrot.slane %v3187_v18, 4  ;;  %v2984_v63 = vpop.xlane.xlu0 %2983 }
 0x3a4   :  { %v3178_v43 = vrot.slane %v3177_v5, 1  ;;  %v7250_v6 = vadd.f32 %v7233_v56, %v2984_v63 }
 0x3a5   :  { %v3279_v47 = vmul.f32 1.442695, %v3260_v26  ;;  %v3184_v13 = vmax.f32 %v3182_v30, %v3183_v21  ;;  %v3189_v49 = vmax.f32 %v3187_v18, %v3188_v0 }
 0x3a6   :  { %v3179_v37 = vmax.f32 %v3177_v5, %v3178_v43  ;;  %v3194_v7 = vsel %vm3144_vm0, %v7250_v6, -inf }
 0x3a7   :  { %5696 = vpow2.f32 %v3279_v47  ;;  %v3185_v35 = vrot.slane %v3184_v13, 1  ;;  %v3190_v44 = vrot.slane %v3189_v49, 2  ;;  %v3195_v31 = vrot.slane %v3194_v7, 4  ;;  %v3001_v54 = vpop.xlane.xlu1 %3000 }
 0x3a8   :  { %v7254_v52 = vpop.eup %5690  ;;  %v3261_v32 = vsub.f32 %v3132_v8, %v3179_v37  ;;  %v7257_v59 = vadd.f32 %v7233_v56, %v3001_v54 }
 0x3a9   :  { %v3305_v42 = vsel %vm3144_vm0, %v7254_v52, 0.0  ;;  %v3186_v15 = vmax.f32 %v3184_v13, %v3185_v35  ;;  %v3191_v45 = vmax.f32 %v3189_v49, %v3190_v44  ;;  %v3196_v23 = vmax.f32 %v3194_v7, %v3195_v31 }
 0x3aa   :  { %v3306_v40 = vrot.slane %v3305_v42, 4  ;;  %v3281_v57 = vmul.f32 1.442695, %v3261_v32  ;;  %v3201_v34 = vsel %vm3144_vm0, %v7257_v59, -inf }
 0x3ab   :  { %v3262_v1 = vsub.f32 %v3133_v53, %v3186_v15  ;;  %v3192_v62 = vrot.slane %v3191_v45, 1  ;;  %v3197_v11 = vrot.slane %v3196_v23, 2  ;;  %v3202_v27 = vrot.slane %v3201_v34, 4  ;;  %v3018_v14 = vpop.xlane.xlu1 %3017 }
 0x3ac   :  { %v7263_v36 = vpop.eup %5692  ;;  %v3307_v24 = vadd.f32 %v3306_v40, %v3305_v42  ;;  %5698 = vpow2.f32 %v3281_v57  ;;  %v7266_v4 = vadd.f32 %v7233_v56, %v3018_v14 }
 0x3ad   :  { %v3312_v38 = vsel %vm3144_vm0, %v7263_v36, 0.0  ;;  %v3283_v12 = vmul.f32 1.442695, %v3262_v1  ;;  %v3193_v8 = vmax.f32 %v3191_v45, %v3192_v62  ;;  %v3198_v58 = vmax.f32 %v3196_v23, %v3197_v11 }
 0x3ae   :  { %v3313_v41 = vrot.slane %v3312_v38, 4  ;;  %v3203_v39 = vmax.f32 %v3201_v34, %v3202_v27  ;;  %v3208_v60 = vsel %vm3144_vm0, %v7266_v4, -inf  ;;  %v3308_v33 = vrot.slane %v3307_v24, 2 }
 0x3af   :  { %5700 = vpow2.f32 %v3283_v12  ;;  %v3263_v3 = vsub.f32 %v3134_v51, %v3193_v8  ;;  %v3199_v22 = vrot.slane %v3198_v58, 1  ;;  %v3209_v2 = vrot.slane %v3208_v60, 4  ;;  %v3035_v19 = vpop.xlane.xlu1 %3034 }
 0x3b0   :  { %v7272_v28 = vpop.eup %5694  ;;  %v3204_v53 = vrot.slane %v3203_v39, 2  ;;  %v7275_v55 = vadd.f32 %v7233_v56, %v3035_v19  ;;  %v3314_v48 = vadd.f32 %v3313_v41, %v3312_v38  ;;  %v3309_v21 = vadd.f32 %v3308_v33, %v3307_v24 }
 0x3b1   :  { %v3319_v16 = vsel %vm3144_vm0, %v7272_v28, 0.0  ;;  %v3285_v20 = vmul.f32 1.442695, %v3263_v3  ;;  %v3200_v29 = vmax.f32 %v3198_v58, %v3199_v22  ;;  %v3210_v25 = vmax.f32 %v3208_v60, %v3209_v2 }
 0x3b2   :  { %v3320_v10 = vrot.slane %v3319_v16, 4  ;;  %v3205_v9 = vmax.f32 %v3203_v39, %v3204_v53  ;;  %v3215_v17 = vsel %vm3144_vm0, %v7275_v55, -inf  ;;  %v3315_v37 = vrot.slane %v3314_v48, 2 }
 0x3b3   :  { %5702 = vpow2.f32 %v3285_v20  ;;  %v3264_v46 = vsub.f32 %v7250_v6, %v3200_v29  ;;  %v3211_v51 = vrot.slane %v3210_v25, 2  ;;  %v3216_v50 = vrot.slane %v3215_v17, 4  ;;  %v3052_v61 = vpop.xlane.xlu1 %3051 }
 0x3b4   :  { %v7282_v30 = vpop.eup %5696  ;;  %v7284_v5 = vadd.f32 %v3320_v10, %v3319_v16  ;;  %v3206_v18 = vrot.slane %v3205_v9, 1  ;;  %v7287_v26 = vadd.f32 %v7233_v56, %v3052_v61  ;;  %v3310_v42 = vrot.slane %v3309_v21, 1 }
 0x3b5   :  { %v3326_v0 = vsel %vm3144_vm0, %v7282_v30, 0.0  ;;  %v3287_v63 = vmul.f32 1.442695, %v3264_v46  ;;  %v3212_v43 = vmax.f32 %v3210_v25, %v3211_v51  ;;  %v3217_v47 = vmax.f32 %v3215_v17, %v3216_v50 }
 0x3b6   :  { %v3327_v13 = vrot.slane %v3326_v0, 4  ;;  %v3207_v6 = vmax.f32 %v3205_v9, %v3206_v18  ;;  %v3222_v49 = vsel %vm3144_vm0, %v7287_v26, -inf  ;;  %v3322_v45 = vrot.slane %v7284_v5, 2 }
 0x3b7   :  { %v3213_v7 = vrot.slane %v3212_v43, 1  ;;  %v3218_v35 = vrot.slane %v3217_v47, 2  ;;  %v3223_v44 = vrot.slane %v3222_v49, 4  ;;  %v3069_v31 = vpop.xlane.xlu1 %3068  ;;  %5704 = vpow2.f32 %v3287_v63 }
 0x3b8   :  { %v3265_v54 = vsub.f32 %v7257_v59, %v3207_v6  ;;  %v7295_v32 = vadd.f32 %v7233_v56, %v3069_v31  ;;  %v7300_v34 = vadd.f32 %v3327_v13, %v3326_v0  ;;  %v3316_v38 = vadd.f32 %v3315_v37, %v3314_v48 }
 0x3b9   :  { %v7297_v15 = vpop.eup %5698  ;;  %v3214_v23 = vmax.f32 %v3212_v43, %v3213_v7  ;;  %v3219_v40 = vmax.f32 %v3217_v47, %v3218_v35  ;;  %v3224_v57 = vmax.f32 %v3222_v49, %v3223_v44  ;;  %v3311_v22 = vadd.f32 %v3310_v42, %v3309_v21 }
 0x3ba   :  { %v3333_v1 = vsel %vm3144_vm0, %v7297_v15, 0.0  ;;  %v3289_v62 = vmul.f32 1.442695, %v3265_v54  ;;  %v3229_v59 = vsel %vm3144_vm0, %v7295_v32, -inf  ;;  %v3317_v29 = vrot.slane %v3316_v38, 1 }
 0x3bb   :  { %v3266_v11 = vsub.f32 %v7266_v4, %v3214_v23  ;;  %v3220_v27 = vrot.slane %v3219_v40, 1  ;;  %v3225_v14 = vrot.slane %v3224_v57, 2  ;;  %v3086_v24 = vpop.xlane.xlu1 %3085  ;;  %v3334_v8 = vrot.slane %v3333_v1, 4 }
 0x3bc   :  { %v7307_v12 = vpop.eup %5700  ;;  %5706 = vpow2.f32 %v3289_v62  ;;  %v3230_v58 = vrot.slane %v3229_v59, 4  ;;  %v7310_v41 = vadd.f32 %v7233_v56, %v3086_v24  ;;  %v3318_v47 = vadd.f32 %v3317_v29, %v3316_v38 }
 0x3bd   :  { %v3340_v39 = vsel %vm3144_vm0, %v7307_v12, 0.0  ;;  %v3291_v60 = vmul.f32 1.442695, %v3266_v11  ;;  %v3221_v3 = vmax.f32 %v3219_v40, %v3220_v27  ;;  %v3226_v4 = vmax.f32 %v3224_v57, %v3225_v14 }
 0x3be   :  { %v3341_v2 = vrot.slane %v3340_v39, 4  ;;  %v3231_v19 = vmax.f32 %v3229_v59, %v3230_v58  ;;  %v3236_v33 = vsel %vm3144_vm0, %v7310_v41, -inf  ;;  %v3335_v48 = vadd.f32 %v3334_v8, %v3333_v1 }
 0x3bf   :  { %5708 = vpow2.f32 %v3291_v60  ;;  %v3267_v53 = vsub.f32 %v7275_v55, %v3221_v3  ;;  %v3237_v16 = vrot.slane %v3236_v33, 4  ;;  %v3103_v20 = vpop.xlane.xlu1 %3102  ;;  %v3227_v10 = vrot.slane %v3226_v4, 1 }
 0x3c0   :  { %v7317_v25 = vpop.eup %5702  ;;  %v3232_v9 = vrot.slane %v3231_v19, 2  ;;  %v7320_v17 = vadd.f32 %v7233_v56, %v3103_v20  ;;  %5710 = vrcp.f32 %v3311_v22  ;;  %v7324_v61 = vadd.f32 %v3341_v2, %v3340_v39 }
 0x3c1   :  { %v3347_v46 = vsel %vm3144_vm0, %v7317_v25, 0.0  ;;  %v3293_v51 = vmul.f32 1.442695, %v3267_v53  ;;  %v3238_v50 = vmax.f32 %v3236_v33, %v3237_v16  ;;  %v3228_v18 = vmax.f32 %v3226_v4, %v3227_v10 }
 0x3c2   :  { %v3348_v55 = vrot.slane %v3347_v46, 4  ;;  %v3233_v21 = vmax.f32 %v3231_v19, %v3232_v9  ;;  %v3243_v63 = vsel %vm3144_vm0, %v7320_v17, -inf  ;;  %v3329_v13 = vrot.slane %v7300_v34, 2 }
 0x3c3   :  { %5712 = vpow2.f32 %v3293_v51  ;;  %v3239_v0 = vrot.slane %v3238_v50, 2  ;;  %v3120_v43 = vpop.xlane.xlu1 %3119  ;;  %v3268_v6 = vsub.f32 %v7287_v26, %v3228_v18  ;;  %v3244_v37 = vrot.slane %v3243_v63, 4 }
 0x3c4   :  { %v3234_v49 = vrot.slane %v3233_v21, 1  ;;  %v7330_v7 = vpop.eup %5704  ;;  %v3336_v35 = vrot.slane %v3335_v48, 2  ;;  %v7333_v31 = vadd.f32 %v7233_v56, %v3120_v43  ;;  %5714 = vrcp.f32 %v3318_v47 }
 0x3c5   :  { %v3240_v44 = vmax.f32 %v3238_v50, %v3239_v0  ;;  %v3343_v54 = vrot.slane %v7324_v61, 2  ;;  %v3349_v42 = vadd.f32 %v3348_v55, %v3347_v46  ;;  %v3295_v23 = vmul.f32 1.442695, %v3268_v6 }
 0x3c6   :  { %v3235_v40 = vmax.f32 %v3233_v21, %v3234_v49  ;;  %v3245_v1 = vmax.f32 %v3243_v63, %v3244_v37  ;;  %v3250_v26 = vsel %vm3144_vm0, %v7333_v31, -inf  ;;  %v3323_v62 = vadd.f32 %v3322_v45, %v7284_v5 }
 0x3c7   :  { %v3241_v57 = vrot.slane %v3240_v44, 1  ;;  %v7343_v59 = vsel %vm3144_vm0, %v7330_v7, 0.0  ;;  %5716 = vpow2.f32 %v3295_v23  ;;  %v3251_v11 = vrot.slane %v3250_v26, 4 }
 0x3c8   :  { %v3269_v56 = vsub.f32 %v7295_v32, %v3235_v40  ;;  %v3246_v24 = vrot.slane %v3245_v1, 2  ;;  %v3324_v38 = vrot.slane %v3323_v62, 1  ;;  %v3330_v8 = vadd.f32 %v3329_v13, %v7300_v34 }
 0x3c9   :  { %v7346_v27 = vpop.eup %5706  ;;  %v3242_v14 = vmax.f32 %v3240_v44, %v3241_v57  ;;  %v3350_v58 = vrot.slane %v3349_v42, 2  ;;  %v3252_v45 = vmax.f32 %v3250_v26, %v3251_v11  ;;  %v3337_v33 = vadd.f32 %v3336_v35, %v3335_v48 }
 0x3ca   :  { %v3361_v39 = vsel %vm3144_vm0, %v7346_v27, 0.0  ;;  %v3297_v5 = vmul.f32 1.442695, %v3269_v56  ;;  %v3247_v22 = vmax.f32 %v3245_v1, %v3246_v24  ;;  %v3325_v2 = vadd.f32 %v3324_v38, %v3323_v62 }
 0x3cb   :  { %v3362_v60 = vrot.slane %v3361_v39, 4  ;;  %v3270_v3 = vsub.f32 %v7310_v41, %v3242_v14  ;;  %v3253_v4 = vrot.slane %v3252_v45, 2  ;;  %v3331_v19 = vrot.slane %v3330_v8, 1 }
 0x3cc   :  { %v7352_v32 = vpop.eup %5708  ;;  %5718 = vpow2.f32 %v3297_v5  ;;  %v3248_v20 = vrot.slane %v3247_v22, 1  ;;  %v3338_v21 = vrot.slane %v3337_v33, 1  ;;  %v3344_v43 = vadd.f32 %v3343_v54, %v7324_v61 }
 0x3cd   :  { %v3363_v53 = vadd.f32 %v3362_v60, %v3361_v39  ;;  %v3368_v34 = vsel %vm3144_vm0, %v7352_v32, 0.0  ;;  %v3299_v16 = vmul.f32 1.442695, %v3270_v3  ;;  %v5711_v29 = vpop.eup %5710  ;;  %v3254_v9 = vmax.f32 %v3252_v45, %v3253_v4 }
 0x3ce   :  { %v3369_v10 = vrot.slane %v3368_v34, 4  ;;  %5720 = vrcp.f32 %v3325_v2  ;;  %v3332_v46 = vadd.f32 %v3331_v19, %v3330_v8  ;;  %v3249_v51 = vmax.f32 %v3247_v22, %v3248_v20 }
 0x3cf   :  { %v3364_v41 = vrot.slane %v3363_v53, 2  ;;  %5722 = vpow2.f32 %v3299_v16  ;;  %v3418_v50 = vmul.f32 %v5711_v29, %v7254_v52  ;;  %v3255_v48 = vrot.slane %v3254_v9, 1 }
 0x3d0   :  { %v7357_v55 = vpop.eup %5712  ;;  %v3370_v18 = vadd.f32 %v3369_v10, %v3368_v34  ;;  %5724 = vrcp.f32 %v3332_v46  ;;  %v3271_v63 = vsub.f32 %v7320_v17, %v3249_v51  ;;  %v3351_v47 = vadd.f32 %v3350_v58, %v3349_v42 }
 0x3d1   :  { %v3375_v0 = vsel %vm3144_vm0, %v7357_v55, 0.0  ;;  %3451 = vperm.xlu0 %5056, %v3418_v50   ;;  %v5715_v13 = vpop.eup %5714  ;;  %v3256_v37 = vmax.f32 %v3254_v9, %v3255_v48  ;;  %v3339_v52 = vadd.f32 %v3338_v21, %v3337_v33  ;;  %v3345_v23 = vrot.slane %v3344_v43, 1 }
 0x3d2   :  { %v3371_v6 = vrot.slane %v3370_v18, 2  ;;  %v3376_v49 = vrot.slane %v3375_v0, 4  ;;  %v3301_v35 = vmul.f32 1.442695, %v3271_v63  ;;  %v3420_v44 = vmul.f32 %v5715_v13, %v7263_v36 }
 0x3d3   :  { %v3352_v40 = vrot.slane %v3351_v47, 1  ;;  %v3272_v1 = vsub.f32 %v7333_v31, %v3256_v37  ;;  %5726 = vrcp.f32 %v3339_v52  ;;  %v3365_v26 = vadd.f32 %v3364_v41, %v3363_v53 }
 0x3d4   :  { %v3377_v57 = vadd.f32 %v3376_v49, %v3375_v0  ;;  %v7365_v17 = vpop.eup %5716  ;;  %5728 = vpow2.f32 %v3301_v35  ;;  %3456 = vperm.xlu1 %5057, %v3420_v44   ;;  %v3346_v61 = vadd.f32 %v3345_v23, %v3344_v43  ;;  %v3372_v42 = vadd.f32 %v3371_v6, %v3370_v18 }
 0x3d5   :  { %v3353_v54 = vadd.f32 %v3352_v40, %v3351_v47  ;;  %v3382_v56 = vsel %vm3144_vm0, %v7365_v17, 0.0  ;;  %v3303_v11 = vmul.f32 1.442695, %v3272_v1  ;;  %v3366_v36 = vrot.slane %v3365_v26, 1 }
 0x3d6   :  { %v3378_v62 = vrot.slane %v3377_v57, 2  ;;  %v3355_v14 = vrot.slane %v7343_v59, 4  ;;  %v3383_v24 = vrot.slane %v3382_v56, 4  ;;  %5730 = vrcp.f32 %v3346_v61 }
 0x3d7   :  { %5732 = vpow2.f32 %v3303_v11  ;;  %v3367_v39 = vadd.f32 %v3366_v36, %v3365_v26  ;;  %v3373_v5 = vrot.slane %v3372_v42, 1 }
 0x3d8   :  { %v3384_v38 = vadd.f32 %v3383_v24, %v3382_v56  ;;  %v3379_v8 = vadd.f32 %v3378_v62, %v3377_v57  ;;  %5734 = vrcp.f32 %v3353_v54  ;;  %v3356_v60 = vadd.f32 %v3355_v14, %v7343_v59 }
 0x3d9   :  { %v7370_v31 = vpop.eup %5718  ;;  %5736 = vrcp.f32 %v3367_v39  ;;  %v3374_v10 = vadd.f32 %v3373_v5, %v3372_v42 }
 0x3da   :  { %v3389_v58 = vsel %vm3144_vm0, %v7370_v31, 0.0  ;;  %v3385_v3 = vrot.slane %v3384_v38, 2  ;;  %v3380_v34 = vrot.slane %v3379_v8, 1  ;;  %v3357_v59 = vrot.slane %v3356_v60, 2 }
 0x3db   :  { %v5721_v45 = vpop.eup %5720  ;;  %v3390_v22 = vrot.slane %v3389_v58, 4  ;;  %5738 = vrcp.f32 %v3374_v10  ;;  %v5168_v10 = vld [vmem:[#allocation17 + $0x60] sm:$0xff]  }
 0x3dc   :  { %v7375_v2 = vpop.eup %5722  ;;  %v3422_v4 = vmul.f32 %v5721_v45, %v7272_v28  ;;  %v3386_v16 = vadd.f32 %v3385_v3, %v3384_v38  ;;  %v3381_v51 = vadd.f32 %v3380_v34, %v3379_v8  ;;  %v3358_v63 = vadd.f32 %v3357_v59, %v3356_v60  ;;  %v5169_v59 = vld [vmem:[#allocation17 + $0x20] sm:$0xff]  }
 0x3dd   :  { %v5725_v19 = vpop.eup %5724  ;;  %v3391_v33 = vadd.f32 %v3390_v22, %v3389_v58  ;;  %v3396_v53 = vsel %vm3144_vm0, %v7375_v2, 0.0 }
 0x3de   :  { %v3397_v20 = vrot.slane %v3396_v53, 4  ;;  %3461 = vperm.xlu1 %5057, %v3422_v4   ;;  %v3424_v29 = vmul.f32 %v5725_v19, %v7282_v30  ;;  %v3387_v50 = vrot.slane %v3386_v16, 1  ;;  %5740 = vrcp.f32 %v3381_v51  ;;  %v5174_v51 = vld [vmem:[#allocation17 + $0x48] sm:$0xff]  }
 0x3df   :  { %v3392_v9 = vrot.slane %v3391_v33, 2  ;;  %v3359_v57 = vrot.slane %v3358_v63, 1 }
 0x3e0   :  { %v3398_v46 = vadd.f32 %v3397_v20, %v3396_v53  ;;  %v5727_v41 = vpop.eup %5726  ;;  %v3388_v49 = vadd.f32 %v3387_v50, %v3386_v16  ;;  %v5163_v16 = vld [vmem:[#allocation17 + $0x38] sm:$0xff]   ;;  %v5165_v20 = vld [vmem:[#allocation17 + $0x30] sm:$0xff]   ;;  %v5175_v50 = vld [vmem:[#allocation17 + $0x8] sm:$0xff]  }
 0x3e1   :  { %v3393_v28 = vadd.f32 %v3392_v9, %v3391_v33  ;;  %v7381_v18 = vpop.eup %5728  ;;  %v3426_v21 = vmul.f32 %v5727_v41, %v7297_v15  ;;  %v3360_v11 = vadd.f32 %v3359_v57, %v3358_v63  ;;  %v5171_v9 = vld [vmem:[#allocation17 + $0x18] sm:$0xff]   ;;  %v5173_v41 = vld [vmem:[#allocation17 + $0x10] sm:$0xff]  }
 0x3e2   :  { %v3399_v48 = vrot.slane %v3398_v46, 2  ;;  %3466 = vperm.xlu1 %5057, %v3424_v29   ;;  %v3403_v0 = vsel %vm3144_vm0, %v7381_v18, 0.0  ;;  %v5167_v29 = vld [vmem:[#allocation17 + $0x28] sm:$0xff]  }
 0x3e3   :  { %v3394_v30 = vrot.slane %v3393_v28, 1  ;;  %v5731_v43 = vpop.eup %5730  ;;  %v3404_v47 = vrot.slane %v3403_v0, 4 }
 0x3e4   :  { %v3400_v13 = vadd.f32 %v3399_v48, %v3398_v46  ;;  %v5733_v6 = vpop.eup %5732  ;;  %v3428_v44 = vmul.f32 %v5731_v43, %v7307_v12  ;;  %v5172_v46 = vld [vmem:[#allocation17 + $0x50] sm:$0xff]  }
 0x3e5   :  { %v3395_v37 = vadd.f32 %v3394_v30, %v3393_v28  ;;  %v3405_v52 = vadd.f32 %v3404_v47, %v3403_v0  ;;  %v3410_v35 = vsel %vm3144_vm0, %v5733_v6, 0.0  ;;  %v5735_v23 = vpop.eup %5734  ;;  %v5176_v28 = vld [vmem:[#allocation17 + $0x40] sm:$0xff]  }
 0x3e6   :  { %3471 = vperm.xlu1 %5057, %v3426_v21   ;;  %v3401_v15 = vrot.slane %v3400_v13, 1  ;;  %v3411_v40 = vrot.slane %v3410_v35, 4  ;;  %v3430_v54 = vmul.f32 %v5735_v23, %v7317_v25  ;;  %v5737_v62 = vpop.eup %5736 }
 0x3e7   :  { %5742 = vrcp.f32 %v3395_v37  ;;  %v3406_v1 = vrot.slane %v3405_v52, 2  ;;  %v3434_v12 = vmul.f32 %v5737_v62, %v7346_v27  ;;  %v7503_v37 = vld [vmem:[#allocation25_spill] sm:$0xff] }
 0x3e8   :  { %v3402_v26 = vadd.f32 %v3401_v15, %v3400_v13  ;;  %v3412_v61 = vadd.f32 %v3411_v40, %v3410_v35  ;;  %5744 = vrcp.f32 %v3388_v49  ;;  %v5739_v38 = vpop.eup %5738  ;;  %v4944_v48 = vpop.f32.mrf.mxu1 }
 0x3e9   :  { %v3407_v42 = vadd.f32 %v3406_v1, %v3405_v52  ;;  %v3436_v25 = vmul.f32 %v5739_v38, %v7352_v32  ;;  %v7504_v1 = vld [vmem:[#allocation26_spill] sm:$0xff] }
 0x3ea   :  { %3476 = vperm.xlu1 %5057, %v3428_v44   ;;  %5746 = vrcp.f32 %v3402_v26  ;;  %v3413_v56 = vrot.slane %v3412_v61, 2  ;;  %v4945_v21 = vpop.f32.mrf.mxu1 }
 0x3eb   :  { %v3408_v36 = vrot.slane %v3407_v42, 1  ;;  %5748 = vrcp.f32 %v3360_v11  ;;  %v5741_v39 = vpop.eup %5740  ;;  %v4946_v62 = vadd.f32 %v4945_v21, %v4944_v48 }
 0x3ec   :  { %v3414_v14 = vadd.f32 %v3413_v56, %v3412_v61  ;;  %v3438_v3 = vmul.f32 %v5741_v39, %v7357_v55  ;;  %v5162_v55 = vld [vmem:[#allocation17 + $0x78] sm:$0xff]   ;;  %v4947_v0 = vpop.f32.mrf.mxu1  ;;  %v4988_v35 = vpop.f32.mrf.mxu0  ;;  %v7505_v61 = vld [vmem:[#allocation27_spill] sm:$0xff]  ;;  %v4774_v56 = vld [vmem:[#allocation12] ss:$0 sm:$0xff] }
 0x3ed   :  { %v3409_v24 = vadd.f32 %v3408_v36, %v3407_v42  ;;  %5016 = vmatprep.subr.bf16.mxu0 %v5162_v55  ;;  %v7508_v55 = vld [vmem:[#allocation30_spill] sm:$0xff] }
 0x3ee   :  { %3481 = vperm.xlu1 %5057, %v3430_v54   ;;  %v3415_v8 = vrot.slane %v3414_v14, 1  ;;  %5017 = vmatpush3.bf16.msra.mxu0 %v5163_v16  ;;  %v4948_v63 = vpop.f32.mrf.mxu1  ;;  %v4989_v40 = vpop.f32.mrf.mxu0 }
 0x3ef   :  { %5750 = vrcp.f32 %v3409_v24  ;;  %v4949_v11 = vadd.f32 %v4948_v63, %v4947_v0 }
 0x3f0   :  { %v3416_v58 = vadd.f32 %v3415_v8, %v3414_v14  ;;  %v4991_v14 = vpop.f32.mrf.mxu0 }
 0x3f2   :  { %3491 = vperm.xlu1 %5057, %v3434_v12   ;;  %5752 = vrcp.f32 %v3416_v58  ;;  %v7506_v58 = vld [vmem:[#allocation28_spill] sm:$0xff] }
 0x3f4   :  { %v5743_v5 = vpop.eup %5742 }
 0x3f5   :  { %v3442_v45 = vmul.f32 %v5743_v5, %v7370_v31  ;;  %v5745_v60 = vpop.eup %5744  ;;  %v4246_v5 = vadd.f32 %v4949_v11, %v4774_v56 }
 0x3f6   :  { %3496 = vperm.xlu1 %5057, %v3436_v25   ;;  %v3440_v4 = vmul.f32 %v5745_v60, %v7365_v17  ;;  %v5166_v17 = vld [vmem:[#allocation17 + $0x68] sm:$0xff]   ;;  %v4243_v25 = vadd.f32 %v4946_v62, %v4774_v56 }
 0x3f7   :  { %v5747_v22 = vpop.eup %5746  ;;  %3511 = vperm.xlu0 %5056, %v3442_v45  }
 0x3f8   :  { %v3444_v27 = vmul.f32 %v5747_v22, %v7375_v2  ;;  %v5749_v19 = vpop.eup %5748  ;;  %v5164_v2 = vld [vmem:[#allocation17 + $0x70] sm:$0xff]   ;;  %v4992_v22 = vpop.f32.mrf.mxu0 }
 0x3f9   :  { %v3432_v31 = vmul.f32 %v5749_v19, %v7330_v7  ;;  %5018 = vmatprep.subr.bf16.mxu0 %v5164_v2  ;;  %v5170_v7 = vld [vmem:[#allocation17 + $0x58] sm:$0xff]   ;;  %v7509_v2 = vld [vmem:[#allocation33_spill] sm:$0xff] }
 0x3fa   :  { %3501 = vperm.xlu1 %5057, %v3438_v3   ;;  %5019 = vmatpush3.bf16.msra.mxu0 %v5165_v20 }
 0x3fb   :  { %3516 = vperm.xlu0 %5056, %v3444_v27   ;;  %5020 = vmatprep.subr.bf16.mxu0 %v5166_v17 }
 0x3fc   :  { %v5751_v33 = vpop.eup %5750 }
 0x3fd   :  { %v3446_v32 = vmul.f32 %v5751_v33, %v7381_v18  ;;  %v5177_v18 = vld [vmem:[#allocation17] sm:$0xff]  }
 0x3fe   :  { %3506 = vperm.xlu1 %5057, %v3440_v4   ;;  %5021 = vmatpush3.bf16.msra.mxu0 %v5167_v29 }
 0x3ff   :  { %v5753_v53 = vpop.eup %5752  ;;  %3521 = vperm.xlu0 %5056, %v3446_v32   ;;  %5022 = vmatprep.subr.bf16.mxu0 %v5168_v10 }
 0x400   :  { %v3448_v34 = vmul.f32 %v5753_v53, %v5733_v6  ;;  %v4990_v53 = vadd.f32 %v4989_v40, %v4988_v35 }
 0x402   :  { %3486 = vperm.xlu1 %5057, %v3432_v31   ;;  %5023 = vmatpush3.bf16.msra.mxu0 %v5169_v59  ;;  %v7507_v31 = vld [vmem:[#allocation29_spill] sm:$0xff]  ;;  %v4993_v59 = vadd.f32 %v4992_v22, %v4991_v14 }
 0x403   :  { %3526 = vperm.xlu0 %5056, %v3448_v34   ;;  %5024 = vmatprep.subr.bf16.mxu0 %v5170_v7 }
 0x406   :  { %5025 = vmatpush3.bf16.msra.mxu0 %v5171_v9 }
 0x407   :  { %5026 = vmatprep.subr.bf16.mxu0 %v5172_v46 }
 0x408   :  { %v4966_v43 = vpop.f32.mrf.mxu1 }
 0x40a   :  { %5027 = vmatpush3.bf16.msra.mxu0 %v5173_v41  ;;  %v4967_v13 = vpop.f32.mrf.mxu1 }
 0x40b   :  { %5028 = vmatprep.subr.bf16.mxu0 %v5174_v51  ;;  %v4968_v45 = vadd.f32 %v4967_v13, %v4966_v43  ;;  %v7512_v43 = vld [vmem:[#allocation37_spill] sm:$0xff] }
 0x40c   :  { %v4969_v44 = vpop.f32.mrf.mxu1 }
 0x40d   :  { %v4284_v17 = vadd.f32 %v4968_v45, %v4243_v25 }
 0x40e   :  { %5029 = vmatpush3.bf16.msra.mxu0 %v5175_v50  ;;  %v4970_v57 = vpop.f32.mrf.mxu1  ;;  %v7510_v50 = vld [vmem:[#allocation31_spill] sm:$0xff] }
 0x40f   :  { %5030 = vmatprep.subr.bf16.mxu0 %v5176_v28  ;;  %v4971_v3 = vadd.f32 %v4970_v57, %v4969_v44 }
 0x411   :  { %v4287_v10 = vadd.f32 %v4971_v3, %v4246_v5 }
 0x412   :  { %5031 = vmatpush3.bf16.msra.mxu0 %v5177_v18  ;;  %v7511_v18 = vld [vmem:[#allocation34_spill] sm:$0xff] }
 0x428   :  { %v5010_v12 = vpop.f32.mrf.mxu1 }
 0x42a   :  { %v5011_v4 = vpop.f32.mrf.mxu1 }
 0x42b   :  { %v7411_v35 = vadd.f32 %v5011_v4, %v5010_v12 }
 0x42c   :  { %v5013_v9 = vpop.f32.mrf.mxu1 }
 0x44c   :  { %v3452_v6 = vpop.permute.xlu0 %3451 }
 0x44d   :  { %v3529_v52 = vmul.f32 %v3452_v6, %v7503_v37  ;;  %v7407_v6 = vadd.f32 %v4990_v53, %v4284_v17 }
 0x44f   :  { %v3457_v30 = vpop.permute.xlu1 %3456  ;;  %v3545_v23 = vrot.slane %v3529_v52, 4 }
 0x450   :  { %v3530_v26 = vmul.f32 %v3457_v30, %v7504_v1 }
 0x451   :  { %v3546_v36 = vadd.f32 %v3545_v23, %v3529_v52 }
 0x452   :  { %v3551_v24 = vrot.slane %v3530_v26, 4 }
 0x453   :  { %v3547_v60 = vrot.slane %v3546_v36, 2 }
 0x454   :  { %v3552_v27 = vadd.f32 %v3551_v24, %v3530_v26 }
 0x455   :  { %v3548_v29 = vadd.f32 %v3547_v60, %v3546_v36  ;;  %v7514_v36 = vld [vmem:[#allocation38_spill] sm:$0xff] }
 0x456   :  { %v3553_v7 = vrot.slane %v3552_v27, 2 }
 0x457   :  { %v3549_v13 = vrot.slane %v3548_v29, 1 }
 0x458   :  { %v3554_v52 = vadd.f32 %v3553_v7, %v3552_v27  ;;  %v7515_v27 = vld [vmem:[#allocation36_spill] sm:$0xff] }
 0x459   :  { %v3462_v47 = vpop.permute.xlu1 %3461  ;;  %v7415_v24 = vadd.f32 %v3549_v13, %v3548_v29 }
 0x45a   :  { %v3531_v54 = vmul.f32 %v3462_v47, %v7505_v61  ;;  %v7513_v61 = vld [vmem:[#allocation35_spill] sm:$0xff] }
 0x45c   :  { %v3557_v38 = vrot.slane %v3531_v54, 4 }
 0x45d   :  { %v3467_v49 = vpop.permute.xlu1 %3466 }
 0x45e   :  { %v3532_v39 = vmul.f32 %v3467_v49, %v7506_v58  ;;  %v3558_v19 = vadd.f32 %v3557_v38, %v3531_v54  ;;  %v7409_v49 = vadd.f32 %v4993_v59, %v4287_v10  ;;  %v3555_v58 = vrot.slane %v3554_v52, 1 }
 0x460   :  { %v3563_v32 = vrot.slane %v3532_v39, 4  ;;  %v3559_v46 = vrot.slane %v3558_v19, 2  ;;  %v3556_v17 = vadd.f32 %v3555_v58, %v3554_v52 }
 0x461   :  { %v3472_v15 = vpop.permute.xlu1 %3471 }
 0x462   :  { %v3533_v34 = vmul.f32 %v3472_v15, %v7507_v31  ;;  %v3564_v51 = vadd.f32 %v3563_v32, %v3532_v39  ;;  %v3560_v44 = vadd.f32 %v3559_v46, %v3558_v19  ;;  %v5014_v15 = vpop.f32.mrf.mxu1 }
 0x463   :  { %v7417_v38 = vadd.f32 %v5014_v15, %v5013_v9 }
 0x464   :  { %v3569_v0 = vrot.slane %v3533_v34, 4  ;;  %v3565_v57 = vrot.slane %v3564_v51, 2  ;;  %v3561_v39 = vrot.slane %v3560_v44, 1 }
 0x465   :  { %v3477_v42 = vpop.permute.xlu1 %3476 }
 0x466   :  { %v3534_v16 = vmul.f32 %v3477_v42, %v7508_v55  ;;  %v3570_v62 = vadd.f32 %v3569_v0, %v3533_v34  ;;  %v3566_v60 = vadd.f32 %v3565_v57, %v3564_v51  ;;  %v3562_v29 = vadd.f32 %v3561_v39, %v3560_v44  ;;  %v7517_v51 = vld [vmem:[#allocation32_spill] sm:$0xff] }
 0x467   :  { %v7518_v44 = vld [vmem:[#allocation40_spill] sm:$0xff] }
 0x468   :  { %v3575_v30 = vrot.slane %v3534_v16, 4  ;;  %v3571_v19 = vrot.slane %v3570_v62, 2 }
 0x469   :  { %v3482_v8 = vpop.permute.xlu1 %3481 }
 0x46a   :  { %v3535_v28 = vmul.f32 %v3482_v8, %v7510_v50  ;;  %v3576_v56 = vadd.f32 %v3575_v30, %v3534_v16 }
 0x46c   :  { %v3581_v1 = vrot.slane %v3535_v28, 4 }
 0x46d   :  { %v3492_v33 = vpop.permute.xlu1 %3491 }
 0x46e   :  { %v3537_v20 = vmul.f32 %v3492_v33, %v7509_v2  ;;  %v3582_v3 = vadd.f32 %v3581_v1, %v3535_v28  ;;  %v3577_v33 = vrot.slane %v3576_v56, 2  ;;  %v7516_v2 = vld [vmem:[#allocation39_spill] sm:$0xff]  ;;  %v3567_v28 = vrot.slane %v3566_v60, 1 }
 0x470   :  { %v3593_v63 = vrot.slane %v3537_v20, 4  ;;  %v3583_v9 = vrot.slane %v3582_v3, 2  ;;  %v3578_v30 = vadd.f32 %v3577_v33, %v3576_v56  ;;  %v3568_v39 = vadd.f32 %v3567_v28, %v3566_v60 }
 0x471   :  { %v3497_v41 = vpop.permute.xlu1 %3496 }
 0x472   :  { %v3538_v48 = vmul.f32 %v3497_v41, %v7511_v18  ;;  %v3512_v21 = vpop.permute.xlu0 %3511  ;;  %v3594_v11 = vadd.f32 %v3593_v63, %v3537_v20  ;;  %v3572_v18 = vadd.f32 %v3571_v19, %v3570_v62  ;;  %v3579_v62 = vrot.slane %v3578_v30, 1 }
 0x473   :  { %v3541_v47 = vmul.f32 %v3512_v21, %v7512_v43  ;;  %v4389_v19 = vsel %vm4388_vm1, %v3556_v17, %v7415_v24  ;;  %v4366_v17 = vadd.f32 %v7411_v35, %v7407_v6 }
 0x474   :  { %v3599_v37 = vrot.slane %v3538_v48, 4  ;;  %v3595_v32 = vrot.slane %v3594_v11, 2  ;;  %v4391_v60 = vsel %vm4390_vm2, %v3562_v29, %v4389_v19  ;;  %v4369_v29 = vadd.f32 %v7417_v38, %v7409_v49  ;;  %v4847_v49 = vld [vmem:[%s7460_s11] ss:$0 sm:$0xff] }
 0x475   :  { %v3502_v23 = vpop.permute.xlu1 %3501  ;;  %v3617_v40 = vrot.slane %v3541_v47, 4 }
 0x476   :  { %v3600_v26 = vadd.f32 %v3599_v37, %v3538_v48  ;;  %v3539_v54 = vmul.f32 %v3502_v23, %v7513_v61  ;;  %v3517_v42 = vpop.permute.xlu0 %3516  ;;  %v3596_v48 = vadd.f32 %v3595_v32, %v3594_v11  ;;  %v3584_v23 = vadd.f32 %v3583_v9, %v3582_v3 }
 0x477   :  { %v3542_v14 = vmul.f32 %v3517_v42, %v7514_v36  ;;  %v3618_v8 = vadd.f32 %v3617_v40, %v3541_v47  ;;  %v4411_v35 = vpack.c.bf16 %v4369_v29, %v4366_v17 }
 0x478   :  { %v3605_v12 = vrot.slane %v3539_v54, 4  ;;  %v3601_v25 = vrot.slane %v3600_v26, 2  ;;  %v3597_v61 = vrot.slane %v3596_v48, 1 }
 0x479   :  { %v3507_v5 = vpop.permute.xlu1 %3506  ;;  %v3623_v45 = vrot.slane %v3542_v14, 4  ;;  %v3619_v16 = vrot.slane %v3618_v8, 2 }
 0x47a   :  { %v3606_v22 = vadd.f32 %v3605_v12, %v3539_v54  ;;  %v3540_v4 = vmul.f32 %v3507_v5, %v7515_v27  ;;  %v3522_v31 = vpop.permute.xlu0 %3521  ;;  %v3602_v10 = vadd.f32 %v3601_v25, %v3600_v26  ;;  %v3573_v26 = vrot.slane %v3572_v18, 1 }
 0x47b   :  { %v3624_v53 = vadd.f32 %v3623_v45, %v3542_v14  ;;  %v3543_v20 = vmul.f32 %v3522_v31, %v7516_v2  ;;  %v3620_v47 = vadd.f32 %v3619_v16, %v3618_v8  ;;  %v3585_v25 = vrot.slane %v3584_v23, 1 }
 0x47c   :  { %v3607_v34 = vrot.slane %v3606_v22, 2  ;;  %v3611_v55 = vrot.slane %v3540_v4, 4  ;;  %v3603_v13 = vrot.slane %v3602_v10, 1  ;;  %v3598_v3 = vadd.f32 %v3597_v61, %v3596_v48 }
 0x47d   :  { %v3487_v59 = vpop.permute.xlu1 %3486  ;;  %v3625_v7 = vrot.slane %v3624_v53, 2  ;;  %v3629_v21 = vrot.slane %v3543_v20, 4  ;;  %v3621_v36 = vrot.slane %v3620_v47, 1  ;;  %v3574_v33 = vadd.f32 %v3573_v26, %v3572_v18 }
 0x47e   :  { %v3608_v46 = vadd.f32 %v3607_v34, %v3606_v22  ;;  %v3612_v41 = vadd.f32 %v3611_v55, %v3540_v4  ;;  %v3536_v50 = vmul.f32 %v3487_v59, %v7517_v51  ;;  %v3527_v0 = vpop.permute.xlu0 %3526  ;;  %v3604_v14 = vadd.f32 %v3603_v13, %v3602_v10 }
 0x47f   :  { %v3626_v37 = vadd.f32 %v3625_v7, %v3624_v53  ;;  %v3630_v52 = vadd.f32 %v3629_v21, %v3543_v20  ;;  %v3544_v15 = vmul.f32 %v3527_v0, %v7518_v44  ;;  %v3622_v53 = vadd.f32 %v3621_v36, %v3620_v47 }
 0x480   :  { %v3613_v63 = vrot.slane %v3612_v41, 2  ;;  %v3587_v43 = vrot.slane %v3536_v50, 4  ;;  %v3609_v40 = vrot.slane %v3608_v46, 1  ;;  %v3580_v31 = vadd.f32 %v3579_v62, %v3578_v30 }
 0x481   :  { %v3631_v54 = vrot.slane %v3630_v52, 2  ;;  %v3635_v42 = vrot.slane %v3544_v15, 4  ;;  %v3627_v12 = vrot.slane %v3626_v37, 1  ;;  %v4402_v34 = vsel %vm4388_vm1, %v3604_v14, %v3598_v3 }
 0x482   :  { %v3614_v57 = vadd.f32 %v3613_v63, %v3612_v41  ;;  %v3588_v1 = vadd.f32 %v3587_v43, %v3536_v50  ;;  %v3610_v5 = vadd.f32 %v3609_v40, %v3608_v46  ;;  %v3586_v2 = vadd.f32 %v3585_v25, %v3584_v23 }
 0x483   :  { %v3632_v8 = vadd.f32 %v3631_v54, %v3630_v52  ;;  %v3636_v58 = vadd.f32 %v3635_v42, %v3544_v15  ;;  %v3628_v55 = vadd.f32 %v3627_v12, %v3626_v37  ;;  %v4393_v59 = vsel %vm4392_vm3, %v3568_v39, %v4391_v60 }
 0x484   :  { %v3615_v56 = vrot.slane %v3614_v57, 1  ;;  %v3589_v11 = vrot.slane %v3588_v1, 2  ;;  %v4403_v20 = vsel %vm4390_vm2, %v3610_v5, %v4402_v34  ;;  %v4395_v46 = vsel %vm4394_vm4, %v3574_v33, %v4393_v59 }
 0x485   :  { %v3633_v27 = vrot.slane %v3632_v8, 1  ;;  %v3637_v4 = vrot.slane %v3636_v58, 2  ;;  %v4397_v50 = vsel %vm4396_vm5, %v3580_v31, %v4395_v46 }
 0x486   :  { %v3590_v45 = vadd.f32 %v3589_v11, %v3588_v1  ;;  %v3616_v22 = vadd.f32 %v3615_v56, %v3614_v57  ;;  %v4399_v18 = vsel %vm4398_vm6, %v3586_v2, %v4397_v50 }
 0x487   :  { %v3638_v16 = vadd.f32 %v3637_v4, %v3636_v58  ;;  %v3634_v10 = vadd.f32 %v3633_v27, %v3632_v8 }
 0x488   :  { %v3591_v32 = vrot.slane %v3590_v45, 1  ;;  %v4404_v7 = vsel %vm4392_vm3, %v3616_v22, %v4403_v20 }
 0x489   :  { %v3639_v24 = vrot.slane %v3638_v16, 1  ;;  %v4405_v41 = vsel %vm4394_vm4, %v3622_v53, %v4404_v7 }
 0x48a   :  { %v3592_v9 = vadd.f32 %v3591_v32, %v3590_v45  ;;  %v4406_v28 = vsel %vm4396_vm5, %v3628_v55, %v4405_v41 }
 0x48b   :  { %v3640_v51 = vadd.f32 %v3639_v24, %v3638_v16  ;;  %v4407_v48 = vsel %vm4398_vm6, %v3634_v10, %v4406_v28 }
 0x48c   :  { %v4401_v21 = vsel %vm4400_vm7, %v3592_v9, %v4399_v18 }
 0x48d   :  { %v4408_v0 = vsel %vm4400_vm7, %v3640_v51, %v4407_v48 }
 0x48e   :  { %v4412_v6 = vpack.c.bf16 %v4408_v0, %v4401_v21 }
 0x490   :  { %4580 = vmatprep.mubr.bf16.mxu0 %v4412_v6 }
 0x491   :  { %4581 = vmatmul.mubr.bf16.vlgmr.msra.gmra.mxu0 %v4411_v35 }
 0x551   :  { %v5032_v30 = vpop.f32.mrf.mxu0 }
 0x553   :  { %v5033_v38 = vpop.f32.mrf.mxu0 }
 0x554   :  { %v5034_v63 = vadd.f32 %v5033_v38, %v5032_v30 }
 0x555   :  { %v5035_v43 = vpop.f32.mrf.mxu0 }
 0x556   :  { %v4583_v47 = vadd.f32 %v5034_v63, %v4847_v49 }
 0x557   :  { %v5036_v13 = vpop.f32.mrf.mxu0 }
 0x558   :  { %4589 = vst [vmem:[#allocation18] sm:$0xff] %v4583_v47  ;;  %v5037_v37 = vadd.f32 %v5036_v13, %v5035_v43 }
 0x55a   :  { %v4586_v52 = vadd.f32 %v5037_v37, %v4847_v49 }
 0x55c   :  { %4590 = vst [vmem:[#allocation18 + $0x8] sm:$0xff] %v4586_v52 }
 0x55d   :  { %5946 = shalt.err (!%p5943_p7)
}
 0x55e   :  { %4602 = dma.vmem_to_hbm [thread:$0]  %s4597_s17, 256, %s7461_s12, [#allocation5], %s5974_s5, %s5974_s5, %s5975_s28  }
 0x55f   :  { %5965 = dma.done.wait [#allocation5], 256  }
 0x560   :  { %5966 = vsyncadd [#allocation5], 4294967040 }
 0x561   :  { %4606 = vsyncpa [#allocation4], 1 }
 0x562   :  { %4607 = vsyncpa [#allocation7], 1 }
 0x563   :  { %4608 = vsyncpa [#allocation10], 1 }
 0x564   :  { %4609 = vsyncpa [#allocation13], 1 }
 0x565   :  { %4610 = vsyncpa [#allocation16], 1 }
 0x566   :  { %4611 = vsyncpa [#allocation5], 1 }

</bundles_post_ra>
